<compile_context>
chip_gen: v7x
topology: tpu7x:2x2x1
jax: 0.10.0
libtpu: 0.0.40
codegen_flags: <defaults>
</compile_context>

<pallas_src>
import math
import functools

import jax
import jax.numpy as jnp
from jax.experimental import pallas as pl
from jax.experimental.pallas import tpu as pltpu


def _round_up(x, m):
    return (x + m - 1) // m * m


def _slstm_kernel(num_layers, h_pad, t_blk, mm_dtype, *refs):
    HP = h_pad
    G = 4 * HP
    idx = 0
    w_out_ref = refs[idx]; idx += 1          # SMEM (T_pad,) f32
    pre0_ref = refs[idx]; idx += 1           # VMEM (t_blk, BB, G) f32 = x@W0+b0
    r_refs = [refs[idx]]; idx += 1           # layer-0 recurrent weights (HP, G)
    w_refs = [None]
    b_refs = [None]
    for _ in range(1, num_layers):
        w_refs.append(refs[idx])             # (HP, G) mm_dtype
        r_refs.append(refs[idx + 1])         # (HP, G) mm_dtype
        b_refs.append(refs[idx + 2])         # (1, G)  f32
        idx += 3
    w_lin_ref = refs[idx]; idx += 1          # (HP, 1) f32
    out_const_ref = refs[idx]; idx += 1      # (1, 1)  = b_lin*sum(w_out)+b_out
    out_ref = refs[idx]; idx += 1            # (BB, 1)
    h_st, c_st, n_st, m_st, acc_ref = refs[idx:idx + 5]; idx += 5
    if num_layers > 1:
        hs_buf = refs[idx]                   # (t_blk, BB, HP) f32
        proj_buf = refs[idx + 1]             # (t_blk, BB, G)  f32

    bb = pre0_ref.shape[1]
    tb = pl.program_id(1)                    # sequential time-block axis

    @pl.when(tb == 0)
    def _():
        h_st[...] = jnp.zeros_like(h_st)
        c_st[...] = jnp.zeros_like(c_st)
        n_st[...] = jnp.zeros_like(n_st)
        m_st[...] = jnp.zeros_like(m_st)
        acc_ref[...] = jnp.zeros_like(acc_ref)

    def cell(gates, c, n, m):
        i_t = gates[:, 0 * HP:1 * HP]
        f_t = gates[:, 1 * HP:2 * HP]
        o_t = gates[:, 2 * HP:3 * HP]
        z_t = gates[:, 3 * HP:4 * HP]
        # log(sigmoid(f)) == -softplus(-f): stable (no -inf), one exp + one log.
        log_f = jnp.minimum(f_t, 0.0) - jnp.log(1.0 + jnp.exp(-jnp.abs(f_t)))
        m_new = jnp.maximum(log_f + m, i_t)          # log(i_t) == i_tilda
        i_p = jnp.exp(i_t - m_new)
        f_p = jnp.exp(log_f + m - m_new)
        c_new = f_p * c + i_p * jnp.tanh(z_t)
        n_new = f_p * n + i_p
        # EUP approx reciprocal + one Newton step ~= exact division.
        r = pl.reciprocal(n_new, approx=True)
        r = r * (2.0 - n_new * r)
        h_new = jax.nn.sigmoid(o_t) * jnp.tanh(c_new * r)
        return h_new, c_new, n_new, m_new

    acc = None
    for l in range(num_layers):
        last_layer = l == num_layers - 1

        # Batched (whole time block) non-recurrent input projection for l>=1:
        # one MXU matmul with M = t_blk*BB.  Layer 0's projection was hoisted
        # to an XLA GEMM and streamed in as pre0_ref.
        if l > 0:
            hs = hs_buf[...].reshape(t_blk * bb, HP).astype(mm_dtype)
            proj = jnp.dot(hs, w_refs[l][...], preferred_element_type=jnp.float32)
            proj_buf[...] = (proj + b_refs[l][...]).reshape(t_blk, bb, G)

        # Block-carried state: one VMEM read here, one write after the loop.
        h = h_st[l]
        c = c_st[l]
        n = n_st[l]
        m = m_st[l]
        if last_layer:
            acc = acc_ref[...]

        for k in range(t_blk):
            pre = pre0_ref[k] if l == 0 else proj_buf[k]
            gates = pre + jnp.dot(h.astype(mm_dtype), r_refs[l][...],
                                  preferred_element_type=jnp.float32)
            h, c, n, m = cell(gates, c, n, m)
            if last_layer:
                # Folded output projection: scalar w_out[t] from SMEM, lane-
                # dense (BB, HP) FMA into the local accumulator.
                acc = acc + w_out_ref[tb * t_blk + k] * h
            else:
                hs_buf[k] = h                # input to the next layer's batched GEMM

        h_st[l] = h
        c_st[l] = c
        n_st[l] = n
        m_st[l] = m
        if last_layer:
            acc_ref[...] = acc

    @pl.when(tb == pl.num_programs(1) - 1)
    def _():
        # Single N=1 matmul at the very end; out_const = b_lin*sum(w_out)+b_out.
        out_ref[...] = (jnp.dot(acc, w_lin_ref[...],
                                preferred_element_type=jnp.float32)
                        + out_const_ref[...])


def slstm_forward(x, params, *, t_blk=8, batch_block=None, mm_dtype=jnp.bfloat16):
    """x: (batch, seq_len, input_size) f32 -> (batch, 1) f32.

    t_blk:       timesteps unrolled per grid step (16-32 recommended on
                 v5e/v6e where VMEM is plentiful).
    batch_block: rows per grid step on the 'parallel' batch axis; on v7x use
                 bp//2 (multiple of 8) so both TensorCores get work.
    mm_dtype:    MXU operand dtype for W/R and h (bf16 = single-pass MXU);
                 accumulation is always f32.
    """
    batch, seq_len, input_size = x.shape
    H = params["hidden_size"]
    layers = params["layers"]
    num_layers = len(layers)
    HP = _round_up(H, 128)          # lane-aligned per-gate width
    G = 4 * HP

    # ---- batch / time padding ------------------------------------------------
    pad_b = (-batch) % 8
    bp = batch + pad_b
    if batch_block is None:
        batch_block = bp            # v7x: set bp // 2 (multiple of 8) to use both TCs
    assert batch_block % 8 == 0 and bp % batch_block == 0
    n_bb = bp // batch_block

    t_blk = max(1, min(t_blk, seq_len))
    pad_t = (-seq_len) % t_blk
    tp = seq_len + pad_t
    n_tb = tp // t_blk

    # ---- pack weights into lane-aligned [i|f|o|z] blocks of HP lanes ---------
    def pack_gates(mats, rows, rows_pad):
        out = jnp.zeros((rows_pad, G), jnp.float32)
        for g, mat in enumerate(mats):                      # mat: (H, rows)
            out = out.at[:rows, g * HP:g * HP + H].set(mat.T)
        return out

    def pack_bias(bvecs):
        out = jnp.zeros((1, G), jnp.float32)
        for g, b in enumerate(bvecs):
            out = out.at[0, g * HP:g * HP + H].set(b)
        return out

    # Layer-0 input projection hoisted to one big XLA GEMM (full MXU efficiency,
    # fully parallel over batch*time); kernel streams lane-dense preactivations.
    w0 = pack_gates(layers[0]["w"], input_size, input_size)          # (in, G)
    b0 = pack_bias(layers[0]["b"])                                   # (1, G)
    preact0 = jnp.einsum("bti,ig->btg", x, w0) + b0                  # (B, T, G)
    preact0 = jnp.pad(preact0, ((0, pad_b), (0, pad_t), (0, 0)))
    preact0 = jnp.transpose(preact0, (1, 0, 2))                      # (tp, bp, G)

    # Padded timesteps come after all real ones and get w_out = 0, so they can
    # never affect the output.  Padded batch rows are benign wasted work.
    w_out_vec = jnp.pad(params["w_out"][0], (0, pad_t))              # (tp,)
    out_const = (params["b_lin"].reshape(1, 1) * jnp.sum(params["w_out"])
                 + params["b_out"].reshape(1, 1))                    # (1, 1)
    w_lin = jnp.zeros((HP, 1), jnp.float32).at[:H, 0].set(params["w_lin"][0])

    inputs = [w_out_vec, preact0]
    in_specs = [
        pl.BlockSpec(memory_space=pltpu.MemorySpace.SMEM),           # scalars
        pl.BlockSpec((t_blk, batch_block, G), lambda b, tb: (tb, b, 0)),
    ]

    def full_spec(arr):
        nd = arr.ndim
        # Grid-invariant weights.  (On VMEM-tight v7x configs, additionally
        # request single buffering for these constant-index blocks.)
        return pl.BlockSpec(arr.shape, lambda b, tb, _nd=nd: (0,) * _nd)

    for l in range(num_layers):
        r_cat = pack_gates(layers[l]["r"], H, HP).astype(mm_dtype)   # (HP, G)
        if l == 0:
            inputs += [r_cat]
            in_specs += [full_spec(r_cat)]
        else:
            w_cat = pack_gates(layers[l]["w"], H, HP).astype(mm_dtype)
            b_cat = pack_bias(layers[l]["b"])
            inputs += [w_cat, r_cat, b_cat]
            in_specs += [full_spec(w_cat), full_spec(r_cat), full_spec(b_cat)]
    inputs += [w_lin, out_const]
    in_specs += [full_spec(w_lin), full_spec(out_const)]

    scratch_shapes = [
        pltpu.VMEM((num_layers, batch_block, HP), jnp.float32),      # h
        pltpu.VMEM((num_layers, batch_block, HP), jnp.float32),      # c
        pltpu.VMEM((num_layers, batch_block, HP), jnp.float32),      # n
        pltpu.VMEM((num_layers, batch_block, HP), jnp.float32),      # m
        pltpu.VMEM((batch_block, HP), jnp.float32),                  # acc_h
    ]
    if num_layers > 1:
        scratch_shapes += [
            pltpu.VMEM((t_blk, batch_block, HP), jnp.float32),       # hs of layer l-1
            pltpu.VMEM((t_blk, batch_block, G), jnp.float32),        # batched proj
        ]

    # vmem limit from the actual footprint (double-buffered inputs + scratch).
    stream_block_bytes = t_blk * batch_block * G * 4
    weight_bytes = sum(int(a.size) * a.dtype.itemsize for a in inputs[2:])
    scratch_bytes = (4 * num_layers + 1) * batch_block * HP * 4
    if num_layers > 1:
        scratch_bytes += t_blk * batch_block * (HP + G) * 4
    vmem_limit = int(1.5 * (2 * stream_block_bytes + 2 * weight_bytes
                            + scratch_bytes)) + (4 << 20)
    vmem_limit = max(8 << 20, min(vmem_limit, 96 << 20))

    kernel = functools.partial(_slstm_kernel, num_layers, HP, t_blk, mm_dtype)

    out = pl.pallas_call(
        kernel,
        out_shape=jax.ShapeDtypeStruct((bp, 1), jnp.float32),
        grid_spec=pltpu.PrefetchScalarGridSpec(
            num_scalar_prefetch=0,
            grid=(n_bb, n_tb),
            in_specs=in_specs,
            out_specs=pl.BlockSpec((batch_block, 1), lambda b, tb: (b, 0)),
            scratch_shapes=scratch_shapes,
        ),
        compiler_params=pltpu.CompilerParams(
            dimension_semantics=("parallel", "arbitrary"),
            vmem_limit_bytes=vmem_limit,
        ),
    )(*inputs)
    return out[:batch]


def init_params(key, input_size, seq_len, hidden_size, num_layers):
    """Deterministic synthetic init matching the torch module's parameter shapes."""
    H = hidden_size
    keys = jax.random.split(key, num_layers * 8 + 4)
    ki = iter(keys)

    def xavier(k, shape):
        fan_out, fan_in = shape
        bound = math.sqrt(6.0 / (fan_in + fan_out))
        return jax.random.uniform(k, shape, jnp.float32, -bound, bound)

    def orthogonal(k, n):
        a = jax.random.normal(k, (n, n), jnp.float32)
        q, r = jnp.linalg.qr(a)
        return (q * jnp.sign(jnp.diag(r))[None, :]).astype(jnp.float32)

    layers = []
    for l in range(num_layers):
        in_dim = input_size if l == 0 else H
        w = tuple(xavier(next(ki), (H, in_dim)) for _ in range(4))   # w_i,w_f,w_o,w_z
        r = tuple(orthogonal(next(ki), H) for _ in range(4))         # r_i,r_f,r_o,r_z
        b = tuple(jnp.zeros((H,), jnp.float32) for _ in range(4))    # biases zero-init
        layers.append({"w": w, "r": r, "b": b})

    k1, k2, k3, k4 = (next(ki) for _ in range(4))
    bnd = 1.0 / math.sqrt(H)
    w_lin = jax.random.uniform(k1, (1, H), jnp.float32, -bnd, bnd)
    b_lin = jax.random.uniform(k2, (1,), jnp.float32, -bnd, bnd)
    bnd2 = 1.0 / math.sqrt(seq_len)
    w_out = jax.random.uniform(k3, (1, seq_len), jnp.float32, -bnd2, bnd2)
    b_out = jax.random.uniform(k4, (1,), jnp.float32, -bnd2, bnd2)

    return {"hidden_size": H, "layers": layers,
            "w_lin": w_lin, "b_lin": b_lin, "w_out": w_out, "b_out": b_out}


def slstm_ref(x, params):
    """Pure-JAX reference mirroring the torch forward exactly."""
    batch, seq_len, _ = x.shape
    H = params["hidden_size"]
    z0 = jnp.zeros((batch, H), jnp.float32)
    states = [(z0, z0, z0, z0) for _ in params["layers"]]
    hs = []
    for t in range(seq_len):
        x_t = x[:, t, :]
        new_states = []
        for l, layer in enumerate(params["layers"]):
            h_p, c_p, n_p, m_p = states[l]

            def gate(g):
                return x_t @ layer["w"][g].T + h_p @ layer["r"][g].T + layer["b"][g]

            i_t, f_t, o_t, z_t = gate(0), gate(1), gate(2), gate(3)
            log_f = jnp.log(jax.nn.sigmoid(f_t))
            m_t = jnp.maximum(log_f + m_p, i_t)
            i_pr = jnp.exp(i_t - m_t)
            f_pr = jnp.exp(log_f + m_p - m_t)
            c_t = f_pr * c_p + i_pr * jnp.tanh(z_t)
            n_t = f_pr * n_p + i_pr
            h_t = jax.nn.sigmoid(o_t) * jnp.tanh(c_t / n_t)
            new_states.append((h_t, c_t, n_t, m_t))
            x_t = h_t
        states = new_states
        hs.append(x_t)
    outs = jnp.stack(hs, axis=1)                                  # (B, T, H)
    s = (outs @ params["w_lin"].T + params["b_lin"])[..., 0]      # (B, T)
    return s @ params["w_out"].T + params["b_out"]                # (B, 1)


if __name__ == "__main__":
    batch, seq_len, input_size, hidden_size, num_layers = 2, 8, 4, 32, 2
    key = jax.random.PRNGKey(0)
    kx, kp = jax.random.split(key)
    x = jax.random.normal(kx, (batch, seq_len, input_size), jnp.float32)
    params = init_params(kp, input_size, seq_len, hidden_size, num_layers)

    out = jax.block_until_ready(slstm_forward(x, params))
    ref = slstm_ref(x, params)

    assert out.shape == (batch, 1)
    # bf16 MXU operands on the recurrent / input-projection matmuls introduce
    # O(1e-3..1e-2) absolute error over 8 steps x 2 layers; a structural bug
    # would miss by orders of magnitude.
    assert jnp.allclose(out, ref, rtol=2e-2, atol=2e-2), (out, ref)
    print("KERNEL_OK")
</pallas_src>

<mosaic_0001>
module attributes {stable_mosaic.version = 11 : i64} {
  func.func @_slstm_kernel(%arg0: i32, %arg1: i32, %arg2: memref<8xf32, #tpu.memory_space<smem>>, %arg3: memref<8x8x512xf32, #tpu.memory_space<vmem>>, %arg4: memref<128x512xbf16, #tpu.memory_space<vmem>>, %arg5: memref<128x512xbf16, #tpu.memory_space<vmem>>, %arg6: memref<128x512xbf16, #tpu.memory_space<vmem>>, %arg7: memref<1x512xf32, #tpu.memory_space<vmem>>, %arg8: memref<128x1xf32, #tpu.memory_space<vmem>>, %arg9: memref<1x1xf32, #tpu.memory_space<vmem>>, %arg10: memref<8x1xf32, #tpu.memory_space<vmem>>, %arg11: memref<2x8x128xf32, #tpu.memory_space<vmem>>, %arg12: memref<2x8x128xf32, #tpu.memory_space<vmem>>, %arg13: memref<2x8x128xf32, #tpu.memory_space<vmem>>, %arg14: memref<2x8x128xf32, #tpu.memory_space<vmem>>, %arg15: memref<8x128xf32, #tpu.memory_space<vmem>>, %arg16: memref<8x8x128xf32, #tpu.memory_space<vmem>>, %arg17: memref<8x8x512xf32, #tpu.memory_space<vmem>>) attributes {dimension_semantics = [#tpu.dimension_semantics<parallel>, #tpu.dimension_semantics<arbitrary>], iteration_bounds = array<i64: 1, 1>, scalar_prefetch = 0 : i64, scratch_operands = 7 : i64, tpu.core_type = #tpu.core_type<tc>, window_params = [{transform_indices = @transform_0, window_bounds = array<i64: 8>}, {transform_indices = @transform_1, window_bounds = array<i64: 8, 8, 512>}, {pipeline_mode = #tpu.pipeline_mode<synchronous>, transform_indices = @transform_2, window_bounds = array<i64: 128, 512>}, {pipeline_mode = #tpu.pipeline_mode<synchronous>, transform_indices = @transform_3, window_bounds = array<i64: 128, 512>}, {pipeline_mode = #tpu.pipeline_mode<synchronous>, transform_indices = @transform_4, window_bounds = array<i64: 128, 512>}, {pipeline_mode = #tpu.pipeline_mode<synchronous>, transform_indices = @transform_5, window_bounds = array<i64: 1, 512>}, {pipeline_mode = #tpu.pipeline_mode<synchronous>, transform_indices = @transform_6, window_bounds = array<i64: 128, 1>}, {pipeline_mode = #tpu.pipeline_mode<synchronous>, transform_indices = @transform_7, window_bounds = array<i64: 1, 1>}, {transform_indices = @transform_8, window_bounds = array<i64: 8, 1>}]} {
    %c0_i32 = arith.constant 0 : i32
    %0 = arith.cmpi eq, %arg1, %c0_i32 : i32
    %1 = arith.extui %0 : i1 to i32
    %c0_i32_0 = arith.constant 0 : i32
    %2 = arith.cmpi ne, %1, %c0_i32_0 : i32
    scf.if %2 {
      %cst_265 = arith.constant 0.000000e+00 : f32
      %874 = vector.broadcast %cst_265 : f32 to vector<2x8x128xf32>
      %c0_266 = arith.constant 0 : index
      %c0_267 = arith.constant 0 : index
      %c0_268 = arith.constant 0 : index
      %875 = vector.load %arg11[%c0_266, %c0_267, %c0_268] : memref<2x8x128xf32, #tpu.memory_space<vmem>>, vector<2x8x128xf32>
      tpu.vector_store %arg11[%c0_266, %c0_267, %c0_268], %874 {strides = array<i32>} : memref<2x8x128xf32, #tpu.memory_space<vmem>>, vector<2x8x128xf32>,
      %cst_269 = arith.constant 0.000000e+00 : f32
      %876 = vector.broadcast %cst_269 : f32 to vector<2x8x128xf32>
      %c0_270 = arith.constant 0 : index
      %c0_271 = arith.constant 0 : index
      %c0_272 = arith.constant 0 : index
      %877 = vector.load %arg12[%c0_270, %c0_271, %c0_272] : memref<2x8x128xf32, #tpu.memory_space<vmem>>, vector<2x8x128xf32>
      tpu.vector_store %arg12[%c0_270, %c0_271, %c0_272], %876 {strides = array<i32>} : memref<2x8x128xf32, #tpu.memory_space<vmem>>, vector<2x8x128xf32>,
      %cst_273 = arith.constant 0.000000e+00 : f32
      %878 = vector.broadcast %cst_273 : f32 to vector<2x8x128xf32>
      %c0_274 = arith.constant 0 : index
      %c0_275 = arith.constant 0 : index
      %c0_276 = arith.constant 0 : index
      %879 = vector.load %arg13[%c0_274, %c0_275, %c0_276] : memref<2x8x128xf32, #tpu.memory_space<vmem>>, vector<2x8x128xf32>
      tpu.vector_store %arg13[%c0_274, %c0_275, %c0_276], %878 {strides = array<i32>} : memref<2x8x128xf32, #tpu.memory_space<vmem>>, vector<2x8x128xf32>,
      %cst_277 = arith.constant 0.000000e+00 : f32
      %880 = vector.broadcast %cst_277 : f32 to vector<2x8x128xf32>
      %c0_278 = arith.constant 0 : index
      %c0_279 = arith.constant 0 : index
      %c0_280 = arith.constant 0 : index
      %881 = vector.load %arg14[%c0_278, %c0_279, %c0_280] : memref<2x8x128xf32, #tpu.memory_space<vmem>>, vector<2x8x128xf32>
      tpu.vector_store %arg14[%c0_278, %c0_279, %c0_280], %880 {strides = array<i32>} : memref<2x8x128xf32, #tpu.memory_space<vmem>>, vector<2x8x128xf32>,
      %cst_281 = arith.constant 0.000000e+00 : f32
      %882 = vector.broadcast %cst_281 : f32 to vector<8x128xf32>
      %c0_282 = arith.constant 0 : index
      %c0_283 = arith.constant 0 : index
      %883 = vector.load %arg15[%c0_282, %c0_283] : memref<8x128xf32, #tpu.memory_space<vmem>>, vector<8x128xf32>
      tpu.vector_store %arg15[%c0_282, %c0_283], %882 {strides = array<i32>} : memref<8x128xf32, #tpu.memory_space<vmem>>, vector<8x128xf32>,
    } else {
    }
    %c0 = arith.constant 0 : index
    %c0_1 = arith.constant 0 : index
    %c0_2 = arith.constant 0 : index
    %3 = vector.load %arg11[%c0, %c0_1, %c0_2] : memref<2x8x128xf32, #tpu.memory_space<vmem>>, vector<1x8x128xf32>
    %4 = vector.shape_cast %3 : vector<1x8x128xf32> to vector<8x128xf32>
    %c0_3 = arith.constant 0 : index
    %c0_4 = arith.constant 0 : index
    %c0_5 = arith.constant 0 : index
    %5 = vector.load %arg12[%c0_3, %c0_4, %c0_5] : memref<2x8x128xf32, #tpu.memory_space<vmem>>, vector<1x8x128xf32>
    %6 = vector.shape_cast %5 : vector<1x8x128xf32> to vector<8x128xf32>
    %c0_6 = arith.constant 0 : index
    %c0_7 = arith.constant 0 : index
    %c0_8 = arith.constant 0 : index
    %7 = vector.load %arg13[%c0_6, %c0_7, %c0_8] : memref<2x8x128xf32, #tpu.memory_space<vmem>>, vector<1x8x128xf32>
    %8 = vector.shape_cast %7 : vector<1x8x128xf32> to vector<8x128xf32>
    %c0_9 = arith.constant 0 : index
    %c0_10 = arith.constant 0 : index
    %c0_11 = arith.constant 0 : index
    %9 = vector.load %arg14[%c0_9, %c0_10, %c0_11] : memref<2x8x128xf32, #tpu.memory_space<vmem>>, vector<1x8x128xf32>
    %10 = vector.shape_cast %9 : vector<1x8x128xf32> to vector<8x128xf32>
    %c0_12 = arith.constant 0 : index
    %c0_13 = arith.constant 0 : index
    %c0_14 = arith.constant 0 : index
    %11 = vector.load %arg3[%c0_12, %c0_13, %c0_14] : memref<8x8x512xf32, #tpu.memory_space<vmem>>, vector<1x8x512xf32>
    %12 = vector.shape_cast %11 : vector<1x8x512xf32> to vector<8x512xf32>
    %13 = arith.truncf %4 : vector<8x128xf32> to vector<8x128xbf16>
    %c0_15 = arith.constant 0 : index
    %c0_16 = arith.constant 0 : index
    %14 = vector.load %arg4[%c0_15, %c0_16] : memref<128x512xbf16, #tpu.memory_space<vmem>>, vector<128x512xbf16>
    %cst = arith.constant dense<0.000000e+00> : vector<8x512xf32>
    %15 = tpu.matmul %13, %14, %cst {dimension_numbers = #tpu.dot_dimension_numbers<[1], [0], [0], [1], [0, 0, 1, 1], [], []>} : vector<8x128xbf16>, vector<128x512xbf16>, vector<8x512xf32> -> vector<8x512xf32>
    %16 = arith.addf %12, %15 : vector<8x512xf32>
    %17 = vector.extract_strided_slice %16 {offsets = [0, 0], sizes = [8, 128], strides = [1, 1]} : vector<8x512xf32> to vector<8x128xf32>
    %18 = vector.extract_strided_slice %16 {offsets = [0, 128], sizes = [8, 128], strides = [1, 1]} : vector<8x512xf32> to vector<8x128xf32>
    %19 = vector.extract_strided_slice %16 {offsets = [0, 256], sizes = [8, 128], strides = [1, 1]} : vector<8x512xf32> to vector<8x128xf32>
    %20 = vector.extract_strided_slice %16 {offsets = [0, 384], sizes = [8, 128], strides = [1, 1]} : vector<8x512xf32> to vector<8x128xf32>
    %cst_17 = arith.constant 0.000000e+00 : f32
    %21 = vector.broadcast %cst_17 : f32 to vector<8x128xf32>
    %22 = arith.minimumf %18, %21 : vector<8x128xf32>
    %23 = math.absf %18 : vector<8x128xf32>
    %cst_18 = arith.constant 0.000000e+00 : f32
    %24 = vector.broadcast %cst_18 : f32 to vector<8x128xf32>
    %25 = arith.subf %24, %23 : vector<8x128xf32>
    %26 = math.exp %25 : vector<8x128xf32>
    %cst_19 = arith.constant 1.000000e+00 : f32
    %27 = vector.broadcast %cst_19 : f32 to vector<8x128xf32>
    %28 = arith.addf %27, %26 : vector<8x128xf32>
    %29 = math.log %28 : vector<8x128xf32>
    %30 = arith.subf %22, %29 : vector<8x128xf32>
    %31 = arith.addf %30, %10 : vector<8x128xf32>
    %32 = arith.maximumf %31, %17 : vector<8x128xf32>
    %33 = arith.subf %17, %32 : vector<8x128xf32>
    %34 = math.exp %33 : vector<8x128xf32>
    %35 = arith.addf %30, %10 : vector<8x128xf32>
    %36 = arith.subf %35, %32 : vector<8x128xf32>
    %37 = math.exp %36 : vector<8x128xf32>
    %38 = arith.mulf %37, %6 : vector<8x128xf32>
    %39 = math.tanh %20 : vector<8x128xf32>
    %40 = arith.mulf %34, %39 : vector<8x128xf32>
    %41 = arith.addf %38, %40 : vector<8x128xf32>
    %42 = arith.mulf %37, %8 : vector<8x128xf32>
    %43 = arith.addf %42, %34 : vector<8x128xf32>
    %44 = tpu.reciprocal %43 {approx = true} : vector<8x128xf32> -> vector<8x128xf32>
    %45 = arith.mulf %43, %44 : vector<8x128xf32>
    %cst_20 = arith.constant 2.000000e+00 : f32
    %46 = vector.broadcast %cst_20 : f32 to vector<8x128xf32>
    %47 = arith.subf %46, %45 : vector<8x128xf32>
    %48 = arith.mulf %44, %47 : vector<8x128xf32>
    %49 = arith.negf %19 : vector<8x128xf32>
    %50 = math.exp %49 : vector<8x128xf32>
    %cst_21 = arith.constant 1.000000e+00 : f32
    %51 = vector.broadcast %cst_21 : f32 to vector<8x128xf32>
    %52 = arith.addf %51, %50 : vector<8x128xf32>
    %53 = arith.divf %51, %52 : vector<8x128xf32>
    %54 = arith.mulf %41, %48 : vector<8x128xf32>
    %55 = math.tanh %54 : vector<8x128xf32>
    %56 = arith.mulf %53, %55 : vector<8x128xf32>
    %c0_22 = arith.constant 0 : index
    %c0_23 = arith.constant 0 : index
    %c0_24 = arith.constant 0 : index
    %57 = vector.load %arg16[%c0_22, %c0_23, %c0_24] : memref<8x8x128xf32, #tpu.memory_space<vmem>>, vector<1x8x128xf32>
    %58 = vector.shape_cast %57 : vector<1x8x128xf32> to vector<8x128xf32>
    %59 = vector.shape_cast %56 : vector<8x128xf32> to vector<1x8x128xf32>
    tpu.vector_store %arg16[%c0_22, %c0_23, %c0_24], %59 {strides = array<i32>} : memref<8x8x128xf32, #tpu.memory_space<vmem>>, vector<1x8x128xf32>,
    %c1 = arith.constant 1 : index
    %c0_25 = arith.constant 0 : index
    %c0_26 = arith.constant 0 : index
    %60 = vector.load %arg3[%c1, %c0_25, %c0_26] : memref<8x8x512xf32, #tpu.memory_space<vmem>>, vector<1x8x512xf32>
    %61 = vector.shape_cast %60 : vector<1x8x512xf32> to vector<8x512xf32>
    %62 = arith.truncf %56 : vector<8x128xf32> to vector<8x128xbf16>
    %c0_27 = arith.constant 0 : index
    %c0_28 = arith.constant 0 : index
    %63 = vector.load %arg4[%c0_27, %c0_28] : memref<128x512xbf16, #tpu.memory_space<vmem>>, vector<128x512xbf16>
    %cst_29 = arith.constant dense<0.000000e+00> : vector<8x512xf32>
    %64 = tpu.matmul %62, %63, %cst_29 {dimension_numbers = #tpu.dot_dimension_numbers<[1], [0], [0], [1], [0, 0, 1, 1], [], []>} : vector<8x128xbf16>, vector<128x512xbf16>, vector<8x512xf32> -> vector<8x512xf32>
    %65 = arith.addf %61, %64 : vector<8x512xf32>
    %66 = vector.extract_strided_slice %65 {offsets = [0, 0], sizes = [8, 128], strides = [1, 1]} : vector<8x512xf32> to vector<8x128xf32>
    %67 = vector.extract_strided_slice %65 {offsets = [0, 128], sizes = [8, 128], strides = [1, 1]} : vector<8x512xf32> to vector<8x128xf32>
    %68 = vector.extract_strided_slice %65 {offsets = [0, 256], sizes = [8, 128], strides = [1, 1]} : vector<8x512xf32> to vector<8x128xf32>
    %69 = vector.extract_strided_slice %65 {offsets = [0, 384], sizes = [8, 128], strides = [1, 1]} : vector<8x512xf32> to vector<8x128xf32>
    %cst_30 = arith.constant 0.000000e+00 : f32
    %70 = vector.broadcast %cst_30 : f32 to vector<8x128xf32>
    %71 = arith.minimumf %67, %70 : vector<8x128xf32>
    %72 = math.absf %67 : vector<8x128xf32>
    %cst_31 = arith.constant 0.000000e+00 : f32
    %73 = vector.broadcast %cst_31 : f32 to vector<8x128xf32>
    %74 = arith.subf %73, %72 : vector<8x128xf32>
    %75 = math.exp %74 : vector<8x128xf32>
    %cst_32 = arith.constant 1.000000e+00 : f32
    %76 = vector.broadcast %cst_32 : f32 to vector<8x128xf32>
    %77 = arith.addf %76, %75 : vector<8x128xf32>
    %78 = math.log %77 : vector<8x128xf32>
    %79 = arith.subf %71, %78 : vector<8x128xf32>
    %80 = arith.addf %79, %32 : vector<8x128xf32>
    %81 = arith.maximumf %80, %66 : vector<8x128xf32>
    %82 = arith.subf %66, %81 : vector<8x128xf32>
    %83 = math.exp %82 : vector<8x128xf32>
    %84 = arith.addf %79, %32 : vector<8x128xf32>
    %85 = arith.subf %84, %81 : vector<8x128xf32>
    %86 = math.exp %85 : vector<8x128xf32>
    %87 = arith.mulf %86, %41 : vector<8x128xf32>
    %88 = math.tanh %69 : vector<8x128xf32>
    %89 = arith.mulf %83, %88 : vector<8x128xf32>
    %90 = arith.addf %87, %89 : vector<8x128xf32>
    %91 = arith.mulf %86, %43 : vector<8x128xf32>
    %92 = arith.addf %91, %83 : vector<8x128xf32>
    %93 = tpu.reciprocal %92 {approx = true} : vector<8x128xf32> -> vector<8x128xf32>
    %94 = arith.mulf %92, %93 : vector<8x128xf32>
    %cst_33 = arith.constant 2.000000e+00 : f32
    %95 = vector.broadcast %cst_33 : f32 to vector<8x128xf32>
    %96 = arith.subf %95, %94 : vector<8x128xf32>
    %97 = arith.mulf %93, %96 : vector<8x128xf32>
    %98 = arith.negf %68 : vector<8x128xf32>
    %99 = math.exp %98 : vector<8x128xf32>
    %cst_34 = arith.constant 1.000000e+00 : f32
    %100 = vector.broadcast %cst_34 : f32 to vector<8x128xf32>
    %101 = arith.addf %100, %99 : vector<8x128xf32>
    %102 = arith.divf %100, %101 : vector<8x128xf32>
    %103 = arith.mulf %90, %97 : vector<8x128xf32>
    %104 = math.tanh %103 : vector<8x128xf32>
    %105 = arith.mulf %102, %104 : vector<8x128xf32>
    %c1_35 = arith.constant 1 : index
    %c0_36 = arith.constant 0 : index
    %c0_37 = arith.constant 0 : index
    %106 = vector.load %arg16[%c1_35, %c0_36, %c0_37] : memref<8x8x128xf32, #tpu.memory_space<vmem>>, vector<1x8x128xf32>
    %107 = vector.shape_cast %106 : vector<1x8x128xf32> to vector<8x128xf32>
    %108 = vector.shape_cast %105 : vector<8x128xf32> to vector<1x8x128xf32>
    tpu.vector_store %arg16[%c1_35, %c0_36, %c0_37], %108 {strides = array<i32>} : memref<8x8x128xf32, #tpu.memory_space<vmem>>, vector<1x8x128xf32>,
    %c2 = arith.constant 2 : index
    %c0_38 = arith.constant 0 : index
    %c0_39 = arith.constant 0 : index
    %109 = vector.load %arg3[%c2, %c0_38, %c0_39] : memref<8x8x512xf32, #tpu.memory_space<vmem>>, vector<1x8x512xf32>
    %110 = vector.shape_cast %109 : vector<1x8x512xf32> to vector<8x512xf32>
    %111 = arith.truncf %105 : vector<8x128xf32> to vector<8x128xbf16>
    %c0_40 = arith.constant 0 : index
    %c0_41 = arith.constant 0 : index
    %112 = vector.load %arg4[%c0_40, %c0_41] : memref<128x512xbf16, #tpu.memory_space<vmem>>, vector<128x512xbf16>
    %cst_42 = arith.constant dense<0.000000e+00> : vector<8x512xf32>
    %113 = tpu.matmul %111, %112, %cst_42 {dimension_numbers = #tpu.dot_dimension_numbers<[1], [0], [0], [1], [0, 0, 1, 1], [], []>} : vector<8x128xbf16>, vector<128x512xbf16>, vector<8x512xf32> -> vector<8x512xf32>
    %114 = arith.addf %110, %113 : vector<8x512xf32>
    %115 = vector.extract_strided_slice %114 {offsets = [0, 0], sizes = [8, 128], strides = [1, 1]} : vector<8x512xf32> to vector<8x128xf32>
    %116 = vector.extract_strided_slice %114 {offsets = [0, 128], sizes = [8, 128], strides = [1, 1]} : vector<8x512xf32> to vector<8x128xf32>
    %117 = vector.extract_strided_slice %114 {offsets = [0, 256], sizes = [8, 128], strides = [1, 1]} : vector<8x512xf32> to vector<8x128xf32>
    %118 = vector.extract_strided_slice %114 {offsets = [0, 384], sizes = [8, 128], strides = [1, 1]} : vector<8x512xf32> to vector<8x128xf32>
    %cst_43 = arith.constant 0.000000e+00 : f32
    %119 = vector.broadcast %cst_43 : f32 to vector<8x128xf32>
    %120 = arith.minimumf %116, %119 : vector<8x128xf32>
    %121 = math.absf %116 : vector<8x128xf32>
    %cst_44 = arith.constant 0.000000e+00 : f32
    %122 = vector.broadcast %cst_44 : f32 to vector<8x128xf32>
    %123 = arith.subf %122, %121 : vector<8x128xf32>
    %124 = math.exp %123 : vector<8x128xf32>
    %cst_45 = arith.constant 1.000000e+00 : f32
    %125 = vector.broadcast %cst_45 : f32 to vector<8x128xf32>
    %126 = arith.addf %125, %124 : vector<8x128xf32>
    %127 = math.log %126 : vector<8x128xf32>
    %128 = arith.subf %120, %127 : vector<8x128xf32>
    %129 = arith.addf %128, %81 : vector<8x128xf32>
    %130 = arith.maximumf %129, %115 : vector<8x128xf32>
    %131 = arith.subf %115, %130 : vector<8x128xf32>
    %132 = math.exp %131 : vector<8x128xf32>
    %133 = arith.addf %128, %81 : vector<8x128xf32>
    %134 = arith.subf %133, %130 : vector<8x128xf32>
    %135 = math.exp %134 : vector<8x128xf32>
    %136 = arith.mulf %135, %90 : vector<8x128xf32>
    %137 = math.tanh %118 : vector<8x128xf32>
    %138 = arith.mulf %132, %137 : vector<8x128xf32>
    %139 = arith.addf %136, %138 : vector<8x128xf32>
    %140 = arith.mulf %135, %92 : vector<8x128xf32>
    %141 = arith.addf %140, %132 : vector<8x128xf32>
    %142 = tpu.reciprocal %141 {approx = true} : vector<8x128xf32> -> vector<8x128xf32>
    %143 = arith.mulf %141, %142 : vector<8x128xf32>
    %cst_46 = arith.constant 2.000000e+00 : f32
    %144 = vector.broadcast %cst_46 : f32 to vector<8x128xf32>
    %145 = arith.subf %144, %143 : vector<8x128xf32>
    %146 = arith.mulf %142, %145 : vector<8x128xf32>
    %147 = arith.negf %117 : vector<8x128xf32>
    %148 = math.exp %147 : vector<8x128xf32>
    %cst_47 = arith.constant 1.000000e+00 : f32
    %149 = vector.broadcast %cst_47 : f32 to vector<8x128xf32>
    %150 = arith.addf %149, %148 : vector<8x128xf32>
    %151 = arith.divf %149, %150 : vector<8x128xf32>
    %152 = arith.mulf %139, %146 : vector<8x128xf32>
    %153 = math.tanh %152 : vector<8x128xf32>
    %154 = arith.mulf %151, %153 : vector<8x128xf32>
    %c2_48 = arith.constant 2 : index
    %c0_49 = arith.constant 0 : index
    %c0_50 = arith.constant 0 : index
    %155 = vector.load %arg16[%c2_48, %c0_49, %c0_50] : memref<8x8x128xf32, #tpu.memory_space<vmem>>, vector<1x8x128xf32>
    %156 = vector.shape_cast %155 : vector<1x8x128xf32> to vector<8x128xf32>
    %157 = vector.shape_cast %154 : vector<8x128xf32> to vector<1x8x128xf32>
    tpu.vector_store %arg16[%c2_48, %c0_49, %c0_50], %157 {strides = array<i32>} : memref<8x8x128xf32, #tpu.memory_space<vmem>>, vector<1x8x128xf32>,
    %c3 = arith.constant 3 : index
    %c0_51 = arith.constant 0 : index
    %c0_52 = arith.constant 0 : index
    %158 = vector.load %arg3[%c3, %c0_51, %c0_52] : memref<8x8x512xf32, #tpu.memory_space<vmem>>, vector<1x8x512xf32>
    %159 = vector.shape_cast %158 : vector<1x8x512xf32> to vector<8x512xf32>
    %160 = arith.truncf %154 : vector<8x128xf32> to vector<8x128xbf16>
    %c0_53 = arith.constant 0 : index
    %c0_54 = arith.constant 0 : index
    %161 = vector.load %arg4[%c0_53, %c0_54] : memref<128x512xbf16, #tpu.memory_space<vmem>>, vector<128x512xbf16>
    %cst_55 = arith.constant dense<0.000000e+00> : vector<8x512xf32>
    %162 = tpu.matmul %160, %161, %cst_55 {dimension_numbers = #tpu.dot_dimension_numbers<[1], [0], [0], [1], [0, 0, 1, 1], [], []>} : vector<8x128xbf16>, vector<128x512xbf16>, vector<8x512xf32> -> vector<8x512xf32>
    %163 = arith.addf %159, %162 : vector<8x512xf32>
    %164 = vector.extract_strided_slice %163 {offsets = [0, 0], sizes = [8, 128], strides = [1, 1]} : vector<8x512xf32> to vector<8x128xf32>
    %165 = vector.extract_strided_slice %163 {offsets = [0, 128], sizes = [8, 128], strides = [1, 1]} : vector<8x512xf32> to vector<8x128xf32>
    %166 = vector.extract_strided_slice %163 {offsets = [0, 256], sizes = [8, 128], strides = [1, 1]} : vector<8x512xf32> to vector<8x128xf32>
    %167 = vector.extract_strided_slice %163 {offsets = [0, 384], sizes = [8, 128], strides = [1, 1]} : vector<8x512xf32> to vector<8x128xf32>
    %cst_56 = arith.constant 0.000000e+00 : f32
    %168 = vector.broadcast %cst_56 : f32 to vector<8x128xf32>
    %169 = arith.minimumf %165, %168 : vector<8x128xf32>
    %170 = math.absf %165 : vector<8x128xf32>
    %cst_57 = arith.constant 0.000000e+00 : f32
    %171 = vector.broadcast %cst_57 : f32 to vector<8x128xf32>
    %172 = arith.subf %171, %170 : vector<8x128xf32>
    %173 = math.exp %172 : vector<8x128xf32>
    %cst_58 = arith.constant 1.000000e+00 : f32
    %174 = vector.broadcast %cst_58 : f32 to vector<8x128xf32>
    %175 = arith.addf %174, %173 : vector<8x128xf32>
    %176 = math.log %175 : vector<8x128xf32>
    %177 = arith.subf %169, %176 : vector<8x128xf32>
    %178 = arith.addf %177, %130 : vector<8x128xf32>
    %179 = arith.maximumf %178, %164 : vector<8x128xf32>
    %180 = arith.subf %164, %179 : vector<8x128xf32>
    %181 = math.exp %180 : vector<8x128xf32>
    %182 = arith.addf %177, %130 : vector<8x128xf32>
    %183 = arith.subf %182, %179 : vector<8x128xf32>
    %184 = math.exp %183 : vector<8x128xf32>
    %185 = arith.mulf %184, %139 : vector<8x128xf32>
    %186 = math.tanh %167 : vector<8x128xf32>
    %187 = arith.mulf %181, %186 : vector<8x128xf32>
    %188 = arith.addf %185, %187 : vector<8x128xf32>
    %189 = arith.mulf %184, %141 : vector<8x128xf32>
    %190 = arith.addf %189, %181 : vector<8x128xf32>
    %191 = tpu.reciprocal %190 {approx = true} : vector<8x128xf32> -> vector<8x128xf32>
    %192 = arith.mulf %190, %191 : vector<8x128xf32>
    %cst_59 = arith.constant 2.000000e+00 : f32
    %193 = vector.broadcast %cst_59 : f32 to vector<8x128xf32>
    %194 = arith.subf %193, %192 : vector<8x128xf32>
    %195 = arith.mulf %191, %194 : vector<8x128xf32>
    %196 = arith.negf %166 : vector<8x128xf32>
    %197 = math.exp %196 : vector<8x128xf32>
    %cst_60 = arith.constant 1.000000e+00 : f32
    %198 = vector.broadcast %cst_60 : f32 to vector<8x128xf32>
    %199 = arith.addf %198, %197 : vector<8x128xf32>
    %200 = arith.divf %198, %199 : vector<8x128xf32>
    %201 = arith.mulf %188, %195 : vector<8x128xf32>
    %202 = math.tanh %201 : vector<8x128xf32>
    %203 = arith.mulf %200, %202 : vector<8x128xf32>
    %c3_61 = arith.constant 3 : index
    %c0_62 = arith.constant 0 : index
    %c0_63 = arith.constant 0 : index
    %204 = vector.load %arg16[%c3_61, %c0_62, %c0_63] : memref<8x8x128xf32, #tpu.memory_space<vmem>>, vector<1x8x128xf32>
    %205 = vector.shape_cast %204 : vector<1x8x128xf32> to vector<8x128xf32>
    %206 = vector.shape_cast %203 : vector<8x128xf32> to vector<1x8x128xf32>
    tpu.vector_store %arg16[%c3_61, %c0_62, %c0_63], %206 {strides = array<i32>} : memref<8x8x128xf32, #tpu.memory_space<vmem>>, vector<1x8x128xf32>,
    %c4 = arith.constant 4 : index
    %c0_64 = arith.constant 0 : index
    %c0_65 = arith.constant 0 : index
    %207 = vector.load %arg3[%c4, %c0_64, %c0_65] : memref<8x8x512xf32, #tpu.memory_space<vmem>>, vector<1x8x512xf32>
    %208 = vector.shape_cast %207 : vector<1x8x512xf32> to vector<8x512xf32>
    %209 = arith.truncf %203 : vector<8x128xf32> to vector<8x128xbf16>
    %c0_66 = arith.constant 0 : index
    %c0_67 = arith.constant 0 : index
    %210 = vector.load %arg4[%c0_66, %c0_67] : memref<128x512xbf16, #tpu.memory_space<vmem>>, vector<128x512xbf16>
    %cst_68 = arith.constant dense<0.000000e+00> : vector<8x512xf32>
    %211 = tpu.matmul %209, %210, %cst_68 {dimension_numbers = #tpu.dot_dimension_numbers<[1], [0], [0], [1], [0, 0, 1, 1], [], []>} : vector<8x128xbf16>, vector<128x512xbf16>, vector<8x512xf32> -> vector<8x512xf32>
    %212 = arith.addf %208, %211 : vector<8x512xf32>
    %213 = vector.extract_strided_slice %212 {offsets = [0, 0], sizes = [8, 128], strides = [1, 1]} : vector<8x512xf32> to vector<8x128xf32>
    %214 = vector.extract_strided_slice %212 {offsets = [0, 128], sizes = [8, 128], strides = [1, 1]} : vector<8x512xf32> to vector<8x128xf32>
    %215 = vector.extract_strided_slice %212 {offsets = [0, 256], sizes = [8, 128], strides = [1, 1]} : vector<8x512xf32> to vector<8x128xf32>
    %216 = vector.extract_strided_slice %212 {offsets = [0, 384], sizes = [8, 128], strides = [1, 1]} : vector<8x512xf32> to vector<8x128xf32>
    %cst_69 = arith.constant 0.000000e+00 : f32
    %217 = vector.broadcast %cst_69 : f32 to vector<8x128xf32>
    %218 = arith.minimumf %214, %217 : vector<8x128xf32>
    %219 = math.absf %214 : vector<8x128xf32>
    %cst_70 = arith.constant 0.000000e+00 : f32
    %220 = vector.broadcast %cst_70 : f32 to vector<8x128xf32>
    %221 = arith.subf %220, %219 : vector<8x128xf32>
    %222 = math.exp %221 : vector<8x128xf32>
    %cst_71 = arith.constant 1.000000e+00 : f32
    %223 = vector.broadcast %cst_71 : f32 to vector<8x128xf32>
    %224 = arith.addf %223, %222 : vector<8x128xf32>
    %225 = math.log %224 : vector<8x128xf32>
    %226 = arith.subf %218, %225 : vector<8x128xf32>
    %227 = arith.addf %226, %179 : vector<8x128xf32>
    %228 = arith.maximumf %227, %213 : vector<8x128xf32>
    %229 = arith.subf %213, %228 : vector<8x128xf32>
    %230 = math.exp %229 : vector<8x128xf32>
    %231 = arith.addf %226, %179 : vector<8x128xf32>
    %232 = arith.subf %231, %228 : vector<8x128xf32>
    %233 = math.exp %232 : vector<8x128xf32>
    %234 = arith.mulf %233, %188 : vector<8x128xf32>
    %235 = math.tanh %216 : vector<8x128xf32>
    %236 = arith.mulf %230, %235 : vector<8x128xf32>
    %237 = arith.addf %234, %236 : vector<8x128xf32>
    %238 = arith.mulf %233, %190 : vector<8x128xf32>
    %239 = arith.addf %238, %230 : vector<8x128xf32>
    %240 = tpu.reciprocal %239 {approx = true} : vector<8x128xf32> -> vector<8x128xf32>
    %241 = arith.mulf %239, %240 : vector<8x128xf32>
    %cst_72 = arith.constant 2.000000e+00 : f32
    %242 = vector.broadcast %cst_72 : f32 to vector<8x128xf32>
    %243 = arith.subf %242, %241 : vector<8x128xf32>
    %244 = arith.mulf %240, %243 : vector<8x128xf32>
    %245 = arith.negf %215 : vector<8x128xf32>
    %246 = math.exp %245 : vector<8x128xf32>
    %cst_73 = arith.constant 1.000000e+00 : f32
    %247 = vector.broadcast %cst_73 : f32 to vector<8x128xf32>
    %248 = arith.addf %247, %246 : vector<8x128xf32>
    %249 = arith.divf %247, %248 : vector<8x128xf32>
    %250 = arith.mulf %237, %244 : vector<8x128xf32>
    %251 = math.tanh %250 : vector<8x128xf32>
    %252 = arith.mulf %249, %251 : vector<8x128xf32>
    %c4_74 = arith.constant 4 : index
    %c0_75 = arith.constant 0 : index
    %c0_76 = arith.constant 0 : index
    %253 = vector.load %arg16[%c4_74, %c0_75, %c0_76] : memref<8x8x128xf32, #tpu.memory_space<vmem>>, vector<1x8x128xf32>
    %254 = vector.shape_cast %253 : vector<1x8x128xf32> to vector<8x128xf32>
    %255 = vector.shape_cast %252 : vector<8x128xf32> to vector<1x8x128xf32>
    tpu.vector_store %arg16[%c4_74, %c0_75, %c0_76], %255 {strides = array<i32>} : memref<8x8x128xf32, #tpu.memory_space<vmem>>, vector<1x8x128xf32>,
    %c5 = arith.constant 5 : index
    %c0_77 = arith.constant 0 : index
    %c0_78 = arith.constant 0 : index
    %256 = vector.load %arg3[%c5, %c0_77, %c0_78] : memref<8x8x512xf32, #tpu.memory_space<vmem>>, vector<1x8x512xf32>
    %257 = vector.shape_cast %256 : vector<1x8x512xf32> to vector<8x512xf32>
    %258 = arith.truncf %252 : vector<8x128xf32> to vector<8x128xbf16>
    %c0_79 = arith.constant 0 : index
    %c0_80 = arith.constant 0 : index
    %259 = vector.load %arg4[%c0_79, %c0_80] : memref<128x512xbf16, #tpu.memory_space<vmem>>, vector<128x512xbf16>
    %cst_81 = arith.constant dense<0.000000e+00> : vector<8x512xf32>
    %260 = tpu.matmul %258, %259, %cst_81 {dimension_numbers = #tpu.dot_dimension_numbers<[1], [0], [0], [1], [0, 0, 1, 1], [], []>} : vector<8x128xbf16>, vector<128x512xbf16>, vector<8x512xf32> -> vector<8x512xf32>
    %261 = arith.addf %257, %260 : vector<8x512xf32>
    %262 = vector.extract_strided_slice %261 {offsets = [0, 0], sizes = [8, 128], strides = [1, 1]} : vector<8x512xf32> to vector<8x128xf32>
    %263 = vector.extract_strided_slice %261 {offsets = [0, 128], sizes = [8, 128], strides = [1, 1]} : vector<8x512xf32> to vector<8x128xf32>
    %264 = vector.extract_strided_slice %261 {offsets = [0, 256], sizes = [8, 128], strides = [1, 1]} : vector<8x512xf32> to vector<8x128xf32>
    %265 = vector.extract_strided_slice %261 {offsets = [0, 384], sizes = [8, 128], strides = [1, 1]} : vector<8x512xf32> to vector<8x128xf32>
    %cst_82 = arith.constant 0.000000e+00 : f32
    %266 = vector.broadcast %cst_82 : f32 to vector<8x128xf32>
    %267 = arith.minimumf %263, %266 : vector<8x128xf32>
    %268 = math.absf %263 : vector<8x128xf32>
    %cst_83 = arith.constant 0.000000e+00 : f32
    %269 = vector.broadcast %cst_83 : f32 to vector<8x128xf32>
    %270 = arith.subf %269, %268 : vector<8x128xf32>
    %271 = math.exp %270 : vector<8x128xf32>
    %cst_84 = arith.constant 1.000000e+00 : f32
    %272 = vector.broadcast %cst_84 : f32 to vector<8x128xf32>
    %273 = arith.addf %272, %271 : vector<8x128xf32>
    %274 = math.log %273 : vector<8x128xf32>
    %275 = arith.subf %267, %274 : vector<8x128xf32>
    %276 = arith.addf %275, %228 : vector<8x128xf32>
    %277 = arith.maximumf %276, %262 : vector<8x128xf32>
    %278 = arith.subf %262, %277 : vector<8x128xf32>
    %279 = math.exp %278 : vector<8x128xf32>
    %280 = arith.addf %275, %228 : vector<8x128xf32>
    %281 = arith.subf %280, %277 : vector<8x128xf32>
    %282 = math.exp %281 : vector<8x128xf32>
    %283 = arith.mulf %282, %237 : vector<8x128xf32>
    %284 = math.tanh %265 : vector<8x128xf32>
    %285 = arith.mulf %279, %284 : vector<8x128xf32>
    %286 = arith.addf %283, %285 : vector<8x128xf32>
    %287 = arith.mulf %282, %239 : vector<8x128xf32>
    %288 = arith.addf %287, %279 : vector<8x128xf32>
    %289 = tpu.reciprocal %288 {approx = true} : vector<8x128xf32> -> vector<8x128xf32>
    %290 = arith.mulf %288, %289 : vector<8x128xf32>
    %cst_85 = arith.constant 2.000000e+00 : f32
    %291 = vector.broadcast %cst_85 : f32 to vector<8x128xf32>
    %292 = arith.subf %291, %290 : vector<8x128xf32>
    %293 = arith.mulf %289, %292 : vector<8x128xf32>
    %294 = arith.negf %264 : vector<8x128xf32>
    %295 = math.exp %294 : vector<8x128xf32>
    %cst_86 = arith.constant 1.000000e+00 : f32
    %296 = vector.broadcast %cst_86 : f32 to vector<8x128xf32>
    %297 = arith.addf %296, %295 : vector<8x128xf32>
    %298 = arith.divf %296, %297 : vector<8x128xf32>
    %299 = arith.mulf %286, %293 : vector<8x128xf32>
    %300 = math.tanh %299 : vector<8x128xf32>
    %301 = arith.mulf %298, %300 : vector<8x128xf32>
    %c5_87 = arith.constant 5 : index
    %c0_88 = arith.constant 0 : index
    %c0_89 = arith.constant 0 : index
    %302 = vector.load %arg16[%c5_87, %c0_88, %c0_89] : memref<8x8x128xf32, #tpu.memory_space<vmem>>, vector<1x8x128xf32>
    %303 = vector.shape_cast %302 : vector<1x8x128xf32> to vector<8x128xf32>
    %304 = vector.shape_cast %301 : vector<8x128xf32> to vector<1x8x128xf32>
    tpu.vector_store %arg16[%c5_87, %c0_88, %c0_89], %304 {strides = array<i32>} : memref<8x8x128xf32, #tpu.memory_space<vmem>>, vector<1x8x128xf32>,
    %c6 = arith.constant 6 : index
    %c0_90 = arith.constant 0 : index
    %c0_91 = arith.constant 0 : index
    %305 = vector.load %arg3[%c6, %c0_90, %c0_91] : memref<8x8x512xf32, #tpu.memory_space<vmem>>, vector<1x8x512xf32>
    %306 = vector.shape_cast %305 : vector<1x8x512xf32> to vector<8x512xf32>
    %307 = arith.truncf %301 : vector<8x128xf32> to vector<8x128xbf16>
    %c0_92 = arith.constant 0 : index
    %c0_93 = arith.constant 0 : index
    %308 = vector.load %arg4[%c0_92, %c0_93] : memref<128x512xbf16, #tpu.memory_space<vmem>>, vector<128x512xbf16>
    %cst_94 = arith.constant dense<0.000000e+00> : vector<8x512xf32>
    %309 = tpu.matmul %307, %308, %cst_94 {dimension_numbers = #tpu.dot_dimension_numbers<[1], [0], [0], [1], [0, 0, 1, 1], [], []>} : vector<8x128xbf16>, vector<128x512xbf16>, vector<8x512xf32> -> vector<8x512xf32>
    %310 = arith.addf %306, %309 : vector<8x512xf32>
    %311 = vector.extract_strided_slice %310 {offsets = [0, 0], sizes = [8, 128], strides = [1, 1]} : vector<8x512xf32> to vector<8x128xf32>
    %312 = vector.extract_strided_slice %310 {offsets = [0, 128], sizes = [8, 128], strides = [1, 1]} : vector<8x512xf32> to vector<8x128xf32>
    %313 = vector.extract_strided_slice %310 {offsets = [0, 256], sizes = [8, 128], strides = [1, 1]} : vector<8x512xf32> to vector<8x128xf32>
    %314 = vector.extract_strided_slice %310 {offsets = [0, 384], sizes = [8, 128], strides = [1, 1]} : vector<8x512xf32> to vector<8x128xf32>
    %cst_95 = arith.constant 0.000000e+00 : f32
    %315 = vector.broadcast %cst_95 : f32 to vector<8x128xf32>
    %316 = arith.minimumf %312, %315 : vector<8x128xf32>
    %317 = math.absf %312 : vector<8x128xf32>
    %cst_96 = arith.constant 0.000000e+00 : f32
    %318 = vector.broadcast %cst_96 : f32 to vector<8x128xf32>
    %319 = arith.subf %318, %317 : vector<8x128xf32>
    %320 = math.exp %319 : vector<8x128xf32>
    %cst_97 = arith.constant 1.000000e+00 : f32
    %321 = vector.broadcast %cst_97 : f32 to vector<8x128xf32>
    %322 = arith.addf %321, %320 : vector<8x128xf32>
    %323 = math.log %322 : vector<8x128xf32>
    %324 = arith.subf %316, %323 : vector<8x128xf32>
    %325 = arith.addf %324, %277 : vector<8x128xf32>
    %326 = arith.maximumf %325, %311 : vector<8x128xf32>
    %327 = arith.subf %311, %326 : vector<8x128xf32>
    %328 = math.exp %327 : vector<8x128xf32>
    %329 = arith.addf %324, %277 : vector<8x128xf32>
    %330 = arith.subf %329, %326 : vector<8x128xf32>
    %331 = math.exp %330 : vector<8x128xf32>
    %332 = arith.mulf %331, %286 : vector<8x128xf32>
    %333 = math.tanh %314 : vector<8x128xf32>
    %334 = arith.mulf %328, %333 : vector<8x128xf32>
    %335 = arith.addf %332, %334 : vector<8x128xf32>
    %336 = arith.mulf %331, %288 : vector<8x128xf32>
    %337 = arith.addf %336, %328 : vector<8x128xf32>
    %338 = tpu.reciprocal %337 {approx = true} : vector<8x128xf32> -> vector<8x128xf32>
    %339 = arith.mulf %337, %338 : vector<8x128xf32>
    %cst_98 = arith.constant 2.000000e+00 : f32
    %340 = vector.broadcast %cst_98 : f32 to vector<8x128xf32>
    %341 = arith.subf %340, %339 : vector<8x128xf32>
    %342 = arith.mulf %338, %341 : vector<8x128xf32>
    %343 = arith.negf %313 : vector<8x128xf32>
    %344 = math.exp %343 : vector<8x128xf32>
    %cst_99 = arith.constant 1.000000e+00 : f32
    %345 = vector.broadcast %cst_99 : f32 to vector<8x128xf32>
    %346 = arith.addf %345, %344 : vector<8x128xf32>
    %347 = arith.divf %345, %346 : vector<8x128xf32>
    %348 = arith.mulf %335, %342 : vector<8x128xf32>
    %349 = math.tanh %348 : vector<8x128xf32>
    %350 = arith.mulf %347, %349 : vector<8x128xf32>
    %c6_100 = arith.constant 6 : index
    %c0_101 = arith.constant 0 : index
    %c0_102 = arith.constant 0 : index
    %351 = vector.load %arg16[%c6_100, %c0_101, %c0_102] : memref<8x8x128xf32, #tpu.memory_space<vmem>>, vector<1x8x128xf32>
    %352 = vector.shape_cast %351 : vector<1x8x128xf32> to vector<8x128xf32>
    %353 = vector.shape_cast %350 : vector<8x128xf32> to vector<1x8x128xf32>
    tpu.vector_store %arg16[%c6_100, %c0_101, %c0_102], %353 {strides = array<i32>} : memref<8x8x128xf32, #tpu.memory_space<vmem>>, vector<1x8x128xf32>,
    %c7 = arith.constant 7 : index
    %c0_103 = arith.constant 0 : index
    %c0_104 = arith.constant 0 : index
    %354 = vector.load %arg3[%c7, %c0_103, %c0_104] : memref<8x8x512xf32, #tpu.memory_space<vmem>>, vector<1x8x512xf32>
    %355 = vector.shape_cast %354 : vector<1x8x512xf32> to vector<8x512xf32>
    %356 = arith.truncf %350 : vector<8x128xf32> to vector<8x128xbf16>
    %c0_105 = arith.constant 0 : index
    %c0_106 = arith.constant 0 : index
    %357 = vector.load %arg4[%c0_105, %c0_106] : memref<128x512xbf16, #tpu.memory_space<vmem>>, vector<128x512xbf16>
    %cst_107 = arith.constant dense<0.000000e+00> : vector<8x512xf32>
    %358 = tpu.matmul %356, %357, %cst_107 {dimension_numbers = #tpu.dot_dimension_numbers<[1], [0], [0], [1], [0, 0, 1, 1], [], []>} : vector<8x128xbf16>, vector<128x512xbf16>, vector<8x512xf32> -> vector<8x512xf32>
    %359 = arith.addf %355, %358 : vector<8x512xf32>
    %360 = vector.extract_strided_slice %359 {offsets = [0, 0], sizes = [8, 128], strides = [1, 1]} : vector<8x512xf32> to vector<8x128xf32>
    %361 = vector.extract_strided_slice %359 {offsets = [0, 128], sizes = [8, 128], strides = [1, 1]} : vector<8x512xf32> to vector<8x128xf32>
    %362 = vector.extract_strided_slice %359 {offsets = [0, 256], sizes = [8, 128], strides = [1, 1]} : vector<8x512xf32> to vector<8x128xf32>
    %363 = vector.extract_strided_slice %359 {offsets = [0, 384], sizes = [8, 128], strides = [1, 1]} : vector<8x512xf32> to vector<8x128xf32>
    %cst_108 = arith.constant 0.000000e+00 : f32
    %364 = vector.broadcast %cst_108 : f32 to vector<8x128xf32>
    %365 = arith.minimumf %361, %364 : vector<8x128xf32>
    %366 = math.absf %361 : vector<8x128xf32>
    %cst_109 = arith.constant 0.000000e+00 : f32
    %367 = vector.broadcast %cst_109 : f32 to vector<8x128xf32>
    %368 = arith.subf %367, %366 : vector<8x128xf32>
    %369 = math.exp %368 : vector<8x128xf32>
    %cst_110 = arith.constant 1.000000e+00 : f32
    %370 = vector.broadcast %cst_110 : f32 to vector<8x128xf32>
    %371 = arith.addf %370, %369 : vector<8x128xf32>
    %372 = math.log %371 : vector<8x128xf32>
    %373 = arith.subf %365, %372 : vector<8x128xf32>
    %374 = arith.addf %373, %326 : vector<8x128xf32>
    %375 = arith.maximumf %374, %360 : vector<8x128xf32>
    %376 = arith.subf %360, %375 : vector<8x128xf32>
    %377 = math.exp %376 : vector<8x128xf32>
    %378 = arith.addf %373, %326 : vector<8x128xf32>
    %379 = arith.subf %378, %375 : vector<8x128xf32>
    %380 = math.exp %379 : vector<8x128xf32>
    %381 = arith.mulf %380, %335 : vector<8x128xf32>
    %382 = math.tanh %363 : vector<8x128xf32>
    %383 = arith.mulf %377, %382 : vector<8x128xf32>
    %384 = arith.addf %381, %383 : vector<8x128xf32>
    %385 = arith.mulf %380, %337 : vector<8x128xf32>
    %386 = arith.addf %385, %377 : vector<8x128xf32>
    %387 = tpu.reciprocal %386 {approx = true} : vector<8x128xf32> -> vector<8x128xf32>
    %388 = arith.mulf %386, %387 : vector<8x128xf32>
    %cst_111 = arith.constant 2.000000e+00 : f32
    %389 = vector.broadcast %cst_111 : f32 to vector<8x128xf32>
    %390 = arith.subf %389, %388 : vector<8x128xf32>
    %391 = arith.mulf %387, %390 : vector<8x128xf32>
    %392 = arith.negf %362 : vector<8x128xf32>
    %393 = math.exp %392 : vector<8x128xf32>
    %cst_112 = arith.constant 1.000000e+00 : f32
    %394 = vector.broadcast %cst_112 : f32 to vector<8x128xf32>
    %395 = arith.addf %394, %393 : vector<8x128xf32>
    %396 = arith.divf %394, %395 : vector<8x128xf32>
    %397 = arith.mulf %384, %391 : vector<8x128xf32>
    %398 = math.tanh %397 : vector<8x128xf32>
    %399 = arith.mulf %396, %398 : vector<8x128xf32>
    %c7_113 = arith.constant 7 : index
    %c0_114 = arith.constant 0 : index
    %c0_115 = arith.constant 0 : index
    %400 = vector.load %arg16[%c7_113, %c0_114, %c0_115] : memref<8x8x128xf32, #tpu.memory_space<vmem>>, vector<1x8x128xf32>
    %401 = vector.shape_cast %400 : vector<1x8x128xf32> to vector<8x128xf32>
    %402 = vector.shape_cast %399 : vector<8x128xf32> to vector<1x8x128xf32>
    tpu.vector_store %arg16[%c7_113, %c0_114, %c0_115], %402 {strides = array<i32>} : memref<8x8x128xf32, #tpu.memory_space<vmem>>, vector<1x8x128xf32>,
    %c0_116 = arith.constant 0 : index
    %c0_117 = arith.constant 0 : index
    %c0_118 = arith.constant 0 : index
    %403 = vector.load %arg11[%c0_116, %c0_117, %c0_118] : memref<2x8x128xf32, #tpu.memory_space<vmem>>, vector<1x8x128xf32>
    %404 = vector.shape_cast %403 : vector<1x8x128xf32> to vector<8x128xf32>
    %405 = vector.shape_cast %399 : vector<8x128xf32> to vector<1x8x128xf32>
    tpu.vector_store %arg11[%c0_116, %c0_117, %c0_118], %405 {strides = array<i32>} : memref<2x8x128xf32, #tpu.memory_space<vmem>>, vector<1x8x128xf32>,
    %c0_119 = arith.constant 0 : index
    %c0_120 = arith.constant 0 : index
    %c0_121 = arith.constant 0 : index
    %406 = vector.load %arg12[%c0_119, %c0_120, %c0_121] : memref<2x8x128xf32, #tpu.memory_space<vmem>>, vector<1x8x128xf32>
    %407 = vector.shape_cast %406 : vector<1x8x128xf32> to vector<8x128xf32>
    %408 = vector.shape_cast %384 : vector<8x128xf32> to vector<1x8x128xf32>
    tpu.vector_store %arg12[%c0_119, %c0_120, %c0_121], %408 {strides = array<i32>} : memref<2x8x128xf32, #tpu.memory_space<vmem>>, vector<1x8x128xf32>,
    %c0_122 = arith.constant 0 : index
    %c0_123 = arith.constant 0 : index
    %c0_124 = arith.constant 0 : index
    %409 = vector.load %arg13[%c0_122, %c0_123, %c0_124] : memref<2x8x128xf32, #tpu.memory_space<vmem>>, vector<1x8x128xf32>
    %410 = vector.shape_cast %409 : vector<1x8x128xf32> to vector<8x128xf32>
    %411 = vector.shape_cast %386 : vector<8x128xf32> to vector<1x8x128xf32>
    tpu.vector_store %arg13[%c0_122, %c0_123, %c0_124], %411 {strides = array<i32>} : memref<2x8x128xf32, #tpu.memory_space<vmem>>, vector<1x8x128xf32>,
    %c0_125 = arith.constant 0 : index
    %c0_126 = arith.constant 0 : index
    %c0_127 = arith.constant 0 : index
    %412 = vector.load %arg14[%c0_125, %c0_126, %c0_127] : memref<2x8x128xf32, #tpu.memory_space<vmem>>, vector<1x8x128xf32>
    %413 = vector.shape_cast %412 : vector<1x8x128xf32> to vector<8x128xf32>
    %414 = vector.shape_cast %375 : vector<8x128xf32> to vector<1x8x128xf32>
    tpu.vector_store %arg14[%c0_125, %c0_126, %c0_127], %414 {strides = array<i32>} : memref<2x8x128xf32, #tpu.memory_space<vmem>>, vector<1x8x128xf32>,
    %c0_128 = arith.constant 0 : index
    %c0_129 = arith.constant 0 : index
    %c0_130 = arith.constant 0 : index
    %415 = vector.load %arg16[%c0_128, %c0_129, %c0_130] : memref<8x8x128xf32, #tpu.memory_space<vmem>>, vector<8x8x128xf32>
    %416 = vector.shape_cast %415 : vector<8x8x128xf32> to vector<64x128xf32>
    %417 = arith.truncf %416 : vector<64x128xf32> to vector<64x128xbf16>
    %c0_131 = arith.constant 0 : index
    %c0_132 = arith.constant 0 : index
    %418 = vector.load %arg5[%c0_131, %c0_132] : memref<128x512xbf16, #tpu.memory_space<vmem>>, vector<128x512xbf16>
    %cst_133 = arith.constant dense<0.000000e+00> : vector<64x512xf32>
    %419 = tpu.matmul %417, %418, %cst_133 {dimension_numbers = #tpu.dot_dimension_numbers<[1], [0], [0], [1], [0, 0, 1, 1], [], []>} : vector<64x128xbf16>, vector<128x512xbf16>, vector<64x512xf32> -> vector<64x512xf32>
    %c0_134 = arith.constant 0 : index
    %c0_135 = arith.constant 0 : index
    %420 = vector.load %arg7[%c0_134, %c0_135] : memref<1x512xf32, #tpu.memory_space<vmem>>, vector<1x512xf32>
    %421 = vector.broadcast %420 : vector<1x512xf32> to vector<64x512xf32>
    %422 = arith.addf %419, %421 : vector<64x512xf32>
    %423 = vector.shape_cast %422 : vector<64x512xf32> to vector<8x8x512xf32>
    %c0_136 = arith.constant 0 : index
    %c0_137 = arith.constant 0 : index
    %c0_138 = arith.constant 0 : index
    %424 = vector.load %arg17[%c0_136, %c0_137, %c0_138] : memref<8x8x512xf32, #tpu.memory_space<vmem>>, vector<8x8x512xf32>
    tpu.vector_store %arg17[%c0_136, %c0_137, %c0_138], %423 {strides = array<i32>} : memref<8x8x512xf32, #tpu.memory_space<vmem>>, vector<8x8x512xf32>,
    %c1_139 = arith.constant 1 : index
    %c0_140 = arith.constant 0 : index
    %c0_141 = arith.constant 0 : index
    %425 = vector.load %arg11[%c1_139, %c0_140, %c0_141] : memref<2x8x128xf32, #tpu.memory_space<vmem>>, vector<1x8x128xf32>
    %426 = vector.shape_cast %425 : vector<1x8x128xf32> to vector<8x128xf32>
    %c1_142 = arith.constant 1 : index
    %c0_143 = arith.constant 0 : index
    %c0_144 = arith.constant 0 : index
    %427 = vector.load %arg12[%c1_142, %c0_143, %c0_144] : memref<2x8x128xf32, #tpu.memory_space<vmem>>, vector<1x8x128xf32>
    %428 = vector.shape_cast %427 : vector<1x8x128xf32> to vector<8x128xf32>
    %c1_145 = arith.constant 1 : index
    %c0_146 = arith.constant 0 : index
    %c0_147 = arith.constant 0 : index
    %429 = vector.load %arg13[%c1_145, %c0_146, %c0_147] : memref<2x8x128xf32, #tpu.memory_space<vmem>>, vector<1x8x128xf32>
    %430 = vector.shape_cast %429 : vector<1x8x128xf32> to vector<8x128xf32>
    %c1_148 = arith.constant 1 : index
    %c0_149 = arith.constant 0 : index
    %c0_150 = arith.constant 0 : index
    %431 = vector.load %arg14[%c1_148, %c0_149, %c0_150] : memref<2x8x128xf32, #tpu.memory_space<vmem>>, vector<1x8x128xf32>
    %432 = vector.shape_cast %431 : vector<1x8x128xf32> to vector<8x128xf32>
    %c0_151 = arith.constant 0 : index
    %c0_152 = arith.constant 0 : index
    %433 = vector.load %arg15[%c0_151, %c0_152] : memref<8x128xf32, #tpu.memory_space<vmem>>, vector<8x128xf32>
    %c0_153 = arith.constant 0 : index
    %c0_154 = arith.constant 0 : index
    %c0_155 = arith.constant 0 : index
    %434 = vector.load %arg17[%c0_153, %c0_154, %c0_155] : memref<8x8x512xf32, #tpu.memory_space<vmem>>, vector<1x8x512xf32>
    %435 = vector.shape_cast %434 : vector<1x8x512xf32> to vector<8x512xf32>
    %436 = arith.truncf %426 : vector<8x128xf32> to vector<8x128xbf16>
    %c0_156 = arith.constant 0 : index
    %c0_157 = arith.constant 0 : index
    %437 = vector.load %arg6[%c0_156, %c0_157] : memref<128x512xbf16, #tpu.memory_space<vmem>>, vector<128x512xbf16>
    %cst_158 = arith.constant dense<0.000000e+00> : vector<8x512xf32>
    %438 = tpu.matmul %436, %437, %cst_158 {dimension_numbers = #tpu.dot_dimension_numbers<[1], [0], [0], [1], [0, 0, 1, 1], [], []>} : vector<8x128xbf16>, vector<128x512xbf16>, vector<8x512xf32> -> vector<8x512xf32>
    %439 = arith.addf %435, %438 : vector<8x512xf32>
    %440 = vector.extract_strided_slice %439 {offsets = [0, 0], sizes = [8, 128], strides = [1, 1]} : vector<8x512xf32> to vector<8x128xf32>
    %441 = vector.extract_strided_slice %439 {offsets = [0, 128], sizes = [8, 128], strides = [1, 1]} : vector<8x512xf32> to vector<8x128xf32>
    %442 = vector.extract_strided_slice %439 {offsets = [0, 256], sizes = [8, 128], strides = [1, 1]} : vector<8x512xf32> to vector<8x128xf32>
    %443 = vector.extract_strided_slice %439 {offsets = [0, 384], sizes = [8, 128], strides = [1, 1]} : vector<8x512xf32> to vector<8x128xf32>
    %cst_159 = arith.constant 0.000000e+00 : f32
    %444 = vector.broadcast %cst_159 : f32 to vector<8x128xf32>
    %445 = arith.minimumf %441, %444 : vector<8x128xf32>
    %446 = math.absf %441 : vector<8x128xf32>
    %cst_160 = arith.constant 0.000000e+00 : f32
    %447 = vector.broadcast %cst_160 : f32 to vector<8x128xf32>
    %448 = arith.subf %447, %446 : vector<8x128xf32>
    %449 = math.exp %448 : vector<8x128xf32>
    %cst_161 = arith.constant 1.000000e+00 : f32
    %450 = vector.broadcast %cst_161 : f32 to vector<8x128xf32>
    %451 = arith.addf %450, %449 : vector<8x128xf32>
    %452 = math.log %451 : vector<8x128xf32>
    %453 = arith.subf %445, %452 : vector<8x128xf32>
    %454 = arith.addf %453, %432 : vector<8x128xf32>
    %455 = arith.maximumf %454, %440 : vector<8x128xf32>
    %456 = arith.subf %440, %455 : vector<8x128xf32>
    %457 = math.exp %456 : vector<8x128xf32>
    %458 = arith.addf %453, %432 : vector<8x128xf32>
    %459 = arith.subf %458, %455 : vector<8x128xf32>
    %460 = math.exp %459 : vector<8x128xf32>
    %461 = arith.mulf %460, %428 : vector<8x128xf32>
    %462 = math.tanh %443 : vector<8x128xf32>
    %463 = arith.mulf %457, %462 : vector<8x128xf32>
    %464 = arith.addf %461, %463 : vector<8x128xf32>
    %465 = arith.mulf %460, %430 : vector<8x128xf32>
    %466 = arith.addf %465, %457 : vector<8x128xf32>
    %467 = tpu.reciprocal %466 {approx = true} : vector<8x128xf32> -> vector<8x128xf32>
    %468 = arith.mulf %466, %467 : vector<8x128xf32>
    %cst_162 = arith.constant 2.000000e+00 : f32
    %469 = vector.broadcast %cst_162 : f32 to vector<8x128xf32>
    %470 = arith.subf %469, %468 : vector<8x128xf32>
    %471 = arith.mulf %467, %470 : vector<8x128xf32>
    %472 = arith.negf %442 : vector<8x128xf32>
    %473 = math.exp %472 : vector<8x128xf32>
    %cst_163 = arith.constant 1.000000e+00 : f32
    %474 = vector.broadcast %cst_163 : f32 to vector<8x128xf32>
    %475 = arith.addf %474, %473 : vector<8x128xf32>
    %476 = arith.divf %474, %475 : vector<8x128xf32>
    %477 = arith.mulf %464, %471 : vector<8x128xf32>
    %478 = math.tanh %477 : vector<8x128xf32>
    %479 = arith.mulf %476, %478 : vector<8x128xf32>
    %c8_i32 = arith.constant 8 : i32
    %480 = arith.muli %arg1, %c8_i32 : i32
    %c0_i32_164 = arith.constant 0 : i32
    %481 = arith.addi %480, %c0_i32_164 : i32
    %482 = arith.index_cast %481 : i32 to index
    %483 = memref.load %arg2[%482] : memref<8xf32, #tpu.memory_space<smem>>
    %484 = vector.broadcast %483 : f32 to vector<8x128xf32>
    %485 = arith.mulf %484, %479 : vector<8x128xf32>
    %486 = arith.addf %433, %485 : vector<8x128xf32>
    %c1_165 = arith.constant 1 : index
    %c0_166 = arith.constant 0 : index
    %c0_167 = arith.constant 0 : index
    %487 = vector.load %arg17[%c1_165, %c0_166, %c0_167] : memref<8x8x512xf32, #tpu.memory_space<vmem>>, vector<1x8x512xf32>
    %488 = vector.shape_cast %487 : vector<1x8x512xf32> to vector<8x512xf32>
    %489 = arith.truncf %479 : vector<8x128xf32> to vector<8x128xbf16>
    %c0_168 = arith.constant 0 : index
    %c0_169 = arith.constant 0 : index
    %490 = vector.load %arg6[%c0_168, %c0_169] : memref<128x512xbf16, #tpu.memory_space<vmem>>, vector<128x512xbf16>
    %cst_170 = arith.constant dense<0.000000e+00> : vector<8x512xf32>
    %491 = tpu.matmul %489, %490, %cst_170 {dimension_numbers = #tpu.dot_dimension_numbers<[1], [0], [0], [1], [0, 0, 1, 1], [], []>} : vector<8x128xbf16>, vector<128x512xbf16>, vector<8x512xf32> -> vector<8x512xf32>
    %492 = arith.addf %488, %491 : vector<8x512xf32>
    %493 = vector.extract_strided_slice %492 {offsets = [0, 0], sizes = [8, 128], strides = [1, 1]} : vector<8x512xf32> to vector<8x128xf32>
    %494 = vector.extract_strided_slice %492 {offsets = [0, 128], sizes = [8, 128], strides = [1, 1]} : vector<8x512xf32> to vector<8x128xf32>
    %495 = vector.extract_strided_slice %492 {offsets = [0, 256], sizes = [8, 128], strides = [1, 1]} : vector<8x512xf32> to vector<8x128xf32>
    %496 = vector.extract_strided_slice %492 {offsets = [0, 384], sizes = [8, 128], strides = [1, 1]} : vector<8x512xf32> to vector<8x128xf32>
    %cst_171 = arith.constant 0.000000e+00 : f32
    %497 = vector.broadcast %cst_171 : f32 to vector<8x128xf32>
    %498 = arith.minimumf %494, %497 : vector<8x128xf32>
    %499 = math.absf %494 : vector<8x128xf32>
    %cst_172 = arith.constant 0.000000e+00 : f32
    %500 = vector.broadcast %cst_172 : f32 to vector<8x128xf32>
    %501 = arith.subf %500, %499 : vector<8x128xf32>
    %502 = math.exp %501 : vector<8x128xf32>
    %cst_173 = arith.constant 1.000000e+00 : f32
    %503 = vector.broadcast %cst_173 : f32 to vector<8x128xf32>
    %504 = arith.addf %503, %502 : vector<8x128xf32>
    %505 = math.log %504 : vector<8x128xf32>
    %506 = arith.subf %498, %505 : vector<8x128xf32>
    %507 = arith.addf %506, %455 : vector<8x128xf32>
    %508 = arith.maximumf %507, %493 : vector<8x128xf32>
    %509 = arith.subf %493, %508 : vector<8x128xf32>
    %510 = math.exp %509 : vector<8x128xf32>
    %511 = arith.addf %506, %455 : vector<8x128xf32>
    %512 = arith.subf %511, %508 : vector<8x128xf32>
    %513 = math.exp %512 : vector<8x128xf32>
    %514 = arith.mulf %513, %464 : vector<8x128xf32>
    %515 = math.tanh %496 : vector<8x128xf32>
    %516 = arith.mulf %510, %515 : vector<8x128xf32>
    %517 = arith.addf %514, %516 : vector<8x128xf32>
    %518 = arith.mulf %513, %466 : vector<8x128xf32>
    %519 = arith.addf %518, %510 : vector<8x128xf32>
    %520 = tpu.reciprocal %519 {approx = true} : vector<8x128xf32> -> vector<8x128xf32>
    %521 = arith.mulf %519, %520 : vector<8x128xf32>
    %cst_174 = arith.constant 2.000000e+00 : f32
    %522 = vector.broadcast %cst_174 : f32 to vector<8x128xf32>
    %523 = arith.subf %522, %521 : vector<8x128xf32>
    %524 = arith.mulf %520, %523 : vector<8x128xf32>
    %525 = arith.negf %495 : vector<8x128xf32>
    %526 = math.exp %525 : vector<8x128xf32>
    %cst_175 = arith.constant 1.000000e+00 : f32
    %527 = vector.broadcast %cst_175 : f32 to vector<8x128xf32>
    %528 = arith.addf %527, %526 : vector<8x128xf32>
    %529 = arith.divf %527, %528 : vector<8x128xf32>
    %530 = arith.mulf %517, %524 : vector<8x128xf32>
    %531 = math.tanh %530 : vector<8x128xf32>
    %532 = arith.mulf %529, %531 : vector<8x128xf32>
    %c8_i32_176 = arith.constant 8 : i32
    %533 = arith.muli %arg1, %c8_i32_176 : i32
    %c1_i32 = arith.constant 1 : i32
    %534 = arith.addi %533, %c1_i32 : i32
    %535 = arith.index_cast %534 : i32 to index
    %536 = memref.load %arg2[%535] : memref<8xf32, #tpu.memory_space<smem>>
    %537 = vector.broadcast %536 : f32 to vector<8x128xf32>
    %538 = arith.mulf %537, %532 : vector<8x128xf32>
    %539 = arith.addf %486, %538 : vector<8x128xf32>
    %c2_177 = arith.constant 2 : index
    %c0_178 = arith.constant 0 : index
    %c0_179 = arith.constant 0 : index
    %540 = vector.load %arg17[%c2_177, %c0_178, %c0_179] : memref<8x8x512xf32, #tpu.memory_space<vmem>>, vector<1x8x512xf32>
    %541 = vector.shape_cast %540 : vector<1x8x512xf32> to vector<8x512xf32>
    %542 = arith.truncf %532 : vector<8x128xf32> to vector<8x128xbf16>
    %c0_180 = arith.constant 0 : index
    %c0_181 = arith.constant 0 : index
    %543 = vector.load %arg6[%c0_180, %c0_181] : memref<128x512xbf16, #tpu.memory_space<vmem>>, vector<128x512xbf16>
    %cst_182 = arith.constant dense<0.000000e+00> : vector<8x512xf32>
    %544 = tpu.matmul %542, %543, %cst_182 {dimension_numbers = #tpu.dot_dimension_numbers<[1], [0], [0], [1], [0, 0, 1, 1], [], []>} : vector<8x128xbf16>, vector<128x512xbf16>, vector<8x512xf32> -> vector<8x512xf32>
    %545 = arith.addf %541, %544 : vector<8x512xf32>
    %546 = vector.extract_strided_slice %545 {offsets = [0, 0], sizes = [8, 128], strides = [1, 1]} : vector<8x512xf32> to vector<8x128xf32>
    %547 = vector.extract_strided_slice %545 {offsets = [0, 128], sizes = [8, 128], strides = [1, 1]} : vector<8x512xf32> to vector<8x128xf32>
    %548 = vector.extract_strided_slice %545 {offsets = [0, 256], sizes = [8, 128], strides = [1, 1]} : vector<8x512xf32> to vector<8x128xf32>
    %549 = vector.extract_strided_slice %545 {offsets = [0, 384], sizes = [8, 128], strides = [1, 1]} : vector<8x512xf32> to vector<8x128xf32>
    %cst_183 = arith.constant 0.000000e+00 : f32
    %550 = vector.broadcast %cst_183 : f32 to vector<8x128xf32>
    %551 = arith.minimumf %547, %550 : vector<8x128xf32>
    %552 = math.absf %547 : vector<8x128xf32>
    %cst_184 = arith.constant 0.000000e+00 : f32
    %553 = vector.broadcast %cst_184 : f32 to vector<8x128xf32>
    %554 = arith.subf %553, %552 : vector<8x128xf32>
    %555 = math.exp %554 : vector<8x128xf32>
    %cst_185 = arith.constant 1.000000e+00 : f32
    %556 = vector.broadcast %cst_185 : f32 to vector<8x128xf32>
    %557 = arith.addf %556, %555 : vector<8x128xf32>
    %558 = math.log %557 : vector<8x128xf32>
    %559 = arith.subf %551, %558 : vector<8x128xf32>
    %560 = arith.addf %559, %508 : vector<8x128xf32>
    %561 = arith.maximumf %560, %546 : vector<8x128xf32>
    %562 = arith.subf %546, %561 : vector<8x128xf32>
    %563 = math.exp %562 : vector<8x128xf32>
    %564 = arith.addf %559, %508 : vector<8x128xf32>
    %565 = arith.subf %564, %561 : vector<8x128xf32>
    %566 = math.exp %565 : vector<8x128xf32>
    %567 = arith.mulf %566, %517 : vector<8x128xf32>
    %568 = math.tanh %549 : vector<8x128xf32>
    %569 = arith.mulf %563, %568 : vector<8x128xf32>
    %570 = arith.addf %567, %569 : vector<8x128xf32>
    %571 = arith.mulf %566, %519 : vector<8x128xf32>
    %572 = arith.addf %571, %563 : vector<8x128xf32>
    %573 = tpu.reciprocal %572 {approx = true} : vector<8x128xf32> -> vector<8x128xf32>
    %574 = arith.mulf %572, %573 : vector<8x128xf32>
    %cst_186 = arith.constant 2.000000e+00 : f32
    %575 = vector.broadcast %cst_186 : f32 to vector<8x128xf32>
    %576 = arith.subf %575, %574 : vector<8x128xf32>
    %577 = arith.mulf %573, %576 : vector<8x128xf32>
    %578 = arith.negf %548 : vector<8x128xf32>
    %579 = math.exp %578 : vector<8x128xf32>
    %cst_187 = arith.constant 1.000000e+00 : f32
    %580 = vector.broadcast %cst_187 : f32 to vector<8x128xf32>
    %581 = arith.addf %580, %579 : vector<8x128xf32>
    %582 = arith.divf %580, %581 : vector<8x128xf32>
    %583 = arith.mulf %570, %577 : vector<8x128xf32>
    %584 = math.tanh %583 : vector<8x128xf32>
    %585 = arith.mulf %582, %584 : vector<8x128xf32>
    %c8_i32_188 = arith.constant 8 : i32
    %586 = arith.muli %arg1, %c8_i32_188 : i32
    %c2_i32 = arith.constant 2 : i32
    %587 = arith.addi %586, %c2_i32 : i32
    %588 = arith.index_cast %587 : i32 to index
    %589 = memref.load %arg2[%588] : memref<8xf32, #tpu.memory_space<smem>>
    %590 = vector.broadcast %589 : f32 to vector<8x128xf32>
    %591 = arith.mulf %590, %585 : vector<8x128xf32>
    %592 = arith.addf %539, %591 : vector<8x128xf32>
    %c3_189 = arith.constant 3 : index
    %c0_190 = arith.constant 0 : index
    %c0_191 = arith.constant 0 : index
    %593 = vector.load %arg17[%c3_189, %c0_190, %c0_191] : memref<8x8x512xf32, #tpu.memory_space<vmem>>, vector<1x8x512xf32>
    %594 = vector.shape_cast %593 : vector<1x8x512xf32> to vector<8x512xf32>
    %595 = arith.truncf %585 : vector<8x128xf32> to vector<8x128xbf16>
    %c0_192 = arith.constant 0 : index
    %c0_193 = arith.constant 0 : index
    %596 = vector.load %arg6[%c0_192, %c0_193] : memref<128x512xbf16, #tpu.memory_space<vmem>>, vector<128x512xbf16>
    %cst_194 = arith.constant dense<0.000000e+00> : vector<8x512xf32>
    %597 = tpu.matmul %595, %596, %cst_194 {dimension_numbers = #tpu.dot_dimension_numbers<[1], [0], [0], [1], [0, 0, 1, 1], [], []>} : vector<8x128xbf16>, vector<128x512xbf16>, vector<8x512xf32> -> vector<8x512xf32>
    %598 = arith.addf %594, %597 : vector<8x512xf32>
    %599 = vector.extract_strided_slice %598 {offsets = [0, 0], sizes = [8, 128], strides = [1, 1]} : vector<8x512xf32> to vector<8x128xf32>
    %600 = vector.extract_strided_slice %598 {offsets = [0, 128], sizes = [8, 128], strides = [1, 1]} : vector<8x512xf32> to vector<8x128xf32>
    %601 = vector.extract_strided_slice %598 {offsets = [0, 256], sizes = [8, 128], strides = [1, 1]} : vector<8x512xf32> to vector<8x128xf32>
    %602 = vector.extract_strided_slice %598 {offsets = [0, 384], sizes = [8, 128], strides = [1, 1]} : vector<8x512xf32> to vector<8x128xf32>
    %cst_195 = arith.constant 0.000000e+00 : f32
    %603 = vector.broadcast %cst_195 : f32 to vector<8x128xf32>
    %604 = arith.minimumf %600, %603 : vector<8x128xf32>
    %605 = math.absf %600 : vector<8x128xf32>
    %cst_196 = arith.constant 0.000000e+00 : f32
    %606 = vector.broadcast %cst_196 : f32 to vector<8x128xf32>
    %607 = arith.subf %606, %605 : vector<8x128xf32>
    %608 = math.exp %607 : vector<8x128xf32>
    %cst_197 = arith.constant 1.000000e+00 : f32
    %609 = vector.broadcast %cst_197 : f32 to vector<8x128xf32>
    %610 = arith.addf %609, %608 : vector<8x128xf32>
    %611 = math.log %610 : vector<8x128xf32>
    %612 = arith.subf %604, %611 : vector<8x128xf32>
    %613 = arith.addf %612, %561 : vector<8x128xf32>
    %614 = arith.maximumf %613, %599 : vector<8x128xf32>
    %615 = arith.subf %599, %614 : vector<8x128xf32>
    %616 = math.exp %615 : vector<8x128xf32>
    %617 = arith.addf %612, %561 : vector<8x128xf32>
    %618 = arith.subf %617, %614 : vector<8x128xf32>
    %619 = math.exp %618 : vector<8x128xf32>
    %620 = arith.mulf %619, %570 : vector<8x128xf32>
    %621 = math.tanh %602 : vector<8x128xf32>
    %622 = arith.mulf %616, %621 : vector<8x128xf32>
    %623 = arith.addf %620, %622 : vector<8x128xf32>
    %624 = arith.mulf %619, %572 : vector<8x128xf32>
    %625 = arith.addf %624, %616 : vector<8x128xf32>
    %626 = tpu.reciprocal %625 {approx = true} : vector<8x128xf32> -> vector<8x128xf32>
    %627 = arith.mulf %625, %626 : vector<8x128xf32>
    %cst_198 = arith.constant 2.000000e+00 : f32
    %628 = vector.broadcast %cst_198 : f32 to vector<8x128xf32>
    %629 = arith.subf %628, %627 : vector<8x128xf32>
    %630 = arith.mulf %626, %629 : vector<8x128xf32>
    %631 = arith.negf %601 : vector<8x128xf32>
    %632 = math.exp %631 : vector<8x128xf32>
    %cst_199 = arith.constant 1.000000e+00 : f32
    %633 = vector.broadcast %cst_199 : f32 to vector<8x128xf32>
    %634 = arith.addf %633, %632 : vector<8x128xf32>
    %635 = arith.divf %633, %634 : vector<8x128xf32>
    %636 = arith.mulf %623, %630 : vector<8x128xf32>
    %637 = math.tanh %636 : vector<8x128xf32>
    %638 = arith.mulf %635, %637 : vector<8x128xf32>
    %c8_i32_200 = arith.constant 8 : i32
    %639 = arith.muli %arg1, %c8_i32_200 : i32
    %c3_i32 = arith.constant 3 : i32
    %640 = arith.addi %639, %c3_i32 : i32
    %641 = arith.index_cast %640 : i32 to index
    %642 = memref.load %arg2[%641] : memref<8xf32, #tpu.memory_space<smem>>
    %643 = vector.broadcast %642 : f32 to vector<8x128xf32>
    %644 = arith.mulf %643, %638 : vector<8x128xf32>
    %645 = arith.addf %592, %644 : vector<8x128xf32>
    %c4_201 = arith.constant 4 : index
    %c0_202 = arith.constant 0 : index
    %c0_203 = arith.constant 0 : index
    %646 = vector.load %arg17[%c4_201, %c0_202, %c0_203] : memref<8x8x512xf32, #tpu.memory_space<vmem>>, vector<1x8x512xf32>
    %647 = vector.shape_cast %646 : vector<1x8x512xf32> to vector<8x512xf32>
    %648 = arith.truncf %638 : vector<8x128xf32> to vector<8x128xbf16>
    %c0_204 = arith.constant 0 : index
    %c0_205 = arith.constant 0 : index
    %649 = vector.load %arg6[%c0_204, %c0_205] : memref<128x512xbf16, #tpu.memory_space<vmem>>, vector<128x512xbf16>
    %cst_206 = arith.constant dense<0.000000e+00> : vector<8x512xf32>
    %650 = tpu.matmul %648, %649, %cst_206 {dimension_numbers = #tpu.dot_dimension_numbers<[1], [0], [0], [1], [0, 0, 1, 1], [], []>} : vector<8x128xbf16>, vector<128x512xbf16>, vector<8x512xf32> -> vector<8x512xf32>
    %651 = arith.addf %647, %650 : vector<8x512xf32>
    %652 = vector.extract_strided_slice %651 {offsets = [0, 0], sizes = [8, 128], strides = [1, 1]} : vector<8x512xf32> to vector<8x128xf32>
    %653 = vector.extract_strided_slice %651 {offsets = [0, 128], sizes = [8, 128], strides = [1, 1]} : vector<8x512xf32> to vector<8x128xf32>
    %654 = vector.extract_strided_slice %651 {offsets = [0, 256], sizes = [8, 128], strides = [1, 1]} : vector<8x512xf32> to vector<8x128xf32>
    %655 = vector.extract_strided_slice %651 {offsets = [0, 384], sizes = [8, 128], strides = [1, 1]} : vector<8x512xf32> to vector<8x128xf32>
    %cst_207 = arith.constant 0.000000e+00 : f32
    %656 = vector.broadcast %cst_207 : f32 to vector<8x128xf32>
    %657 = arith.minimumf %653, %656 : vector<8x128xf32>
    %658 = math.absf %653 : vector<8x128xf32>
    %cst_208 = arith.constant 0.000000e+00 : f32
    %659 = vector.broadcast %cst_208 : f32 to vector<8x128xf32>
    %660 = arith.subf %659, %658 : vector<8x128xf32>
    %661 = math.exp %660 : vector<8x128xf32>
    %cst_209 = arith.constant 1.000000e+00 : f32
    %662 = vector.broadcast %cst_209 : f32 to vector<8x128xf32>
    %663 = arith.addf %662, %661 : vector<8x128xf32>
    %664 = math.log %663 : vector<8x128xf32>
    %665 = arith.subf %657, %664 : vector<8x128xf32>
    %666 = arith.addf %665, %614 : vector<8x128xf32>
    %667 = arith.maximumf %666, %652 : vector<8x128xf32>
    %668 = arith.subf %652, %667 : vector<8x128xf32>
    %669 = math.exp %668 : vector<8x128xf32>
    %670 = arith.addf %665, %614 : vector<8x128xf32>
    %671 = arith.subf %670, %667 : vector<8x128xf32>
    %672 = math.exp %671 : vector<8x128xf32>
    %673 = arith.mulf %672, %623 : vector<8x128xf32>
    %674 = math.tanh %655 : vector<8x128xf32>
    %675 = arith.mulf %669, %674 : vector<8x128xf32>
    %676 = arith.addf %673, %675 : vector<8x128xf32>
    %677 = arith.mulf %672, %625 : vector<8x128xf32>
    %678 = arith.addf %677, %669 : vector<8x128xf32>
    %679 = tpu.reciprocal %678 {approx = true} : vector<8x128xf32> -> vector<8x128xf32>
    %680 = arith.mulf %678, %679 : vector<8x128xf32>
    %cst_210 = arith.constant 2.000000e+00 : f32
    %681 = vector.broadcast %cst_210 : f32 to vector<8x128xf32>
    %682 = arith.subf %681, %680 : vector<8x128xf32>
    %683 = arith.mulf %679, %682 : vector<8x128xf32>
    %684 = arith.negf %654 : vector<8x128xf32>
    %685 = math.exp %684 : vector<8x128xf32>
    %cst_211 = arith.constant 1.000000e+00 : f32
    %686 = vector.broadcast %cst_211 : f32 to vector<8x128xf32>
    %687 = arith.addf %686, %685 : vector<8x128xf32>
    %688 = arith.divf %686, %687 : vector<8x128xf32>
    %689 = arith.mulf %676, %683 : vector<8x128xf32>
    %690 = math.tanh %689 : vector<8x128xf32>
    %691 = arith.mulf %688, %690 : vector<8x128xf32>
    %c8_i32_212 = arith.constant 8 : i32
    %692 = arith.muli %arg1, %c8_i32_212 : i32
    %c4_i32 = arith.constant 4 : i32
    %693 = arith.addi %692, %c4_i32 : i32
    %694 = arith.index_cast %693 : i32 to index
    %695 = memref.load %arg2[%694] : memref<8xf32, #tpu.memory_space<smem>>
    %696 = vector.broadcast %695 : f32 to vector<8x128xf32>
    %697 = arith.mulf %696, %691 : vector<8x128xf32>
    %698 = arith.addf %645, %697 : vector<8x128xf32>
    %c5_213 = arith.constant 5 : index
    %c0_214 = arith.constant 0 : index
    %c0_215 = arith.constant 0 : index
    %699 = vector.load %arg17[%c5_213, %c0_214, %c0_215] : memref<8x8x512xf32, #tpu.memory_space<vmem>>, vector<1x8x512xf32>
    %700 = vector.shape_cast %699 : vector<1x8x512xf32> to vector<8x512xf32>
    %701 = arith.truncf %691 : vector<8x128xf32> to vector<8x128xbf16>
    %c0_216 = arith.constant 0 : index
    %c0_217 = arith.constant 0 : index
    %702 = vector.load %arg6[%c0_216, %c0_217] : memref<128x512xbf16, #tpu.memory_space<vmem>>, vector<128x512xbf16>
    %cst_218 = arith.constant dense<0.000000e+00> : vector<8x512xf32>
    %703 = tpu.matmul %701, %702, %cst_218 {dimension_numbers = #tpu.dot_dimension_numbers<[1], [0], [0], [1], [0, 0, 1, 1], [], []>} : vector<8x128xbf16>, vector<128x512xbf16>, vector<8x512xf32> -> vector<8x512xf32>
    %704 = arith.addf %700, %703 : vector<8x512xf32>
    %705 = vector.extract_strided_slice %704 {offsets = [0, 0], sizes = [8, 128], strides = [1, 1]} : vector<8x512xf32> to vector<8x128xf32>
    %706 = vector.extract_strided_slice %704 {offsets = [0, 128], sizes = [8, 128], strides = [1, 1]} : vector<8x512xf32> to vector<8x128xf32>
    %707 = vector.extract_strided_slice %704 {offsets = [0, 256], sizes = [8, 128], strides = [1, 1]} : vector<8x512xf32> to vector<8x128xf32>
    %708 = vector.extract_strided_slice %704 {offsets = [0, 384], sizes = [8, 128], strides = [1, 1]} : vector<8x512xf32> to vector<8x128xf32>
    %cst_219 = arith.constant 0.000000e+00 : f32
    %709 = vector.broadcast %cst_219 : f32 to vector<8x128xf32>
    %710 = arith.minimumf %706, %709 : vector<8x128xf32>
    %711 = math.absf %706 : vector<8x128xf32>
    %cst_220 = arith.constant 0.000000e+00 : f32
    %712 = vector.broadcast %cst_220 : f32 to vector<8x128xf32>
    %713 = arith.subf %712, %711 : vector<8x128xf32>
    %714 = math.exp %713 : vector<8x128xf32>
    %cst_221 = arith.constant 1.000000e+00 : f32
    %715 = vector.broadcast %cst_221 : f32 to vector<8x128xf32>
    %716 = arith.addf %715, %714 : vector<8x128xf32>
    %717 = math.log %716 : vector<8x128xf32>
    %718 = arith.subf %710, %717 : vector<8x128xf32>
    %719 = arith.addf %718, %667 : vector<8x128xf32>
    %720 = arith.maximumf %719, %705 : vector<8x128xf32>
    %721 = arith.subf %705, %720 : vector<8x128xf32>
    %722 = math.exp %721 : vector<8x128xf32>
    %723 = arith.addf %718, %667 : vector<8x128xf32>
    %724 = arith.subf %723, %720 : vector<8x128xf32>
    %725 = math.exp %724 : vector<8x128xf32>
    %726 = arith.mulf %725, %676 : vector<8x128xf32>
    %727 = math.tanh %708 : vector<8x128xf32>
    %728 = arith.mulf %722, %727 : vector<8x128xf32>
    %729 = arith.addf %726, %728 : vector<8x128xf32>
    %730 = arith.mulf %725, %678 : vector<8x128xf32>
    %731 = arith.addf %730, %722 : vector<8x128xf32>
    %732 = tpu.reciprocal %731 {approx = true} : vector<8x128xf32> -> vector<8x128xf32>
    %733 = arith.mulf %731, %732 : vector<8x128xf32>
    %cst_222 = arith.constant 2.000000e+00 : f32
    %734 = vector.broadcast %cst_222 : f32 to vector<8x128xf32>
    %735 = arith.subf %734, %733 : vector<8x128xf32>
    %736 = arith.mulf %732, %735 : vector<8x128xf32>
    %737 = arith.negf %707 : vector<8x128xf32>
    %738 = math.exp %737 : vector<8x128xf32>
    %cst_223 = arith.constant 1.000000e+00 : f32
    %739 = vector.broadcast %cst_223 : f32 to vector<8x128xf32>
    %740 = arith.addf %739, %738 : vector<8x128xf32>
    %741 = arith.divf %739, %740 : vector<8x128xf32>
    %742 = arith.mulf %729, %736 : vector<8x128xf32>
    %743 = math.tanh %742 : vector<8x128xf32>
    %744 = arith.mulf %741, %743 : vector<8x128xf32>
    %c8_i32_224 = arith.constant 8 : i32
    %745 = arith.muli %arg1, %c8_i32_224 : i32
    %c5_i32 = arith.constant 5 : i32
    %746 = arith.addi %745, %c5_i32 : i32
    %747 = arith.index_cast %746 : i32 to index
    %748 = memref.load %arg2[%747] : memref<8xf32, #tpu.memory_space<smem>>
    %749 = vector.broadcast %748 : f32 to vector<8x128xf32>
    %750 = arith.mulf %749, %744 : vector<8x128xf32>
    %751 = arith.addf %698, %750 : vector<8x128xf32>
    %c6_225 = arith.constant 6 : index
    %c0_226 = arith.constant 0 : index
    %c0_227 = arith.constant 0 : index
    %752 = vector.load %arg17[%c6_225, %c0_226, %c0_227] : memref<8x8x512xf32, #tpu.memory_space<vmem>>, vector<1x8x512xf32>
    %753 = vector.shape_cast %752 : vector<1x8x512xf32> to vector<8x512xf32>
    %754 = arith.truncf %744 : vector<8x128xf32> to vector<8x128xbf16>
    %c0_228 = arith.constant 0 : index
    %c0_229 = arith.constant 0 : index
    %755 = vector.load %arg6[%c0_228, %c0_229] : memref<128x512xbf16, #tpu.memory_space<vmem>>, vector<128x512xbf16>
    %cst_230 = arith.constant dense<0.000000e+00> : vector<8x512xf32>
    %756 = tpu.matmul %754, %755, %cst_230 {dimension_numbers = #tpu.dot_dimension_numbers<[1], [0], [0], [1], [0, 0, 1, 1], [], []>} : vector<8x128xbf16>, vector<128x512xbf16>, vector<8x512xf32> -> vector<8x512xf32>
    %757 = arith.addf %753, %756 : vector<8x512xf32>
    %758 = vector.extract_strided_slice %757 {offsets = [0, 0], sizes = [8, 128], strides = [1, 1]} : vector<8x512xf32> to vector<8x128xf32>
    %759 = vector.extract_strided_slice %757 {offsets = [0, 128], sizes = [8, 128], strides = [1, 1]} : vector<8x512xf32> to vector<8x128xf32>
    %760 = vector.extract_strided_slice %757 {offsets = [0, 256], sizes = [8, 128], strides = [1, 1]} : vector<8x512xf32> to vector<8x128xf32>
    %761 = vector.extract_strided_slice %757 {offsets = [0, 384], sizes = [8, 128], strides = [1, 1]} : vector<8x512xf32> to vector<8x128xf32>
    %cst_231 = arith.constant 0.000000e+00 : f32
    %762 = vector.broadcast %cst_231 : f32 to vector<8x128xf32>
    %763 = arith.minimumf %759, %762 : vector<8x128xf32>
    %764 = math.absf %759 : vector<8x128xf32>
    %cst_232 = arith.constant 0.000000e+00 : f32
    %765 = vector.broadcast %cst_232 : f32 to vector<8x128xf32>
    %766 = arith.subf %765, %764 : vector<8x128xf32>
    %767 = math.exp %766 : vector<8x128xf32>
    %cst_233 = arith.constant 1.000000e+00 : f32
    %768 = vector.broadcast %cst_233 : f32 to vector<8x128xf32>
    %769 = arith.addf %768, %767 : vector<8x128xf32>
    %770 = math.log %769 : vector<8x128xf32>
    %771 = arith.subf %763, %770 : vector<8x128xf32>
    %772 = arith.addf %771, %720 : vector<8x128xf32>
    %773 = arith.maximumf %772, %758 : vector<8x128xf32>
    %774 = arith.subf %758, %773 : vector<8x128xf32>
    %775 = math.exp %774 : vector<8x128xf32>
    %776 = arith.addf %771, %720 : vector<8x128xf32>
    %777 = arith.subf %776, %773 : vector<8x128xf32>
    %778 = math.exp %777 : vector<8x128xf32>
    %779 = arith.mulf %778, %729 : vector<8x128xf32>
    %780 = math.tanh %761 : vector<8x128xf32>
    %781 = arith.mulf %775, %780 : vector<8x128xf32>
    %782 = arith.addf %779, %781 : vector<8x128xf32>
    %783 = arith.mulf %778, %731 : vector<8x128xf32>
    %784 = arith.addf %783, %775 : vector<8x128xf32>
    %785 = tpu.reciprocal %784 {approx = true} : vector<8x128xf32> -> vector<8x128xf32>
    %786 = arith.mulf %784, %785 : vector<8x128xf32>
    %cst_234 = arith.constant 2.000000e+00 : f32
    %787 = vector.broadcast %cst_234 : f32 to vector<8x128xf32>
    %788 = arith.subf %787, %786 : vector<8x128xf32>
    %789 = arith.mulf %785, %788 : vector<8x128xf32>
    %790 = arith.negf %760 : vector<8x128xf32>
    %791 = math.exp %790 : vector<8x128xf32>
    %cst_235 = arith.constant 1.000000e+00 : f32
    %792 = vector.broadcast %cst_235 : f32 to vector<8x128xf32>
    %793 = arith.addf %792, %791 : vector<8x128xf32>
    %794 = arith.divf %792, %793 : vector<8x128xf32>
    %795 = arith.mulf %782, %789 : vector<8x128xf32>
    %796 = math.tanh %795 : vector<8x128xf32>
    %797 = arith.mulf %794, %796 : vector<8x128xf32>
    %c8_i32_236 = arith.constant 8 : i32
    %798 = arith.muli %arg1, %c8_i32_236 : i32
    %c6_i32 = arith.constant 6 : i32
    %799 = arith.addi %798, %c6_i32 : i32
    %800 = arith.index_cast %799 : i32 to index
    %801 = memref.load %arg2[%800] : memref<8xf32, #tpu.memory_space<smem>>
    %802 = vector.broadcast %801 : f32 to vector<8x128xf32>
    %803 = arith.mulf %802, %797 : vector<8x128xf32>
    %804 = arith.addf %751, %803 : vector<8x128xf32>
    %c7_237 = arith.constant 7 : index
    %c0_238 = arith.constant 0 : index
    %c0_239 = arith.constant 0 : index
    %805 = vector.load %arg17[%c7_237, %c0_238, %c0_239] : memref<8x8x512xf32, #tpu.memory_space<vmem>>, vector<1x8x512xf32>
    %806 = vector.shape_cast %805 : vector<1x8x512xf32> to vector<8x512xf32>
    %807 = arith.truncf %797 : vector<8x128xf32> to vector<8x128xbf16>
    %c0_240 = arith.constant 0 : index
    %c0_241 = arith.constant 0 : index
    %808 = vector.load %arg6[%c0_240, %c0_241] : memref<128x512xbf16, #tpu.memory_space<vmem>>, vector<128x512xbf16>
    %cst_242 = arith.constant dense<0.000000e+00> : vector<8x512xf32>
    %809 = tpu.matmul %807, %808, %cst_242 {dimension_numbers = #tpu.dot_dimension_numbers<[1], [0], [0], [1], [0, 0, 1, 1], [], []>} : vector<8x128xbf16>, vector<128x512xbf16>, vector<8x512xf32> -> vector<8x512xf32>
    %810 = arith.addf %806, %809 : vector<8x512xf32>
    %811 = vector.extract_strided_slice %810 {offsets = [0, 0], sizes = [8, 128], strides = [1, 1]} : vector<8x512xf32> to vector<8x128xf32>
    %812 = vector.extract_strided_slice %810 {offsets = [0, 128], sizes = [8, 128], strides = [1, 1]} : vector<8x512xf32> to vector<8x128xf32>
    %813 = vector.extract_strided_slice %810 {offsets = [0, 256], sizes = [8, 128], strides = [1, 1]} : vector<8x512xf32> to vector<8x128xf32>
    %814 = vector.extract_strided_slice %810 {offsets = [0, 384], sizes = [8, 128], strides = [1, 1]} : vector<8x512xf32> to vector<8x128xf32>
    %cst_243 = arith.constant 0.000000e+00 : f32
    %815 = vector.broadcast %cst_243 : f32 to vector<8x128xf32>
    %816 = arith.minimumf %812, %815 : vector<8x128xf32>
    %817 = math.absf %812 : vector<8x128xf32>
    %cst_244 = arith.constant 0.000000e+00 : f32
    %818 = vector.broadcast %cst_244 : f32 to vector<8x128xf32>
    %819 = arith.subf %818, %817 : vector<8x128xf32>
    %820 = math.exp %819 : vector<8x128xf32>
    %cst_245 = arith.constant 1.000000e+00 : f32
    %821 = vector.broadcast %cst_245 : f32 to vector<8x128xf32>
    %822 = arith.addf %821, %820 : vector<8x128xf32>
    %823 = math.log %822 : vector<8x128xf32>
    %824 = arith.subf %816, %823 : vector<8x128xf32>
    %825 = arith.addf %824, %773 : vector<8x128xf32>
    %826 = arith.maximumf %825, %811 : vector<8x128xf32>
    %827 = arith.subf %811, %826 : vector<8x128xf32>
    %828 = math.exp %827 : vector<8x128xf32>
    %829 = arith.addf %824, %773 : vector<8x128xf32>
    %830 = arith.subf %829, %826 : vector<8x128xf32>
    %831 = math.exp %830 : vector<8x128xf32>
    %832 = arith.mulf %831, %782 : vector<8x128xf32>
    %833 = math.tanh %814 : vector<8x128xf32>
    %834 = arith.mulf %828, %833 : vector<8x128xf32>
    %835 = arith.addf %832, %834 : vector<8x128xf32>
    %836 = arith.mulf %831, %784 : vector<8x128xf32>
    %837 = arith.addf %836, %828 : vector<8x128xf32>
    %838 = tpu.reciprocal %837 {approx = true} : vector<8x128xf32> -> vector<8x128xf32>
    %839 = arith.mulf %837, %838 : vector<8x128xf32>
    %cst_246 = arith.constant 2.000000e+00 : f32
    %840 = vector.broadcast %cst_246 : f32 to vector<8x128xf32>
    %841 = arith.subf %840, %839 : vector<8x128xf32>
    %842 = arith.mulf %838, %841 : vector<8x128xf32>
    %843 = arith.negf %813 : vector<8x128xf32>
    %844 = math.exp %843 : vector<8x128xf32>
    %cst_247 = arith.constant 1.000000e+00 : f32
    %845 = vector.broadcast %cst_247 : f32 to vector<8x128xf32>
    %846 = arith.addf %845, %844 : vector<8x128xf32>
    %847 = arith.divf %845, %846 : vector<8x128xf32>
    %848 = arith.mulf %835, %842 : vector<8x128xf32>
    %849 = math.tanh %848 : vector<8x128xf32>
    %850 = arith.mulf %847, %849 : vector<8x128xf32>
    %c8_i32_248 = arith.constant 8 : i32
    %851 = arith.muli %arg1, %c8_i32_248 : i32
    %c7_i32 = arith.constant 7 : i32
    %852 = arith.addi %851, %c7_i32 : i32
    %853 = arith.index_cast %852 : i32 to index
    %854 = memref.load %arg2[%853] : memref<8xf32, #tpu.memory_space<smem>>
    %855 = vector.broadcast %854 : f32 to vector<8x128xf32>
    %856 = arith.mulf %855, %850 : vector<8x128xf32>
    %857 = arith.addf %804, %856 : vector<8x128xf32>
    %c1_249 = arith.constant 1 : index
    %c0_250 = arith.constant 0 : index
    %c0_251 = arith.constant 0 : index
    %858 = vector.load %arg11[%c1_249, %c0_250, %c0_251] : memref<2x8x128xf32, #tpu.memory_space<vmem>>, vector<1x8x128xf32>
    %859 = vector.shape_cast %858 : vector<1x8x128xf32> to vector<8x128xf32>
    %860 = vector.shape_cast %850 : vector<8x128xf32> to vector<1x8x128xf32>
    tpu.vector_store %arg11[%c1_249, %c0_250, %c0_251], %860 {strides = array<i32>} : memref<2x8x128xf32, #tpu.memory_space<vmem>>, vector<1x8x128xf32>,
    %c1_252 = arith.constant 1 : index
    %c0_253 = arith.constant 0 : index
    %c0_254 = arith.constant 0 : index
    %861 = vector.load %arg12[%c1_252, %c0_253, %c0_254] : memref<2x8x128xf32, #tpu.memory_space<vmem>>, vector<1x8x128xf32>
    %862 = vector.shape_cast %861 : vector<1x8x128xf32> to vector<8x128xf32>
    %863 = vector.shape_cast %835 : vector<8x128xf32> to vector<1x8x128xf32>
    tpu.vector_store %arg12[%c1_252, %c0_253, %c0_254], %863 {strides = array<i32>} : memref<2x8x128xf32, #tpu.memory_space<vmem>>, vector<1x8x128xf32>,
    %c1_255 = arith.constant 1 : index
    %c0_256 = arith.constant 0 : index
    %c0_257 = arith.constant 0 : index
    %864 = vector.load %arg13[%c1_255, %c0_256, %c0_257] : memref<2x8x128xf32, #tpu.memory_space<vmem>>, vector<1x8x128xf32>
    %865 = vector.shape_cast %864 : vector<1x8x128xf32> to vector<8x128xf32>
    %866 = vector.shape_cast %837 : vector<8x128xf32> to vector<1x8x128xf32>
    tpu.vector_store %arg13[%c1_255, %c0_256, %c0_257], %866 {strides = array<i32>} : memref<2x8x128xf32, #tpu.memory_space<vmem>>, vector<1x8x128xf32>,
    %c1_258 = arith.constant 1 : index
    %c0_259 = arith.constant 0 : index
    %c0_260 = arith.constant 0 : index
    %867 = vector.load %arg14[%c1_258, %c0_259, %c0_260] : memref<2x8x128xf32, #tpu.memory_space<vmem>>, vector<1x8x128xf32>
    %868 = vector.shape_cast %867 : vector<1x8x128xf32> to vector<8x128xf32>
    %869 = vector.shape_cast %826 : vector<8x128xf32> to vector<1x8x128xf32>
    tpu.vector_store %arg14[%c1_258, %c0_259, %c0_260], %869 {strides = array<i32>} : memref<2x8x128xf32, #tpu.memory_space<vmem>>, vector<1x8x128xf32>,
    %c0_261 = arith.constant 0 : index
    %c0_262 = arith.constant 0 : index
    %870 = vector.load %arg15[%c0_261, %c0_262] : memref<8x128xf32, #tpu.memory_space<vmem>>, vector<8x128xf32>
    tpu.vector_store %arg15[%c0_261, %c0_262], %857 {strides = array<i32>} : memref<8x128xf32, #tpu.memory_space<vmem>>, vector<8x128xf32>,
    %c0_i32_263 = arith.constant 0 : i32
    %871 = arith.cmpi eq, %arg1, %c0_i32_263 : i32
    %872 = arith.extui %871 : i1 to i32
    %c0_i32_264 = arith.constant 0 : i32
    %873 = arith.cmpi ne, %872, %c0_i32_264 : i32
    scf.if %873 {
      %c0_265 = arith.constant 0 : index
      %c0_266 = arith.constant 0 : index
      %874 = vector.load %arg8[%c0_265, %c0_266] : memref<128x1xf32, #tpu.memory_space<vmem>>, vector<128x1xf32>
      %cst_267 = arith.constant dense<0.000000e+00> : vector<8x1xf32>
      %875 = tpu.matmul %857, %874, %cst_267 {dimension_numbers = #tpu.dot_dimension_numbers<[1], [0], [0], [1], [0, 0, 1, 1], [], []>} : vector<8x128xf32>, vector<128x1xf32>, vector<8x1xf32> -> vector<8x1xf32>
      %c0_268 = arith.constant 0 : index
      %c0_269 = arith.constant 0 : index
      %876 = vector.load %arg9[%c0_268, %c0_269] : memref<1x1xf32, #tpu.memory_space<vmem>>, vector<1x1xf32>
      %877 = vector.broadcast %876 : vector<1x1xf32> to vector<8x1xf32>
      %878 = arith.addf %875, %877 : vector<8x1xf32>
      %c0_270 = arith.constant 0 : index
      %c0_271 = arith.constant 0 : index
      %879 = vector.load %arg10[%c0_270, %c0_271] : memref<8x1xf32, #tpu.memory_space<vmem>>, vector<8x1xf32>
      tpu.vector_store %arg10[%c0_270, %c0_271], %878 {strides = array<i32>} : memref<8x1xf32, #tpu.memory_space<vmem>>, vector<8x1xf32>,
    } else {
    }
    return
  }
  func.func @transform_0(%arg0: i32, %arg1: i32) -> i32 {
    %c0_i32 = arith.constant 0 : i32
    %c0_i32_0 = arith.constant 0 : i32
    return %c0_i32 : i32
  }
  func.func @transform_1(%arg0: i32, %arg1: i32) -> (i32, i32, i32) {
    %c0_i32 = arith.constant 0 : i32
    %c0_i32_0 = arith.constant 0 : i32
    return %arg1, %arg0, %c0_i32 : i32, i32, i32
  }
  func.func @transform_2(%arg0: i32, %arg1: i32) -> (i32, i32) {
    %c0_i32 = arith.constant 0 : i32
    %c0_i32_0 = arith.constant 0 : i32
    %c0_i32_1 = arith.constant 0 : i32
    return %c0_i32, %c0_i32_0 : i32, i32
  }
  func.func @transform_3(%arg0: i32, %arg1: i32) -> (i32, i32) {
    %c0_i32 = arith.constant 0 : i32
    %c0_i32_0 = arith.constant 0 : i32
    %c0_i32_1 = arith.constant 0 : i32
    return %c0_i32, %c0_i32_0 : i32, i32
  }
  func.func @transform_4(%arg0: i32, %arg1: i32) -> (i32, i32) {
    %c0_i32 = arith.constant 0 : i32
    %c0_i32_0 = arith.constant 0 : i32
    %c0_i32_1 = arith.constant 0 : i32
    return %c0_i32, %c0_i32_0 : i32, i32
  }
  func.func @transform_5(%arg0: i32, %arg1: i32) -> (i32, i32) {
    %c0_i32 = arith.constant 0 : i32
    %c0_i32_0 = arith.constant 0 : i32
    %c0_i32_1 = arith.constant 0 : i32
    return %c0_i32, %c0_i32_0 : i32, i32
  }
  func.func @transform_6(%arg0: i32, %arg1: i32) -> (i32, i32) {
    %c0_i32 = arith.constant 0 : i32
    %c0_i32_0 = arith.constant 0 : i32
    %c0_i32_1 = arith.constant 0 : i32
    return %c0_i32, %c0_i32_0 : i32, i32
  }
  func.func @transform_7(%arg0: i32, %arg1: i32) -> (i32, i32) {
    %c0_i32 = arith.constant 0 : i32
    %c0_i32_0 = arith.constant 0 : i32
    %c0_i32_1 = arith.constant 0 : i32
    return %c0_i32, %c0_i32_0 : i32, i32
  }
  func.func @transform_8(%arg0: i32, %arg1: i32) -> (i32, i32) {
    %c0_i32 = arith.constant 0 : i32
    %c0_i32_0 = arith.constant 0 : i32
    return %arg0, %c0_i32 : i32, i32
  }
}

</mosaic_0001>

<bundles_post_ra>
// kernel: tpu_custom_call.1
= control target key start
LH: loop header
LB: loop body
LE: loop exit
PB: predicated region body
PF: predicated region fallthrough
CT: control target
= control target key end

     0   :  { %s6912_s0 = inlined_call_operand.vmem [shape: f32[8], index: 0, kind: input, shape index: {}]   ;;  %s6913_s1 = inlined_call_operand.hbm [shape: f32[8,8,512], index: 1, kind: input, shape index: {}]   ;;  %s6914_s2 = inlined_call_operand.hbm [shape: bf16[128,512], index: 2, kind: input, shape index: {}]   ;;  %s6915_s3 = inlined_call_operand.hbm [shape: bf16[128,512], index: 3, kind: input, shape index: {}]   ;;  %s6916_s4 = inlined_call_operand.hbm [shape: bf16[128,512], index: 4, kind: input, shape index: {}]   ;;  %s6917_s5 = inlined_call_operand.vmem [shape: f32[1,512], index: 5, kind: input, shape index: {}]   ;;  %s6918_s6 = inlined_call_operand.vmem [shape: f32[128,1], index: 6, kind: input, shape index: {}]   ;;  %s6919_s7 = inlined_call_operand.<no memory space> [shape: f32[1,1], index: 7, kind: input, shape index: {}]   ;;  %s6920_s8 = inlined_call_operand.vmem [shape: f32[8,1], index: 8, kind: output, shape index: {}]  }
   0x1   :  { %v13_v0 = vstv %s6919_s7 }
   0x2   :  { %14 = vst [vmem:[#allocation9] sm:$0x1] %v13_v0 }
   0x3   :  { %15 = vsyncpa [#allocation12], 0 }
   0x4   :  { %16 = vsyncpa [#allocation11], 0 }
   0x5   :  { %17 = vsyncpa [#allocation15], 0 }
   0x6   :  { %18 = vsyncpa [#allocation18], 0  ;;  %s5527_s29 = smov [#allocation14]   ;;  %s25_s11 = sshll.u32 %s6912_s0, 4  ;;  %s26_s11 = int_to_ptr.vmem [resolvable:$true] %s25_s11 }
   0x7   :  { %s46_s30 = sshll.u32 %s5527_s29, 4  ;;  %s5419_s14 = scalar_lea.hbm %s6914_s2, 4096  ;;  %s47_s30 = int_to_ptr.vmem [resolvable:$true] %s46_s30 }
   0x8   :  { %p5420_p0 = scmp.ne.s32.totalorder %s6914_s2, %s5419_s14  ;;  %p5423_p1 = scmp.lt.u32.totalorder %s5419_s14, %s6914_s2 }
   0xa   :  { %p5425_p2 = pnand %p5423_p1, %p5420_p0 }
   0xc   :  { %5428 = shalt.err (!%p5425_p2)
}
   0xd   :  { %s5429_s18 = scalar_lea.vmem %s47_s30, 4096  ;;  %p5434_p4 = scmp.lt.s32.totalorder %s47_s30, %s47_s30 }
   0xe   :  { %p5430_p3 = scmp.ne.s32.totalorder %s47_s30, %s5429_s18  ;;  %p5435_p5 = scmp.lt.s32.totalorder %s5429_s18, %s5429_s18 }
  0x10   :  { %p5436_p6 = por %p5435_p5, %p5434_p4 }
  0x12   :  { %p5437_p7 = pnand %p5436_p6, %p5430_p3 }
  0x14   :  { %5440 = shalt.err (!%p5437_p7)
}
  0x15   :  { %s5528_s0 = smov 256   ;;  %s5529_s19 = smov 16  }
  0x16   :  { %52 = dma.hbm_to_vmem [thread:$0]  %s6914_s2, 4096, %s47_s30, [#allocation15], %s5528_s0, %s5528_s0, %s5529_s19  }
  0x17   :  { %s5441_s22 = scalar_lea.vmem %s26_s11, 16  ;;  %p5446_p9 = scmp.lt.s32.totalorder %s26_s11, %s26_s11 }
  0x18   :  { %p5442_p8 = scmp.ne.s32.totalorder %s26_s11, %s5441_s22  ;;  %p5447_p10 = scmp.lt.s32.totalorder %s5441_s22, %s5441_s22 }
  0x1a   :  { %p5448_p11 = por %p5447_p10, %p5446_p9 }
  0x1c   :  { %p5449_p12 = pnand %p5448_p11, %p5442_p8 }
  0x1e   :  { %5452 = shalt.err (!%p5449_p12)
}
  0x1f   :  { %s5530_s23 = smov [#allocation10]   ;;  %s5531_s24 = smov [#allocation13]  }
  0x20   :  { %28 = dma.vmem_to_smem %s26_s11, 16, %s5530_s23, [#allocation12]  }
  0x21   :  { %s34_s25 = sshll.u32 %s5531_s24, 4  ;;  %s5453_s28 = scalar_lea.hbm %s6913_s1, 4096  ;;  %s35_s25 = int_to_ptr.vmem [resolvable:$true] %s34_s25 }
  0x22   :  { %p5454_p13 = scmp.ne.s32.totalorder %s6913_s1, %s5453_s28  ;;  %p5457_p0 = scmp.lt.u32.totalorder %s5453_s28, %s6913_s1 }
  0x24   :  { %p5459_p1 = pnand %p5457_p0, %p5454_p13 }
  0x26   :  { %5462 = shalt.err (!%p5459_p1)
}
  0x27   :  { %s5463_s10 = scalar_lea.vmem %s35_s25, 4096  ;;  %p5468_p3 = scmp.lt.s32.totalorder %s35_s25, %s35_s25 }
  0x28   :  { %p5464_p2 = scmp.ne.s32.totalorder %s35_s25, %s5463_s10  ;;  %p5469_p4 = scmp.lt.s32.totalorder %s5463_s10, %s5463_s10 }
  0x2a   :  { %p5470_p5 = por %p5469_p4, %p5468_p3 }
  0x2c   :  { %p5471_p6 = pnand %p5470_p5, %p5464_p2 }
  0x2e   :  { %5474 = shalt.err (!%p5471_p6)
}
  0x2f   :  { %s5532_s11 = smov 512   ;;  %s5533_s12 = smov 32  }
  0x30   :  { %40 = dma.hbm_to_vmem [thread:$0]  %s6913_s1, 4096, %s35_s25, [#allocation11], %s5532_s11, %s5532_s11, %s5533_s12  }
  0x31   :  { %s5534_s15 = smov [#allocation16]   ;;  %s5535_s7 = smov [#allocation17]  }
  0x32   :  { %s58_s16 = sshll.u32 %s5534_s15, 4  ;;  %s70_s17 = sshll.u32 %s5535_s7, 4  ;;  %s59_s16 = int_to_ptr.vmem [resolvable:$true] %s58_s16  ;;  %s71_s17 = int_to_ptr.vmem [resolvable:$true] %s70_s17 }
  0x33   :  { %s5475_s21 = scalar_lea.hbm %s6915_s3, 4096 }
  0x34   :  { %p5476_p7 = scmp.ne.s32.totalorder %s6915_s3, %s5475_s21  ;;  %p5479_p8 = scmp.lt.u32.totalorder %s5475_s21, %s6915_s3 }
  0x36   :  { %p5481_p9 = pnand %p5479_p8, %p5476_p7 }
  0x38   :  { %5484 = shalt.err (!%p5481_p9)
}
  0x39   :  { %s5485_s1 = scalar_lea.vmem %s59_s16, 4096  ;;  %p5490_p11 = scmp.lt.s32.totalorder %s59_s16, %s59_s16 }
  0x3a   :  { %p5486_p10 = scmp.ne.s32.totalorder %s59_s16, %s5485_s1  ;;  %p5491_p12 = scmp.lt.s32.totalorder %s5485_s1, %s5485_s1 }
  0x3c   :  { %p5492_p13 = por %p5491_p12, %p5490_p11 }
  0x3e   :  { %p5493_p0 = pnand %p5492_p13, %p5486_p10 }
  0x40   :  { %5496 = shalt.err (!%p5493_p0)
}
  0x41   :  { %64 = dma.hbm_to_vmem [thread:$0]  %s6915_s3, 4096, %s59_s16, [#allocation15], %s5528_s0, %s5528_s0, %s5529_s19  }
  0x42   :  { %s5497_s9 = scalar_lea.hbm %s6916_s4, 4096 }
  0x43   :  { %p5498_p1 = scmp.ne.s32.totalorder %s6916_s4, %s5497_s9  ;;  %p5501_p2 = scmp.lt.u32.totalorder %s5497_s9, %s6916_s4 }
  0x45   :  { %p5503_p3 = pnand %p5501_p2, %p5498_p1 }
  0x47   :  { %5506 = shalt.err (!%p5503_p3)
}
  0x48   :  { %s5507_s12 = scalar_lea.vmem %s71_s17, 4096  ;;  %p5512_p5 = scmp.lt.s32.totalorder %s71_s17, %s71_s17 }
  0x49   :  { %p5508_p4 = scmp.ne.s32.totalorder %s71_s17, %s5507_s12  ;;  %p5513_p6 = scmp.lt.s32.totalorder %s5507_s12, %s5507_s12 }
  0x4b   :  { %p5514_p7 = por %p5513_p6, %p5512_p5 }
  0x4d   :  { %p5515_p8 = pnand %p5514_p7, %p5508_p4 }
  0x4f   :  { %5518 = shalt.err (!%p5515_p8)
}
  0x50   :  { %76 = dma.hbm_to_vmem [thread:$0]  %s6916_s4, 4096, %s71_s17, [#allocation18], %s5528_s0, %s5528_s0, %s5529_s19  }
  0x51   :  { %5519 = dma.done.wait [#allocation12], 16  }
  0x52   :  { %5520 = vsyncadd [#allocation12], 4294967280 }
  0x53   :  { %5521 = dma.done.wait [#allocation11], 4096  }
  0x54   :  { %5522 = vsyncadd [#allocation11], 4294963200 }
  0x55   :  { %5523 = dma.done.wait [#allocation15], 8192  }
  0x56   :  { %5524 = vsyncadd [#allocation15], 4294959104 }
  0x57   :  { %5525 = dma.done.wait [#allocation18], 4096  }
  0x58   :  { %5526 = vsyncadd [#allocation18], 4294963200 }
  0x59   :  { %98 = sfence }
  0x5a   :  { %v5648_v1 = vld [vmem:[#allocation14 + $0x4] ss:$16 sps:$4 sm:$0xff]   ;;  %v5650_v2 = vld [vmem:[#allocation14] ss:$16 sps:$4 sm:$0xff]   ;;  %v6923_v3 = vmov 0   ;;  %v6921_v33 = vmov 0.0|0.0  }
  0x5b   :  { %346 = vmatprep.mubr.bf16.mxu0 %v6923_v3  ;;  %387 = vmatprep.mubr.bf16.mxu1 %v6923_v3  ;;  %v5655_v4 = vld [vmem:[#allocation14 + $0x24] ss:$16 sps:$4 sm:$0xff]   ;;  %v5658_v5 = vld [vmem:[#allocation14 + $0x20] ss:$16 sps:$4 sm:$0xff]   ;;  %v5674_v11 = vld [vmem:[#allocation14 + $0xc] ss:$16 sps:$4 sm:$0xff]  }
  0x5c   :  { %314 = vmatprep.subr.bf16.mxu0 %v5648_v1  ;;  %v5661_v6 = vld [vmem:[#allocation14 + $0x44] ss:$16 sps:$4 sm:$0xff]   ;;  %v5664_v7 = vld [vmem:[#allocation14 + $0x40] ss:$16 sps:$4 sm:$0xff]   ;;  %v5676_v12 = vld [vmem:[#allocation14 + $0x8] ss:$16 sps:$4 sm:$0xff]   ;;  %355 = vmatprep.subr.bf16.mxu1 %v5674_v11 }
  0x5d   :  { %315 = vmatpush1.bf16.msra.mxu0 %v5650_v2  ;;  %v5667_v8 = vld [vmem:[#allocation14 + $0x64] ss:$16 sps:$4 sm:$0xff]   ;;  %v5669_v9 = vld [vmem:[#allocation14 + $0x60] ss:$16 sps:$4 sm:$0xff]   ;;  %v5679_v13 = vld [vmem:[#allocation14 + $0x2c] ss:$16 sps:$4 sm:$0xff]   ;;  %356 = vmatpush1.bf16.msra.mxu1 %v5676_v12 }
  0x5e   :  { %316 = vmatprep.subr.bf16.mxu0 %v5655_v4  ;;  %v5671_v10 = vld [vmem:[#allocation14 + $0x84] ss:$16 sps:$4 sm:$0xff]   ;;  %v5683_v14 = vld [vmem:[#allocation14 + $0x28] ss:$16 sps:$4 sm:$0xff]   ;;  %v5686_v15 = vld [vmem:[#allocation14 + $0x80] ss:$16 sps:$4 sm:$0xff]   ;;  %357 = vmatprep.subr.bf16.mxu1 %v5679_v13 }
  0x5f   :  { %v5689_v16 = vld [vmem:[#allocation14 + $0x4c] ss:$16 sps:$4 sm:$0xff]   ;;  %v5692_v17 = vld [vmem:[#allocation14 + $0xa4] ss:$16 sps:$4 sm:$0xff]   ;;  %v5695_v18 = vld [vmem:[#allocation14 + $0x48] ss:$16 sps:$4 sm:$0xff]  }
  0x60   :  { %v5698_v19 = vld [vmem:[#allocation14 + $0xa0] ss:$16 sps:$4 sm:$0xff]   ;;  %v5701_v20 = vld [vmem:[#allocation14 + $0x6c] ss:$16 sps:$4 sm:$0xff]   ;;  %v5704_v21 = vld [vmem:[#allocation14 + $0xc4] ss:$16 sps:$4 sm:$0xff]  }
  0x61   :  { %317 = vmatpush1.bf16.msra.mxu0 %v5658_v5  ;;  %358 = vmatpush1.bf16.msra.mxu1 %v5683_v14  ;;  %v5706_v22 = vld [vmem:[#allocation14 + $0xc0] ss:$16 sps:$4 sm:$0xff]   ;;  %v5708_v23 = vld [vmem:[#allocation14 + $0x68] ss:$16 sps:$4 sm:$0xff]   ;;  %v5710_v24 = vld [vmem:[#allocation14 + $0x8c] ss:$16 sps:$4 sm:$0xff]  }
  0x62   :  { %318 = vmatprep.subr.bf16.mxu0 %v5661_v6  ;;  %359 = vmatprep.subr.bf16.mxu1 %v5689_v16  ;;  %v5712_v25 = vld [vmem:[#allocation14 + $0xe4] ss:$16 sps:$4 sm:$0xff]   ;;  %v5718_v26 = vld [vmem:[#allocation14 + $0x88] ss:$16 sps:$4 sm:$0xff]   ;;  %v5720_v27 = vld [vmem:[#allocation14 + $0xe0] ss:$16 sps:$4 sm:$0xff]  }
  0x63   :  { %v5722_v28 = vld [vmem:[#allocation14 + $0xac] ss:$16 sps:$4 sm:$0xff]   ;;  %v5728_v29 = vld [vmem:[#allocation14 + $0xa8] ss:$16 sps:$4 sm:$0xff]   ;;  %v117_v51 = vld [vmem:[#allocation13] sm:$0xff]  ;;  %s4804_s19 = sld [smem:[#allocation10 + $0x1]] }
  0x64   :  { %v5730_v30 = vld [vmem:[#allocation14 + $0xcc] ss:$16 sps:$4 sm:$0xff]   ;;  %v5735_v31 = vld [vmem:[#allocation14 + $0xc8] ss:$16 sps:$4 sm:$0xff]   ;;  %v119_v63 = vld [vmem:[#allocation13 + $0x10] sm:$0xff]  ;;  %s4806_s14 = sld [smem:[#allocation10 + $0x2]] }
  0x65   :  { %319 = vmatpush1.bf16.msra.mxu0 %v5664_v7  ;;  %360 = vmatpush1.bf16.msra.mxu1 %v5695_v18  ;;  %v5738_v32 = vld [vmem:[#allocation14 + $0xec] ss:$16 sps:$4 sm:$0xff]   ;;  %v5744_v34 = vld [vmem:[#allocation14 + $0xe8] ss:$16 sps:$4 sm:$0xff]   ;;  %s4808_s15 = sld [smem:[#allocation10 + $0x3]]  ;;  %s4810_s16 = sld [smem:[#allocation10 + $0x4]] }
  0x66   :  { %320 = vmatprep.subr.bf16.mxu0 %v5667_v8  ;;  %361 = vmatprep.subr.bf16.mxu1 %v5701_v20  ;;  %v118_v35 = vld [vmem:[#allocation13 + $0x8] sm:$0xff]  ;;  %v120_v54 = vld [vmem:[#allocation13 + $0x18] sm:$0xff]  ;;  %s4812_s7 = sld [smem:[#allocation10 + $0x5]]  ;;  %s4814_s17 = sld [smem:[#allocation10 + $0x6]]  ;;  %vm5538_vm0 = vmmov 0   ;;  %vm4464_vm1 = vcmask 7168  }
  0x69   :  { %321 = vmatpush1.bf16.msra.mxu0 %v5669_v9  ;;  %362 = vmatpush1.bf16.msra.mxu1 %v5708_v23 }
  0x6a   :  { %322 = vmatprep.subr.bf16.mxu0 %v5671_v10  ;;  %363 = vmatprep.subr.bf16.mxu1 %v5710_v24 }
  0x6d   :  { %323 = vmatpush1.bf16.msra.mxu0 %v5686_v15  ;;  %364 = vmatpush1.bf16.msra.mxu1 %v5718_v26 }
  0x6e   :  { %324 = vmatprep.subr.bf16.mxu0 %v5692_v17  ;;  %365 = vmatprep.subr.bf16.mxu1 %v5722_v28 }
  0x71   :  { %325 = vmatpush1.bf16.msra.mxu0 %v5698_v19  ;;  %366 = vmatpush1.bf16.msra.mxu1 %v5728_v29 }
  0x72   :  { %326 = vmatprep.subr.bf16.mxu0 %v5704_v21  ;;  %367 = vmatprep.subr.bf16.mxu1 %v5730_v30 }
  0x75   :  { %327 = vmatpush1.bf16.msra.mxu0 %v5706_v22  ;;  %368 = vmatpush1.bf16.msra.mxu1 %v5735_v31 }
  0x76   :  { %328 = vmatprep.subr.bf16.mxu0 %v5712_v25  ;;  %369 = vmatprep.subr.bf16.mxu1 %v5738_v32 }
  0x79   :  { %329 = vmatpush1.bf16.msra.mxu0 %v5720_v27  ;;  %370 = vmatpush1.bf16.msra.mxu1 %v5744_v34 }
  0x7a   :  { %635 = vmatprep.subr.bf16.mxu0 %v5648_v1  ;;  %676 = vmatprep.subr.bf16.mxu1 %v5674_v11 }
  0x7c   :  { %347 = vmatmul.mubr.bf16.vlgmr.msra.gmra.mrb[0].mxu0 %v6921_v33  ;;  %388 = vmatmul.mubr.bf16.vlgmr.msra.gmra.mrb[0].mxu1 %v6921_v33 }
  0x7d   :  { %636 = vmatpush1.bf16.msra.mxu0 %v5650_v2  ;;  %667 = vmatprep.mubr.bf16.mxu0 %v6923_v3 }
  0x7e   :  { %637 = vmatprep.subr.bf16.mxu0 %v5655_v4  ;;  %677 = vmatpush1.bf16.msra.mxu1 %v5676_v12 }
  0x7f   :  { %708 = vmatprep.mubr.bf16.mxu1 %v6923_v3  ;;  %678 = vmatprep.subr.bf16.mxu1 %v5679_v13 }
  0x81   :  { %638 = vmatpush1.bf16.msra.mxu0 %v5658_v5 }
  0x82   :  { %639 = vmatprep.subr.bf16.mxu0 %v5661_v6  ;;  %679 = vmatpush1.bf16.msra.mxu1 %v5683_v14 }
  0x83   :  { %680 = vmatprep.subr.bf16.mxu1 %v5689_v16 }
  0x85   :  { %640 = vmatpush1.bf16.msra.mxu0 %v5664_v7 }
  0x86   :  { %641 = vmatprep.subr.bf16.mxu0 %v5667_v8  ;;  %681 = vmatpush1.bf16.msra.mxu1 %v5695_v18 }
  0x87   :  { %682 = vmatprep.subr.bf16.mxu1 %v5701_v20 }
  0x89   :  { %642 = vmatpush1.bf16.msra.mxu0 %v5669_v9 }
  0x8a   :  { %643 = vmatprep.subr.bf16.mxu0 %v5671_v10  ;;  %683 = vmatpush1.bf16.msra.mxu1 %v5708_v23 }
  0x8b   :  { %684 = vmatprep.subr.bf16.mxu1 %v5710_v24 }
  0x8d   :  { %644 = vmatpush1.bf16.msra.mxu0 %v5686_v15 }
  0x8e   :  { %645 = vmatprep.subr.bf16.mxu0 %v5692_v17  ;;  %685 = vmatpush1.bf16.msra.mxu1 %v5718_v26 }
  0x8f   :  { %686 = vmatprep.subr.bf16.mxu1 %v5722_v28 }
  0x91   :  { %646 = vmatpush1.bf16.msra.mxu0 %v5698_v19 }
  0x92   :  { %647 = vmatprep.subr.bf16.mxu0 %v5704_v21  ;;  %687 = vmatpush1.bf16.msra.mxu1 %v5728_v29 }
  0x93   :  { %688 = vmatprep.subr.bf16.mxu1 %v5730_v30 }
  0x95   :  { %648 = vmatpush1.bf16.msra.mxu0 %v5706_v22 }
  0x96   :  { %649 = vmatprep.subr.bf16.mxu0 %v5712_v25  ;;  %689 = vmatpush1.bf16.msra.mxu1 %v5735_v31 }
  0x97   :  { %690 = vmatprep.subr.bf16.mxu1 %v5738_v32 }
  0x99   :  { %650 = vmatpush1.bf16.msra.mxu0 %v5720_v27 }
  0x9a   :  { %957 = vmatprep.subr.bf16.mxu0 %v5648_v1  ;;  %691 = vmatpush1.bf16.msra.mxu1 %v5744_v34 }
  0x9b   :  { %998 = vmatprep.subr.bf16.mxu1 %v5674_v11 }
 0x14f   :  { %v348_v36 = vpop.f32.mrb[0].mxu0  ;;  %v389_v44 = vpop.f32.mrb[0].mxu1 }
 0x150   :  { %v350_v37 = vpop.f32.mrb[1].mxu0  ;;  %v391_v45 = vpop.f32.mrb[1].mxu1  ;;  %v396_v55 = vadd.f32 %v348_v36, %v117_v51 }
 0x151   :  { %v397_v38 = vadd.f32 %v350_v37, %v118_v35  ;;  %v352_v39 = vpop.f32.mrb[2].mxu0  ;;  %v393_v46 = vpop.f32.mrb[2].mxu1  ;;  %v399_v58 = vadd.f32 %v391_v45, %v120_v54  ;;  %v398_v35 = vadd.f32 %v389_v44, %v119_v63  ;;  %v439_v54 = vld [vmem:[#allocation13 + $0x28] sm:$0xff] }
 0x152   :  { %v353_v40 = vpop.f32.mrb[3].mxu0  ;;  %v394_v47 = vpop.f32.mrb[3].mxu1 }
 0x153   :  { %v401_v41 = vand.u32 2147483647, %v397_v38  ;;  %v400_v52 = vmin.f32 %v397_v38, 0.0  ;;  %v4506_v40 = vmul.f32 -1.442695, %v398_v35 }
 0x155   :  { %v402_v42 = vsub.f32 0.0, %v401_v41 }
 0x157   :  { %v403_v43 = vmul.f32 1.442695, %v402_v42 }
 0x159   :  { %5099 = vpow2.f32 %v403_v43 }
 0x163   :  { %v5100_v48 = vpop.eup %5099 }
 0x164   :  { %v405_v49 = vadd.f32 1.0, %v5100_v48 }
 0x166   :  { %5101 = vlog2.f32 %v405_v49 }
 0x167   :  { %5103 = vtanh.f32 %v399_v58 }
 0x170   :  { %v5102_v50 = vpop.eup %5101 }
 0x171   :  { %v407_v53 = vmul.f32 0.6931472, %v5102_v50  ;;  %v5104_v0 = vpop.eup %5103 }
 0x173   :  { %v408_v56 = vsub.f32 %v400_v52, %v407_v53 }
 0x175   :  { %v5784_v57 = vmax.f32 %v408_v56, %v396_v55 }
 0x177   :  { %v411_v59 = vsub.f32 %v396_v55, %v5784_v57  ;;  %v414_v60 = vsub.f32 %v408_v56, %v5784_v57 }
 0x179   :  { %v412_v61 = vmul.f32 1.442695, %v411_v59  ;;  %v415_v62 = vmul.f32 1.442695, %v414_v60 }
 0x17b   :  { %5105 = vpow2.f32 %v412_v61 }
 0x17c   :  { %5107 = vpow2.f32 %v415_v62 }
 0x185   :  { %v5106_v37 = vpop.eup %5105 }
 0x186   :  { %v5108_v38 = vpop.eup %5107  ;;  %v419_v39 = vmul.f32 %v5106_v37, %v5104_v0 }
 0x187   :  { %v417_v36 = vmul.f32 0.0, %v5108_v38 }
 0x189   :  { %v5788_v41 = vadd.f32 %v5106_v37, %v417_v36  ;;  %v5790_v42 = vadd.f32 %v419_v39, %v417_v36 }
 0x18b   :  { %5109 = vrcp.f32 %v5788_v41 }
 0x18c   :  { %5111 = vpow2.f32 %v4506_v40 }
 0x195   :  { %v5110_v43 = vpop.eup %5109 }
 0x196   :  { %v5112_v45 = vpop.eup %5111  ;;  %v424_v46 = vmul.f32 %v5110_v43, %v5788_v41 }
 0x197   :  { %v430_v48 = vadd.f32 1.0, %v5112_v45 }
 0x198   :  { %v425_v47 = vsub.f32 2.0, %v424_v46 }
 0x199   :  { %5113 = vrcp.f32 %v430_v48  ;;  %v441_v48 = vld [vmem:[#allocation13 + $0x38] sm:$0xff] }
 0x19a   :  { %v426_v49 = vmul.f32 %v5110_v43, %v425_v47  ;;  %v438_v43 = vld [vmem:[#allocation13 + $0x20] sm:$0xff] }
 0x19c   :  { %v433_v44 = vmul.f32 %v426_v49, %v5790_v42 }
 0x19e   :  { %5115 = vtanh.f32 %v433_v44 }
 0x1a3   :  { %v5114_v50 = vpop.eup %5113 }
 0x1a8   :  { %v5116_v51 = vpop.eup %5115 }
 0x1a9   :  { %v5795_v52 = vmul.f32 %v5116_v51, %v5114_v50 }
 0x1ab   :  { %v442_v53 = vpack.c.bf16 %v5795_v52, %v5795_v52 }
 0x1ad   :  { %668 = vmatmul.mubr.bf16.vlgmr.msra.gmra.mrb[4].mxu0 %v442_v53  ;;  %709 = vmatmul.mubr.bf16.vlgmr.msra.gmra.mrb[4].mxu1 %v442_v53 }
 0x1ae   :  { %958 = vmatpush1.bf16.msra.mxu0 %v5650_v2  ;;  %999 = vmatpush1.bf16.msra.mxu1 %v5676_v12 }
 0x1af   :  { %959 = vmatprep.subr.bf16.mxu0 %v5655_v4  ;;  %1000 = vmatprep.subr.bf16.mxu1 %v5679_v13 }
 0x1b0   :  { %989 = vmatprep.mubr.bf16.mxu0 %v6923_v3  ;;  %1030 = vmatprep.mubr.bf16.mxu1 %v6923_v3 }
 0x1b2   :  { %960 = vmatpush1.bf16.msra.mxu0 %v5658_v5  ;;  %1001 = vmatpush1.bf16.msra.mxu1 %v5683_v14 }
 0x1b3   :  { %961 = vmatprep.subr.bf16.mxu0 %v5661_v6  ;;  %1002 = vmatprep.subr.bf16.mxu1 %v5689_v16 }
 0x1b6   :  { %962 = vmatpush1.bf16.msra.mxu0 %v5664_v7  ;;  %1003 = vmatpush1.bf16.msra.mxu1 %v5695_v18 }
 0x1b7   :  { %963 = vmatprep.subr.bf16.mxu0 %v5667_v8  ;;  %1004 = vmatprep.subr.bf16.mxu1 %v5701_v20 }
 0x1ba   :  { %964 = vmatpush1.bf16.msra.mxu0 %v5669_v9  ;;  %1005 = vmatpush1.bf16.msra.mxu1 %v5708_v23 }
 0x1bb   :  { %965 = vmatprep.subr.bf16.mxu0 %v5671_v10  ;;  %1006 = vmatprep.subr.bf16.mxu1 %v5710_v24 }
 0x1be   :  { %966 = vmatpush1.bf16.msra.mxu0 %v5686_v15  ;;  %1007 = vmatpush1.bf16.msra.mxu1 %v5718_v26 }
 0x1bf   :  { %967 = vmatprep.subr.bf16.mxu0 %v5692_v17  ;;  %1008 = vmatprep.subr.bf16.mxu1 %v5722_v28 }
 0x1c2   :  { %968 = vmatpush1.bf16.msra.mxu0 %v5698_v19  ;;  %1009 = vmatpush1.bf16.msra.mxu1 %v5728_v29 }
 0x1c3   :  { %969 = vmatprep.subr.bf16.mxu0 %v5704_v21  ;;  %1010 = vmatprep.subr.bf16.mxu1 %v5730_v30 }
 0x1c6   :  { %970 = vmatpush1.bf16.msra.mxu0 %v5706_v22  ;;  %1011 = vmatpush1.bf16.msra.mxu1 %v5735_v31 }
 0x1c7   :  { %971 = vmatprep.subr.bf16.mxu0 %v5712_v25  ;;  %1012 = vmatprep.subr.bf16.mxu1 %v5738_v32 }
 0x1ca   :  { %972 = vmatpush1.bf16.msra.mxu0 %v5720_v27  ;;  %1013 = vmatpush1.bf16.msra.mxu1 %v5744_v34 }
 0x1cb   :  { %1279 = vmatprep.subr.bf16.mxu0 %v5648_v1  ;;  %1320 = vmatprep.subr.bf16.mxu1 %v5674_v11 }
 0x280   :  { %v669_v55 = vpop.f32.mrb[4].mxu0  ;;  %v710_v56 = vpop.f32.mrb[4].mxu1 }
 0x281   :  { %v671_v58 = vpop.f32.mrb[5].mxu0  ;;  %v712_v59 = vpop.f32.mrb[5].mxu1  ;;  %v717_v46 = vadd.f32 %v669_v55, %v438_v43 }
 0x282   :  { %v718_v60 = vadd.f32 %v671_v58, %v439_v54  ;;  %v673_v61 = vpop.f32.mrb[6].mxu0  ;;  %v714_v62 = vpop.f32.mrb[6].mxu1  ;;  %v720_v44 = vadd.f32 %v712_v59, %v441_v48  ;;  %v440_v58 = vld [vmem:[#allocation13 + $0x30] sm:$0xff] }
 0x283   :  { %v674_v63 = vpop.f32.mrb[7].mxu0  ;;  %v715_v0 = vpop.f32.mrb[7].mxu1  ;;  %v719_v61 = vadd.f32 %v710_v56, %v440_v58 }
 0x284   :  { %v722_v35 = vand.u32 2147483647, %v718_v60  ;;  %v721_v40 = vmin.f32 %v718_v60, 0.0 }
 0x285   :  { %v4539_v59 = vmul.f32 -1.442695, %v719_v61 }
 0x286   :  { %v723_v37 = vsub.f32 0.0, %v722_v35 }
 0x288   :  { %v724_v38 = vmul.f32 1.442695, %v723_v37 }
 0x28a   :  { %5117 = vpow2.f32 %v724_v38 }
 0x294   :  { %v5118_v39 = vpop.eup %5117 }
 0x295   :  { %v726_v36 = vadd.f32 1.0, %v5118_v39 }
 0x297   :  { %5119 = vlog2.f32 %v726_v36 }
 0x298   :  { %5121 = vtanh.f32 %v720_v44 }
 0x2a1   :  { %v5120_v1 = vpop.eup %5119 }
 0x2a2   :  { %v728_v11 = vmul.f32 0.6931472, %v5120_v1  ;;  %v5122_v60 = vpop.eup %5121 }
 0x2a4   :  { %v729_v45 = vsub.f32 %v721_v40, %v728_v11 }
 0x2a6   :  { %v730_v47 = vadd.f32 %v729_v45, %v5784_v57 }
 0x2a8   :  { %v5834_v49 = vmax.f32 %v730_v47, %v717_v46 }
 0x2aa   :  { %v732_v50 = vsub.f32 %v717_v46, %v5834_v49  ;;  %v735_v51 = vsub.f32 %v730_v47, %v5834_v49 }
 0x2ac   :  { %v733_v53 = vmul.f32 1.442695, %v732_v50  ;;  %v736_v54 = vmul.f32 1.442695, %v735_v51 }
 0x2ae   :  { %5123 = vpow2.f32 %v733_v53 }
 0x2af   :  { %5125 = vpow2.f32 %v736_v54 }
 0x2b8   :  { %v5124_v62 = vpop.eup %5123 }
 0x2b9   :  { %v5126_v55 = vpop.eup %5125  ;;  %v740_v63 = vmul.f32 %v5124_v62, %v5122_v60 }
 0x2ba   :  { %v742_v57 = vmul.f32 %v5126_v55, %v5788_v41  ;;  %v738_v0 = vmul.f32 %v5126_v55, %v5790_v42 }
 0x2bc   :  { %v5840_v35 = vadd.f32 %v5124_v62, %v742_v57  ;;  %v5842_v37 = vadd.f32 %v740_v63, %v738_v0 }
 0x2be   :  { %5127 = vrcp.f32 %v5840_v35 }
 0x2bf   :  { %5129 = vpow2.f32 %v4539_v59 }
 0x2c8   :  { %v5128_v38 = vpop.eup %5127 }
 0x2c9   :  { %v5130_v39 = vpop.eup %5129  ;;  %v745_v36 = vmul.f32 %v5128_v38, %v5840_v35 }
 0x2ca   :  { %v751_v1 = vadd.f32 1.0, %v5130_v39  ;;  %v5903_v39 = vld [vmem:[#allocation14 + $0x4] ss:$16 sps:$4 sm:$0xff]  }
 0x2cb   :  { %v746_v56 = vsub.f32 2.0, %v745_v36  ;;  %v5905_v36 = vld [vmem:[#allocation14 + $0xc] ss:$16 sps:$4 sm:$0xff]  }
 0x2cc   :  { %5131 = vrcp.f32 %v751_v1  ;;  %v5909_v1 = vld [vmem:[#allocation14 + $0x8] ss:$16 sps:$4 sm:$0xff]  }
 0x2cd   :  { %v747_v40 = vmul.f32 %v5128_v38, %v746_v56  ;;  %v5907_v56 = vld [vmem:[#allocation14] ss:$16 sps:$4 sm:$0xff]  }
 0x2cf   :  { %v754_v11 = vmul.f32 %v747_v40, %v5842_v37  ;;  %v5915_v40 = vld [vmem:[#allocation14 + $0x24] ss:$16 sps:$4 sm:$0xff]  }
 0x2d1   :  { %5133 = vtanh.f32 %v754_v11  ;;  %v5917_v11 = vld [vmem:[#allocation14 + $0x2c] ss:$16 sps:$4 sm:$0xff]  }
 0x2d6   :  { %v5132_v41 = vpop.eup %5131 }
 0x2db   :  { %v5134_v42 = vpop.eup %5133 }
 0x2dc   :  { %v5847_v43 = vmul.f32 %v5134_v42, %v5132_v41  ;;  %v5919_v41 = vld [vmem:[#allocation14 + $0x20] ss:$16 sps:$4 sm:$0xff]   ;;  %v5921_v42 = vld [vmem:[#allocation14 + $0x28] ss:$16 sps:$4 sm:$0xff]  }
 0x2de   :  { %v764_v45 = vpack.c.bf16 %v5847_v43, %v5847_v43 }
 0x2e0   :  { %990 = vmatmul.mubr.bf16.vlgmr.msra.gmra.mrb[8].mxu0 %v764_v45  ;;  %1031 = vmatmul.mubr.bf16.vlgmr.msra.gmra.mrb[8].mxu1 %v764_v45  ;;  %v5927_v45 = vld [vmem:[#allocation14 + $0x44] ss:$16 sps:$4 sm:$0xff]  }
 0x2e1   :  { %1280 = vmatpush1.bf16.msra.mxu0 %v5650_v2  ;;  %1321 = vmatpush1.bf16.msra.mxu1 %v5676_v12  ;;  %v761_v2 = vld [vmem:[#allocation13 + $0x48] sm:$0xff] }
 0x2e2   :  { %1281 = vmatprep.subr.bf16.mxu0 %v5655_v4  ;;  %1322 = vmatprep.subr.bf16.mxu1 %v5679_v13 }
 0x2e3   :  { %1311 = vmatprep.mubr.bf16.mxu0 %v6923_v3  ;;  %1352 = vmatprep.mubr.bf16.mxu1 %v6923_v3 }
 0x2e5   :  { %1282 = vmatpush1.bf16.msra.mxu0 %v5658_v5  ;;  %1323 = vmatpush1.bf16.msra.mxu1 %v5683_v14 }
 0x2e6   :  { %1283 = vmatprep.subr.bf16.mxu0 %v5661_v6  ;;  %1324 = vmatprep.subr.bf16.mxu1 %v5689_v16 }
 0x2e9   :  { %1284 = vmatpush1.bf16.msra.mxu0 %v5664_v7  ;;  %1325 = vmatpush1.bf16.msra.mxu1 %v5695_v18 }
 0x2ea   :  { %1285 = vmatprep.subr.bf16.mxu0 %v5667_v8  ;;  %1326 = vmatprep.subr.bf16.mxu1 %v5701_v20 }
 0x2ed   :  { %1286 = vmatpush1.bf16.msra.mxu0 %v5669_v9  ;;  %1327 = vmatpush1.bf16.msra.mxu1 %v5708_v23 }
 0x2ee   :  { %1287 = vmatprep.subr.bf16.mxu0 %v5671_v10  ;;  %1328 = vmatprep.subr.bf16.mxu1 %v5710_v24 }
 0x2f1   :  { %1288 = vmatpush1.bf16.msra.mxu0 %v5686_v15  ;;  %1329 = vmatpush1.bf16.msra.mxu1 %v5718_v26  ;;  %v763_v26 = vld [vmem:[#allocation13 + $0x58] sm:$0xff] }
 0x2f2   :  { %1289 = vmatprep.subr.bf16.mxu0 %v5692_v17  ;;  %1330 = vmatprep.subr.bf16.mxu1 %v5722_v28 }
 0x2f5   :  { %1290 = vmatpush1.bf16.msra.mxu0 %v5698_v19  ;;  %1331 = vmatpush1.bf16.msra.mxu1 %v5728_v29 }
 0x2f6   :  { %1291 = vmatprep.subr.bf16.mxu0 %v5704_v21  ;;  %1332 = vmatprep.subr.bf16.mxu1 %v5730_v30 }
 0x2f9   :  { %1292 = vmatpush1.bf16.msra.mxu0 %v5706_v22  ;;  %1333 = vmatpush1.bf16.msra.mxu1 %v5735_v31  ;;  %v760_v22 = vld [vmem:[#allocation13 + $0x40] sm:$0xff] }
 0x2fa   :  { %1293 = vmatprep.subr.bf16.mxu0 %v5712_v25  ;;  %1334 = vmatprep.subr.bf16.mxu1 %v5738_v32 }
 0x2fd   :  { %1294 = vmatpush1.bf16.msra.mxu0 %v5720_v27  ;;  %1335 = vmatpush1.bf16.msra.mxu1 %v5744_v34  ;;  %v762_v34 = vld [vmem:[#allocation13 + $0x50] sm:$0xff] }
 0x2fe   :  { %1601 = vmatprep.subr.bf16.mxu0 %v5903_v39  ;;  %1642 = vmatprep.subr.bf16.mxu1 %v5905_v36 }
 0x3b3   :  { %v991_v4 = vpop.f32.mrb[8].mxu0  ;;  %v1032_v5 = vpop.f32.mrb[8].mxu1 }
 0x3b4   :  { %v993_v6 = vpop.f32.mrb[9].mxu0  ;;  %v1034_v7 = vpop.f32.mrb[9].mxu1  ;;  %v1039_v24 = vadd.f32 %v991_v4, %v760_v22  ;;  %v1041_v47 = vadd.f32 %v1032_v5, %v762_v34  ;;  %v5931_v4 = vld [vmem:[#allocation14 + $0x40] ss:$16 sps:$4 sm:$0xff]   ;;  %v5933_v5 = vld [vmem:[#allocation14 + $0x48] ss:$16 sps:$4 sm:$0xff]  }
 0x3b5   :  { %v1040_v8 = vadd.f32 %v993_v6, %v761_v2  ;;  %v995_v9 = vpop.f32.mrb[10].mxu0  ;;  %v1036_v10 = vpop.f32.mrb[10].mxu1  ;;  %v1042_v28 = vadd.f32 %v1034_v7, %v763_v26  ;;  %v5929_v2 = vld [vmem:[#allocation14 + $0x4c] ss:$16 sps:$4 sm:$0xff]   ;;  %v5939_v6 = vld [vmem:[#allocation14 + $0x64] ss:$16 sps:$4 sm:$0xff]  }
 0x3b6   :  { %v996_v12 = vpop.f32.mrb[11].mxu0  ;;  %v1037_v13 = vpop.f32.mrb[11].mxu1  ;;  %v4572_v53 = vmul.f32 -1.442695, %v1041_v47  ;;  %v5941_v7 = vld [vmem:[#allocation14 + $0x6c] ss:$16 sps:$4 sm:$0xff]  }
 0x3b7   :  { %v1044_v14 = vand.u32 2147483647, %v1040_v8  ;;  %v1043_v20 = vmin.f32 %v1040_v8, 0.0  ;;  %v5943_v8 = vld [vmem:[#allocation14 + $0x60] ss:$16 sps:$4 sm:$0xff]  }
 0x3b8   :  { %v5945_v9 = vld [vmem:[#allocation14 + $0x68] ss:$16 sps:$4 sm:$0xff]   ;;  %v5951_v10 = vld [vmem:[#allocation14 + $0x84] ss:$16 sps:$4 sm:$0xff]   ;;  %v5953_v12 = vld [vmem:[#allocation14 + $0x8c] ss:$16 sps:$4 sm:$0xff]  }
 0x3b9   :  { %v1045_v15 = vsub.f32 0.0, %v1044_v14  ;;  %v5955_v13 = vld [vmem:[#allocation14 + $0x80] ss:$16 sps:$4 sm:$0xff]   ;;  %v5957_v14 = vld [vmem:[#allocation14 + $0x88] ss:$16 sps:$4 sm:$0xff]  }
 0x3ba   :  { %v5981_v22 = vld [vmem:[#allocation14 + $0xc8] ss:$16 sps:$4 sm:$0xff]  }
 0x3bb   :  { %v1046_v16 = vmul.f32 1.442695, %v1045_v15  ;;  %v5963_v15 = vld [vmem:[#allocation14 + $0xa0] ss:$16 sps:$4 sm:$0xff]   ;;  %v5993_v26 = vld [vmem:[#allocation14 + $0xe8] ss:$16 sps:$4 sm:$0xff]  }
 0x3bd   :  { %5135 = vpow2.f32 %v1046_v16  ;;  %v5965_v16 = vld [vmem:[#allocation14 + $0xa4] ss:$16 sps:$4 sm:$0xff]  }
 0x3c7   :  { %v5136_v17 = vpop.eup %5135 }
 0x3c8   :  { %v1048_v18 = vadd.f32 1.0, %v5136_v17  ;;  %v5967_v17 = vld [vmem:[#allocation14 + $0xa8] ss:$16 sps:$4 sm:$0xff]  }
 0x3ca   :  { %5137 = vlog2.f32 %v1048_v18  ;;  %v5969_v18 = vld [vmem:[#allocation14 + $0xac] ss:$16 sps:$4 sm:$0xff]  }
 0x3cb   :  { %5139 = vtanh.f32 %v1042_v28  ;;  %v1083_v28 = vld [vmem:[#allocation13 + $0x68] sm:$0xff] }
 0x3d4   :  { %v5138_v19 = vpop.eup %5137 }
 0x3d5   :  { %v1050_v21 = vmul.f32 0.6931472, %v5138_v19  ;;  %v5140_v46 = vpop.eup %5139  ;;  %v5971_v19 = vld [vmem:[#allocation14 + $0xc4] ss:$16 sps:$4 sm:$0xff]  }
 0x3d7   :  { %v1051_v23 = vsub.f32 %v1043_v20, %v1050_v21  ;;  %v5974_v20 = vld [vmem:[#allocation14 + $0xcc] ss:$16 sps:$4 sm:$0xff]   ;;  %v5979_v21 = vld [vmem:[#allocation14 + $0xc0] ss:$16 sps:$4 sm:$0xff]  }
 0x3d9   :  { %v1052_v25 = vadd.f32 %v1051_v23, %v5834_v49  ;;  %v5985_v23 = vld [vmem:[#allocation14 + $0xe4] ss:$16 sps:$4 sm:$0xff]  }
 0x3db   :  { %v5884_v27 = vmax.f32 %v1052_v25, %v1039_v24 }
 0x3dd   :  { %v1054_v29 = vsub.f32 %v1039_v24, %v5884_v27  ;;  %v1057_v30 = vsub.f32 %v1052_v25, %v5884_v27  ;;  %v5987_v24 = vld [vmem:[#allocation14 + $0xec] ss:$16 sps:$4 sm:$0xff]   ;;  %v5991_v25 = vld [vmem:[#allocation14 + $0xe0] ss:$16 sps:$4 sm:$0xff]  }
 0x3df   :  { %v1055_v31 = vmul.f32 1.442695, %v1054_v29  ;;  %v1058_v32 = vmul.f32 1.442695, %v1057_v30 }
 0x3e1   :  { %5141 = vpow2.f32 %v1055_v31 }
 0x3e2   :  { %5143 = vpow2.f32 %v1058_v32 }
 0x3eb   :  { %v5142_v48 = vpop.eup %5141 }
 0x3ec   :  { %v5144_v44 = vpop.eup %5143  ;;  %v1062_v50 = vmul.f32 %v5142_v48, %v5140_v46 }
 0x3ed   :  { %v1064_v49 = vmul.f32 %v5144_v44, %v5840_v35  ;;  %v1060_v51 = vmul.f32 %v5144_v44, %v5842_v37 }
 0x3ef   :  { %v5890_v54 = vadd.f32 %v5142_v48, %v1064_v49  ;;  %v5892_v58 = vadd.f32 %v1062_v50, %v1060_v51 }
 0x3f1   :  { %5145 = vrcp.f32 %v5890_v54 }
 0x3f2   :  { %5147 = vpow2.f32 %v4572_v53 }
 0x3fb   :  { %v5146_v60 = vpop.eup %5145 }
 0x3fc   :  { %v5148_v61 = vpop.eup %5147  ;;  %v1067_v62 = vmul.f32 %v5146_v60, %v5890_v54 }
 0x3fd   :  { %v1073_v63 = vadd.f32 1.0, %v5148_v61 }
 0x3fe   :  { %v1068_v55 = vsub.f32 2.0, %v1067_v62 }
 0x3ff   :  { %5149 = vrcp.f32 %v1073_v63  ;;  %v1082_v63 = vld [vmem:[#allocation13 + $0x60] sm:$0xff] }
 0x400   :  { %v1069_v57 = vmul.f32 %v5146_v60, %v1068_v55 }
 0x402   :  { %v1076_v0 = vmul.f32 %v1069_v57, %v5892_v58 }
 0x404   :  { %5151 = vtanh.f32 %v1076_v0 }
 0x409   :  { %v5150_v59 = vpop.eup %5149 }
 0x40e   :  { %v5152_v35 = vpop.eup %5151 }
 0x40f   :  { %v5897_v37 = vmul.f32 %v5152_v35, %v5150_v59  ;;  %v1085_v35 = vld [vmem:[#allocation13 + $0x78] sm:$0xff] }
 0x411   :  { %v1086_v38 = vpack.c.bf16 %v5897_v37, %v5897_v37 }
 0x413   :  { %1312 = vmatmul.mubr.bf16.vlgmr.msra.gmra.mrb[12].mxu0 %v1086_v38  ;;  %1353 = vmatmul.mubr.bf16.vlgmr.msra.gmra.mrb[12].mxu1 %v1086_v38 }
 0x414   :  { %1633 = vmatprep.mubr.bf16.mxu0 %v6923_v3  ;;  %1674 = vmatprep.mubr.bf16.mxu1 %v6923_v3 }
 0x415   :  { %1602 = vmatpush1.bf16.msra.mxu0 %v5907_v56  ;;  %1643 = vmatpush1.bf16.msra.mxu1 %v5909_v1 }
 0x416   :  { %1603 = vmatprep.subr.bf16.mxu0 %v5915_v40  ;;  %1644 = vmatprep.subr.bf16.mxu1 %v5917_v11 }
 0x419   :  { %1604 = vmatpush1.bf16.msra.mxu0 %v5919_v41  ;;  %1645 = vmatpush1.bf16.msra.mxu1 %v5921_v42 }
 0x41a   :  { %1605 = vmatprep.subr.bf16.mxu0 %v5927_v45  ;;  %1646 = vmatprep.subr.bf16.mxu1 %v5929_v2 }
 0x41d   :  { %1606 = vmatpush1.bf16.msra.mxu0 %v5931_v4  ;;  %1647 = vmatpush1.bf16.msra.mxu1 %v5933_v5 }
 0x41e   :  { %1607 = vmatprep.subr.bf16.mxu0 %v5939_v6  ;;  %1648 = vmatprep.subr.bf16.mxu1 %v5941_v7 }
 0x421   :  { %1608 = vmatpush1.bf16.msra.mxu0 %v5943_v8  ;;  %1649 = vmatpush1.bf16.msra.mxu1 %v5945_v9 }
 0x422   :  { %1609 = vmatprep.subr.bf16.mxu0 %v5951_v10  ;;  %1650 = vmatprep.subr.bf16.mxu1 %v5953_v12 }
 0x425   :  { %1610 = vmatpush1.bf16.msra.mxu0 %v5955_v13  ;;  %1651 = vmatpush1.bf16.msra.mxu1 %v5957_v14 }
 0x426   :  { %1611 = vmatprep.subr.bf16.mxu0 %v5965_v16  ;;  %1652 = vmatprep.subr.bf16.mxu1 %v5969_v18 }
 0x429   :  { %1612 = vmatpush1.bf16.msra.mxu0 %v5963_v15  ;;  %1653 = vmatpush1.bf16.msra.mxu1 %v5967_v17 }
 0x42a   :  { %1613 = vmatprep.subr.bf16.mxu0 %v5971_v19  ;;  %1654 = vmatprep.subr.bf16.mxu1 %v5974_v20 }
 0x42d   :  { %1614 = vmatpush1.bf16.msra.mxu0 %v5979_v21  ;;  %1655 = vmatpush1.bf16.msra.mxu1 %v5981_v22 }
 0x42e   :  { %1615 = vmatprep.subr.bf16.mxu0 %v5985_v23  ;;  %1656 = vmatprep.subr.bf16.mxu1 %v5987_v24 }
 0x431   :  { %1616 = vmatpush1.bf16.msra.mxu0 %v5991_v25  ;;  %1657 = vmatpush1.bf16.msra.mxu1 %v5993_v26 }
 0x432   :  { %1923 = vmatprep.subr.bf16.mxu0 %v5903_v39  ;;  %1964 = vmatprep.subr.bf16.mxu1 %v5905_v36 }
 0x4e6   :  { %v1313_v29 = vpop.f32.mrb[12].mxu0  ;;  %v1354_v30 = vpop.f32.mrb[12].mxu1 }
 0x4e7   :  { %v1315_v31 = vpop.f32.mrb[13].mxu0  ;;  %v1356_v32 = vpop.f32.mrb[13].mxu1  ;;  %v1361_v0 = vadd.f32 %v1313_v29, %v1082_v63 }
 0x4e8   :  { %v1362_v34 = vadd.f32 %v1315_v31, %v1083_v28  ;;  %v1317_v46 = vpop.f32.mrb[14].mxu0  ;;  %v1358_v47 = vpop.f32.mrb[14].mxu1  ;;  %v1364_v28 = vadd.f32 %v1356_v32, %v1085_v35 }
 0x4e9   :  { %v1318_v48 = vpop.f32.mrb[15].mxu0  ;;  %v1359_v44 = vpop.f32.mrb[15].mxu1 }
 0x4ea   :  { %v1366_v50 = vand.u32 2147483647, %v1362_v34  ;;  %v1365_v62 = vmin.f32 %v1362_v34, 0.0  ;;  %v1084_v34 = vld [vmem:[#allocation13 + $0x70] sm:$0xff] }
 0x4ec   :  { %v1367_v49 = vsub.f32 0.0, %v1366_v50  ;;  %v1363_v50 = vadd.f32 %v1354_v30, %v1084_v34 }
 0x4ee   :  { %v1368_v51 = vmul.f32 1.442695, %v1367_v49  ;;  %v4605_v32 = vmul.f32 -1.442695, %v1363_v50 }
 0x4f0   :  { %5153 = vpow2.f32 %v1368_v51 }
 0x4fa   :  { %v5154_v53 = vpop.eup %5153 }
 0x4fb   :  { %v1370_v60 = vadd.f32 1.0, %v5154_v53 }
 0x4fd   :  { %5155 = vlog2.f32 %v1370_v60 }
 0x4fe   :  { %5157 = vtanh.f32 %v1364_v28 }
 0x507   :  { %v5156_v61 = vpop.eup %5155 }
 0x508   :  { %v1372_v55 = vmul.f32 0.6931472, %v5156_v61  ;;  %v5158_v44 = vpop.eup %5157 }
 0x50a   :  { %v1373_v57 = vsub.f32 %v1365_v62, %v1372_v55 }
 0x50c   :  { %v1374_v59 = vadd.f32 %v1373_v57, %v5884_v27 }
 0x50e   :  { %v6002_v38 = vmax.f32 %v1374_v59, %v1361_v0 }
 0x510   :  { %v1376_v31 = vsub.f32 %v1361_v0, %v6002_v38  ;;  %v1379_v46 = vsub.f32 %v1374_v59, %v6002_v38 }
 0x512   :  { %v1377_v47 = vmul.f32 1.442695, %v1376_v31  ;;  %v1380_v48 = vmul.f32 1.442695, %v1379_v46  ;;  %v1405_v31 = vld [vmem:[#allocation13 + $0x88] sm:$0xff] }
 0x514   :  { %5159 = vpow2.f32 %v1377_v47 }
 0x515   :  { %5161 = vpow2.f32 %v1380_v48 }
 0x51e   :  { %v5160_v49 = vpop.eup %5159 }
 0x51f   :  { %v5162_v29 = vpop.eup %5161  ;;  %v1384_v51 = vmul.f32 %v5160_v49, %v5158_v44 }
 0x520   :  { %v1386_v27 = vmul.f32 %v5162_v29, %v5890_v54  ;;  %v1382_v53 = vmul.f32 %v5162_v29, %v5892_v58 }
 0x522   :  { %v6008_v60 = vadd.f32 %v5160_v49, %v1386_v27  ;;  %v6010_v61 = vadd.f32 %v1384_v51, %v1382_v53 }
 0x524   :  { %5163 = vrcp.f32 %v6008_v60 }
 0x525   :  { %5165 = vpow2.f32 %v4605_v32 }
 0x52e   :  { %v5164_v62 = vpop.eup %5163 }
 0x52f   :  { %v5166_v55 = vpop.eup %5165  ;;  %v1389_v63 = vmul.f32 %v5164_v62, %v6008_v60 }
 0x530   :  { %v1395_v57 = vadd.f32 1.0, %v5166_v55 }
 0x531   :  { %v1390_v30 = vsub.f32 2.0, %v1389_v63 }
 0x532   :  { %5167 = vrcp.f32 %v1395_v57 }
 0x533   :  { %v1391_v0 = vmul.f32 %v5164_v62, %v1390_v30 }
 0x535   :  { %v1398_v59 = vmul.f32 %v1391_v0, %v6010_v61  ;;  %v1404_v0 = vld [vmem:[#allocation13 + $0x80] sm:$0xff] }
 0x537   :  { %5169 = vtanh.f32 %v1398_v59 }
 0x53c   :  { %v5168_v54 = vpop.eup %5167 }
 0x541   :  { %v5170_v58 = vpop.eup %5169 }
 0x542   :  { %v6015_v35 = vmul.f32 %v5170_v58, %v5168_v54 }
 0x544   :  { %v1408_v28 = vpack.c.bf16 %v6015_v35, %v6015_v35 }
 0x546   :  { %1634 = vmatmul.mubr.bf16.vlgmr.msra.gmra.mrb[16].mxu0 %v1408_v28  ;;  %1675 = vmatmul.mubr.bf16.vlgmr.msra.gmra.mrb[16].mxu1 %v1408_v28  ;;  %v1407_v28 = vld [vmem:[#allocation13 + $0x98] sm:$0xff] }
 0x547   :  { %1924 = vmatpush1.bf16.msra.mxu0 %v5907_v56  ;;  %1965 = vmatpush1.bf16.msra.mxu1 %v5909_v1 }
 0x548   :  { %1925 = vmatprep.subr.bf16.mxu0 %v5915_v40  ;;  %1966 = vmatprep.subr.bf16.mxu1 %v5917_v11 }
 0x549   :  { %1955 = vmatprep.mubr.bf16.mxu0 %v6923_v3  ;;  %1996 = vmatprep.mubr.bf16.mxu1 %v6923_v3 }
 0x54b   :  { %1926 = vmatpush1.bf16.msra.mxu0 %v5919_v41  ;;  %1967 = vmatpush1.bf16.msra.mxu1 %v5921_v42 }
 0x54c   :  { %1927 = vmatprep.subr.bf16.mxu0 %v5927_v45  ;;  %1968 = vmatprep.subr.bf16.mxu1 %v5929_v2 }
 0x54f   :  { %1928 = vmatpush1.bf16.msra.mxu0 %v5931_v4  ;;  %1969 = vmatpush1.bf16.msra.mxu1 %v5933_v5 }
 0x550   :  { %1929 = vmatprep.subr.bf16.mxu0 %v5939_v6  ;;  %1970 = vmatprep.subr.bf16.mxu1 %v5941_v7 }
 0x553   :  { %1930 = vmatpush1.bf16.msra.mxu0 %v5943_v8  ;;  %1971 = vmatpush1.bf16.msra.mxu1 %v5945_v9 }
 0x554   :  { %1931 = vmatprep.subr.bf16.mxu0 %v5951_v10  ;;  %1972 = vmatprep.subr.bf16.mxu1 %v5953_v12 }
 0x557   :  { %1932 = vmatpush1.bf16.msra.mxu0 %v5955_v13  ;;  %1973 = vmatpush1.bf16.msra.mxu1 %v5957_v14 }
 0x558   :  { %1933 = vmatprep.subr.bf16.mxu0 %v5965_v16  ;;  %1974 = vmatprep.subr.bf16.mxu1 %v5969_v18 }
 0x55b   :  { %1934 = vmatpush1.bf16.msra.mxu0 %v5963_v15  ;;  %1975 = vmatpush1.bf16.msra.mxu1 %v5967_v17 }
 0x55c   :  { %1935 = vmatprep.subr.bf16.mxu0 %v5971_v19  ;;  %1976 = vmatprep.subr.bf16.mxu1 %v5974_v20 }
 0x55f   :  { %1936 = vmatpush1.bf16.msra.mxu0 %v5979_v21  ;;  %1977 = vmatpush1.bf16.msra.mxu1 %v5981_v22 }
 0x560   :  { %1937 = vmatprep.subr.bf16.mxu0 %v5985_v23  ;;  %1978 = vmatprep.subr.bf16.mxu1 %v5987_v24 }
 0x563   :  { %1938 = vmatpush1.bf16.msra.mxu0 %v5991_v25  ;;  %1979 = vmatpush1.bf16.msra.mxu1 %v5993_v26 }
 0x564   :  { %2245 = vmatprep.subr.bf16.mxu0 %v5903_v39  ;;  %2286 = vmatprep.subr.bf16.mxu1 %v5905_v36 }
 0x619   :  { %v1635_v46 = vpop.f32.mrb[16].mxu0  ;;  %v1676_v47 = vpop.f32.mrb[16].mxu1 }
 0x61a   :  { %v1637_v48 = vpop.f32.mrb[17].mxu0  ;;  %v1678_v34 = vpop.f32.mrb[17].mxu1  ;;  %v1683_v54 = vadd.f32 %v1635_v46, %v1404_v0 }
 0x61b   :  { %v1684_v44 = vadd.f32 %v1637_v48, %v1405_v31  ;;  %v1639_v50 = vpop.f32.mrb[18].mxu0  ;;  %v1680_v49 = vpop.f32.mrb[18].mxu1  ;;  %v1686_v48 = vadd.f32 %v1678_v34, %v1407_v28 }
 0x61c   :  { %v1640_v29 = vpop.f32.mrb[19].mxu0  ;;  %v1681_v51 = vpop.f32.mrb[19].mxu1 }
 0x61d   :  { %v1688_v27 = vand.u32 2147483647, %v1684_v44  ;;  %v1687_v30 = vmin.f32 %v1684_v44, 0.0  ;;  %v1406_v44 = vld [vmem:[#allocation13 + $0x90] sm:$0xff] }
 0x61f   :  { %v1689_v53 = vsub.f32 0.0, %v1688_v27 }
 0x621   :  { %v1690_v32 = vmul.f32 1.442695, %v1689_v53  ;;  %v1685_v53 = vadd.f32 %v1676_v47, %v1406_v44 }
 0x623   :  { %5171 = vpow2.f32 %v1690_v32  ;;  %v4638_v34 = vmul.f32 -1.442695, %v1685_v53 }
 0x62d   :  { %v5172_v62 = vpop.eup %5171 }
 0x62e   :  { %v1692_v55 = vadd.f32 1.0, %v5172_v62 }
 0x630   :  { %5173 = vlog2.f32 %v1692_v55 }
 0x631   :  { %5175 = vtanh.f32 %v1686_v48 }
 0x63a   :  { %v5174_v63 = vpop.eup %5173 }
 0x63b   :  { %v1694_v57 = vmul.f32 0.6931472, %v5174_v63  ;;  %v5176_v27 = vpop.eup %5175 }
 0x63d   :  { %v1695_v59 = vsub.f32 %v1687_v30, %v1694_v57 }
 0x63f   :  { %v1696_v58 = vadd.f32 %v1695_v59, %v6002_v38 }
 0x641   :  { %v6054_v31 = vmax.f32 %v1696_v58, %v1683_v54 }
 0x643   :  { %v1698_v50 = vsub.f32 %v1683_v54, %v6054_v31  ;;  %v1701_v49 = vsub.f32 %v1696_v58, %v6054_v31 }
 0x645   :  { %v1699_v29 = vmul.f32 1.442695, %v1698_v50  ;;  %v1702_v51 = vmul.f32 1.442695, %v1701_v49  ;;  %v1727_v49 = vld [vmem:[#allocation13 + $0xa8] sm:$0xff] }
 0x647   :  { %5177 = vpow2.f32 %v1699_v29 }
 0x648   :  { %5179 = vpow2.f32 %v1702_v51 }
 0x651   :  { %v5178_v32 = vpop.eup %5177 }
 0x652   :  { %v5180_v46 = vpop.eup %5179  ;;  %v1706_v62 = vmul.f32 %v5178_v32, %v5176_v27 }
 0x653   :  { %v1708_v38 = vmul.f32 %v5180_v46, %v6008_v60  ;;  %v1704_v55 = vmul.f32 %v5180_v46, %v6010_v61 }
 0x655   :  { %v6060_v63 = vadd.f32 %v5178_v32, %v1708_v38  ;;  %v6062_v30 = vadd.f32 %v1706_v62, %v1704_v55 }
 0x657   :  { %5181 = vrcp.f32 %v6060_v63 }
 0x658   :  { %5183 = vpow2.f32 %v4638_v34 }
 0x661   :  { %v5182_v57 = vpop.eup %5181 }
 0x662   :  { %v5184_v0 = vpop.eup %5183  ;;  %v1711_v59 = vmul.f32 %v5182_v57, %v6060_v63 }
 0x663   :  { %v1717_v54 = vadd.f32 1.0, %v5184_v0 }
 0x664   :  { %v1712_v47 = vsub.f32 2.0, %v1711_v59 }
 0x665   :  { %5185 = vrcp.f32 %v1717_v54  ;;  %v1726_v54 = vld [vmem:[#allocation13 + $0xa0] sm:$0xff] }
 0x666   :  { %v1713_v58 = vmul.f32 %v5182_v57, %v1712_v47 }
 0x668   :  { %v1720_v28 = vmul.f32 %v1713_v58, %v6062_v30 }
 0x66a   :  { %5187 = vtanh.f32 %v1720_v28 }
 0x66f   :  { %v5186_v60 = vpop.eup %5185 }
 0x674   :  { %v5188_v61 = vpop.eup %5187 }
 0x675   :  { %v6067_v48 = vmul.f32 %v5188_v61, %v5186_v60  ;;  %v1729_v61 = vld [vmem:[#allocation13 + $0xb8] sm:$0xff] }
 0x677   :  { %v1730_v50 = vpack.c.bf16 %v6067_v48, %v6067_v48 }
 0x679   :  { %1956 = vmatmul.mubr.bf16.vlgmr.msra.gmra.mrb[20].mxu0 %v1730_v50  ;;  %1997 = vmatmul.mubr.bf16.vlgmr.msra.gmra.mrb[20].mxu1 %v1730_v50 }
 0x67a   :  { %2246 = vmatpush1.bf16.msra.mxu0 %v5907_v56  ;;  %2287 = vmatpush1.bf16.msra.mxu1 %v5909_v1 }
 0x67b   :  { %2247 = vmatprep.subr.bf16.mxu0 %v5915_v40  ;;  %2288 = vmatprep.subr.bf16.mxu1 %v5917_v11 }
 0x67c   :  { %2277 = vmatprep.mubr.bf16.mxu0 %v6923_v3  ;;  %2318 = vmatprep.mubr.bf16.mxu1 %v6923_v3 }
 0x67e   :  { %2248 = vmatpush1.bf16.msra.mxu0 %v5919_v41  ;;  %2289 = vmatpush1.bf16.msra.mxu1 %v5921_v42 }
 0x67f   :  { %2249 = vmatprep.subr.bf16.mxu0 %v5927_v45  ;;  %2290 = vmatprep.subr.bf16.mxu1 %v5929_v2 }
 0x682   :  { %2250 = vmatpush1.bf16.msra.mxu0 %v5931_v4  ;;  %2291 = vmatpush1.bf16.msra.mxu1 %v5933_v5 }
 0x683   :  { %2251 = vmatprep.subr.bf16.mxu0 %v5939_v6  ;;  %2292 = vmatprep.subr.bf16.mxu1 %v5941_v7 }
 0x686   :  { %2252 = vmatpush1.bf16.msra.mxu0 %v5943_v8  ;;  %2293 = vmatpush1.bf16.msra.mxu1 %v5945_v9 }
 0x687   :  { %2253 = vmatprep.subr.bf16.mxu0 %v5951_v10  ;;  %2294 = vmatprep.subr.bf16.mxu1 %v5953_v12 }
 0x68a   :  { %2254 = vmatpush1.bf16.msra.mxu0 %v5955_v13  ;;  %2295 = vmatpush1.bf16.msra.mxu1 %v5957_v14 }
 0x68b   :  { %2255 = vmatprep.subr.bf16.mxu0 %v5965_v16  ;;  %2296 = vmatprep.subr.bf16.mxu1 %v5969_v18 }
 0x68e   :  { %2256 = vmatpush1.bf16.msra.mxu0 %v5963_v15  ;;  %2297 = vmatpush1.bf16.msra.mxu1 %v5967_v17 }
 0x68f   :  { %2257 = vmatprep.subr.bf16.mxu0 %v5971_v19  ;;  %2298 = vmatprep.subr.bf16.mxu1 %v5974_v20 }
 0x692   :  { %2258 = vmatpush1.bf16.msra.mxu0 %v5979_v21  ;;  %2299 = vmatpush1.bf16.msra.mxu1 %v5981_v22 }
 0x693   :  { %2259 = vmatprep.subr.bf16.mxu0 %v5985_v23  ;;  %2300 = vmatprep.subr.bf16.mxu1 %v5987_v24 }
 0x696   :  { %2260 = vmatpush1.bf16.msra.mxu0 %v5991_v25  ;;  %2301 = vmatpush1.bf16.msra.mxu1 %v5993_v26 }
 0x697   :  { %2567 = vmatprep.subr.bf16.mxu0 %v5903_v39  ;;  %2608 = vmatprep.subr.bf16.mxu1 %v5905_v36 }
 0x74c   :  { %v1957_v29 = vpop.f32.mrb[20].mxu0  ;;  %v1998_v51 = vpop.f32.mrb[20].mxu1 }
 0x74d   :  { %v1959_v44 = vpop.f32.mrb[21].mxu0  ;;  %v2000_v27 = vpop.f32.mrb[21].mxu1  ;;  %v2005_v28 = vadd.f32 %v1957_v29, %v1726_v54 }
 0x74e   :  { %v2006_v53 = vadd.f32 %v1959_v44, %v1727_v49  ;;  %v1961_v32 = vpop.f32.mrb[22].mxu0  ;;  %v2002_v46 = vpop.f32.mrb[22].mxu1  ;;  %v2008_v49 = vadd.f32 %v2000_v27, %v1729_v61 }
 0x74f   :  { %v1962_v62 = vpop.f32.mrb[23].mxu0  ;;  %v2003_v38 = vpop.f32.mrb[23].mxu1 }
 0x750   :  { %v2010_v55 = vand.u32 2147483647, %v2006_v53  ;;  %v2009_v47 = vmin.f32 %v2006_v53, 0.0  ;;  %v1728_v53 = vld [vmem:[#allocation13 + $0xb0] sm:$0xff] }
 0x752   :  { %v2011_v34 = vsub.f32 0.0, %v2010_v55  ;;  %v2007_v55 = vadd.f32 %v1998_v51, %v1728_v53 }
 0x754   :  { %v2012_v57 = vmul.f32 1.442695, %v2011_v34  ;;  %v4671_v27 = vmul.f32 -1.442695, %v2007_v55 }
 0x756   :  { %5189 = vpow2.f32 %v2012_v57 }
 0x760   :  { %v5190_v0 = vpop.eup %5189 }
 0x761   :  { %v2014_v59 = vadd.f32 1.0, %v5190_v0 }
 0x763   :  { %5191 = vlog2.f32 %v2014_v59 }
 0x764   :  { %5193 = vtanh.f32 %v2008_v49 }
 0x76d   :  { %v5192_v39 = vpop.eup %5191 }
 0x76e   :  { %v2016_v36 = vmul.f32 0.6931472, %v5192_v39  ;;  %v5194_v38 = vpop.eup %5193 }
 0x770   :  { %v2017_v58 = vsub.f32 %v2009_v47, %v2016_v36 }
 0x772   :  { %v2018_v60 = vadd.f32 %v2017_v58, %v6054_v31 }
 0x774   :  { %v6106_v50 = vmax.f32 %v2018_v60, %v2005_v28 }
 0x776   :  { %v2020_v44 = vsub.f32 %v2005_v28, %v6106_v50  ;;  %v2023_v32 = vsub.f32 %v2018_v60, %v6106_v50 }
 0x778   :  { %v2021_v46 = vmul.f32 1.442695, %v2020_v44  ;;  %v2024_v62 = vmul.f32 1.442695, %v2023_v32  ;;  %v2050_v32 = vld [vmem:[#allocation13 + $0xd0] sm:$0xff] }
 0x77a   :  { %5195 = vpow2.f32 %v2021_v46 }
 0x77b   :  { %5197 = vpow2.f32 %v2024_v62 }
 0x784   :  { %v5196_v34 = vpop.eup %5195 }
 0x785   :  { %v5198_v29 = vpop.eup %5197  ;;  %v2028_v57 = vmul.f32 %v5196_v34, %v5194_v38 }
 0x786   :  { %v2030_v31 = vmul.f32 %v5198_v29, %v6060_v63  ;;  %v2026_v0 = vmul.f32 %v5198_v29, %v6062_v30 }
 0x788   :  { %v6112_v59 = vadd.f32 %v5196_v34, %v2030_v31  ;;  %v6114_v39 = vadd.f32 %v2028_v57, %v2026_v0 }
 0x78a   :  { %5199 = vrcp.f32 %v6112_v59 }
 0x78b   :  { %5201 = vpow2.f32 %v4671_v27 }
 0x794   :  { %v5200_v47 = vpop.eup %5199 }
 0x795   :  { %v5202_v36 = vpop.eup %5201  ;;  %v2033_v54 = vmul.f32 %v5200_v47, %v6112_v59 }
 0x796   :  { %v2039_v58 = vadd.f32 1.0, %v5202_v36 }
 0x797   :  { %v2034_v51 = vsub.f32 2.0, %v2033_v54 }
 0x798   :  { %5203 = vrcp.f32 %v2039_v58 }
 0x799   :  { %v2035_v28 = vmul.f32 %v5200_v47, %v2034_v51 }
 0x79b   :  { %v2042_v60 = vmul.f32 %v2035_v28, %v6114_v39 }
 0x79d   :  { %5205 = vtanh.f32 %v2042_v60  ;;  %v5003_v60 = vld [vmem:[#allocation16] ss:$16 sps:$4 sm:$0xff]  }
 0x7a2   :  { %v5204_v63 = vpop.eup %5203 }
 0x7a7   :  { %v5206_v30 = vpop.eup %5205 }
 0x7a8   :  { %v6119_v61 = vmul.f32 %v5206_v30, %v5204_v63  ;;  %v5006_v63 = vld [vmem:[#allocation16 + $0x8] ss:$16 sps:$4 sm:$0xff]  }
 0x7aa   :  { %v2052_v49 = vpack.c.bf16 %v6119_v61, %v6119_v61 }
 0x7ac   :  { %2278 = vmatmul.mubr.bf16.vlgmr.msra.gmra.mrb[24].mxu0 %v2052_v49  ;;  %2319 = vmatmul.mubr.bf16.vlgmr.msra.gmra.mrb[24].mxu1 %v2052_v49  ;;  %v5011_v49 = vld [vmem:[#allocation16 + $0x24] ss:$16 sps:$4 sm:$0xff]  }
 0x7ad   :  { %2568 = vmatpush1.bf16.msra.mxu0 %v5907_v56  ;;  %2609 = vmatpush1.bf16.msra.mxu1 %v5909_v1  ;;  %v5005_v56 = vld [vmem:[#allocation16 + $0x4] ss:$16 sps:$4 sm:$0xff]   ;;  %v5008_v1 = vld [vmem:[#allocation16 + $0xc] ss:$16 sps:$4 sm:$0xff]  }
 0x7ae   :  { %2569 = vmatprep.subr.bf16.mxu0 %v5915_v40  ;;  %2610 = vmatprep.subr.bf16.mxu1 %v5917_v11  ;;  %v2049_v40 = vld [vmem:[#allocation13 + $0xc8] sm:$0xff] }
 0x7af   :  { %2599 = vmatprep.mubr.bf16.mxu0 %v6923_v3  ;;  %2640 = vmatprep.mubr.bf16.mxu1 %v6923_v3 }
 0x7b1   :  { %2570 = vmatpush1.bf16.msra.mxu0 %v5919_v41  ;;  %2611 = vmatpush1.bf16.msra.mxu1 %v5921_v42 }
 0x7b2   :  { %2571 = vmatprep.subr.bf16.mxu0 %v5927_v45  ;;  %2612 = vmatprep.subr.bf16.mxu1 %v5929_v2 }
 0x7b5   :  { %2572 = vmatpush1.bf16.msra.mxu0 %v5931_v4  ;;  %2613 = vmatpush1.bf16.msra.mxu1 %v5933_v5 }
 0x7b6   :  { %2573 = vmatprep.subr.bf16.mxu0 %v5939_v6  ;;  %2614 = vmatprep.subr.bf16.mxu1 %v5941_v7 }
 0x7b9   :  { %2574 = vmatpush1.bf16.msra.mxu0 %v5943_v8  ;;  %2615 = vmatpush1.bf16.msra.mxu1 %v5945_v9 }
 0x7ba   :  { %2575 = vmatprep.subr.bf16.mxu0 %v5951_v10  ;;  %2616 = vmatprep.subr.bf16.mxu1 %v5953_v12 }
 0x7bd   :  { %2576 = vmatpush1.bf16.msra.mxu0 %v5955_v13  ;;  %2617 = vmatpush1.bf16.msra.mxu1 %v5957_v14 }
 0x7be   :  { %2577 = vmatprep.subr.bf16.mxu0 %v5965_v16  ;;  %2618 = vmatprep.subr.bf16.mxu1 %v5969_v18 }
 0x7c1   :  { %2578 = vmatpush1.bf16.msra.mxu0 %v5963_v15  ;;  %2619 = vmatpush1.bf16.msra.mxu1 %v5967_v17  ;;  %v2048_v17 = vld [vmem:[#allocation13 + $0xc0] sm:$0xff] }
 0x7c2   :  { %2579 = vmatprep.subr.bf16.mxu0 %v5971_v19  ;;  %2620 = vmatprep.subr.bf16.mxu1 %v5974_v20 }
 0x7c5   :  { %2580 = vmatpush1.bf16.msra.mxu0 %v5979_v21  ;;  %2621 = vmatpush1.bf16.msra.mxu1 %v5981_v22  ;;  %v2051_v21 = vld [vmem:[#allocation13 + $0xd8] sm:$0xff] }
 0x7c6   :  { %2581 = vmatprep.subr.bf16.mxu0 %v5985_v23  ;;  %2622 = vmatprep.subr.bf16.mxu1 %v5987_v24 }
 0x7c9   :  { %2582 = vmatpush1.bf16.msra.mxu0 %v5991_v25  ;;  %2623 = vmatpush1.bf16.msra.mxu1 %v5993_v26 }
 0x7ca   :  { %2921 = vmatprep.subr.bf16.mxu0 %v5005_v56  ;;  %2994 = vmatprep.subr.bf16.mxu1 %v5008_v1  ;;  %v5014_v56 = vld [vmem:[#allocation16 + $0x2c] ss:$16 sps:$4 sm:$0xff]   ;;  %v5009_v1 = vld [vmem:[#allocation16 + $0x20] ss:$16 sps:$4 sm:$0xff]  }
 0x87f   :  { %v2279_v11 = vpop.f32.mrb[24].mxu0  ;;  %v2320_v41 = vpop.f32.mrb[24].mxu1 }
 0x880   :  { %v2281_v42 = vpop.f32.mrb[25].mxu0  ;;  %v2322_v45 = vpop.f32.mrb[25].mxu1  ;;  %v2327_v19 = vadd.f32 %v2279_v11, %v2048_v17  ;;  %v2329_v62 = vadd.f32 %v2320_v41, %v2050_v32  ;;  %v5017_v11 = vld [vmem:[#allocation16 + $0x44] ss:$16 sps:$4 sm:$0xff]   ;;  %v5020_v41 = vld [vmem:[#allocation16 + $0x4c] ss:$16 sps:$4 sm:$0xff]  }
 0x881   :  { %v2328_v2 = vadd.f32 %v2281_v42, %v2049_v40  ;;  %v2283_v4 = vpop.f32.mrb[26].mxu0  ;;  %v2324_v5 = vpop.f32.mrb[26].mxu1  ;;  %v2330_v23 = vadd.f32 %v2322_v45, %v2051_v21  ;;  %v5012_v40 = vld [vmem:[#allocation16 + $0x28] ss:$16 sps:$4 sm:$0xff]   ;;  %v5015_v42 = vld [vmem:[#allocation16 + $0x40] ss:$16 sps:$4 sm:$0xff]  }
 0x882   :  { %v2284_v6 = vpop.f32.mrb[27].mxu0  ;;  %v2325_v7 = vpop.f32.mrb[27].mxu1  ;;  %v4704_v29 = vmul.f32 -1.442695, %v2329_v62  ;;  %v5018_v45 = vld [vmem:[#allocation16 + $0x48] ss:$16 sps:$4 sm:$0xff]  }
 0x883   :  { %v2332_v8 = vand.u32 2147483647, %v2328_v2  ;;  %v2331_v15 = vmin.f32 %v2328_v2, 0.0  ;;  %v5023_v2 = vld [vmem:[#allocation16 + $0x64] ss:$16 sps:$4 sm:$0xff]  }
 0x884   :  { %v5026_v4 = vld [vmem:[#allocation16 + $0x6c] ss:$16 sps:$4 sm:$0xff]   ;;  %v5021_v5 = vld [vmem:[#allocation16 + $0x60] ss:$16 sps:$4 sm:$0xff]   ;;  %v5024_v6 = vld [vmem:[#allocation16 + $0x68] ss:$16 sps:$4 sm:$0xff]  }
 0x885   :  { %v2333_v9 = vsub.f32 0.0, %v2332_v8  ;;  %v5029_v7 = vld [vmem:[#allocation16 + $0x84] ss:$16 sps:$4 sm:$0xff]   ;;  %v5032_v8 = vld [vmem:[#allocation16 + $0x8c] ss:$16 sps:$4 sm:$0xff]  }
 0x886   :  { %v5044_v17 = vld [vmem:[#allocation16 + $0xcc] ss:$16 sps:$4 sm:$0xff]   ;;  %v6203_v32 = vld [vmem:[#allocation17 + $0x20] ss:$16 sps:$4 sm:$0xff]   ;;  %v6211_v62 = vld [vmem:[#allocation17 + $0x44] ss:$16 sps:$4 sm:$0xff]  }
 0x887   :  { %v2334_v10 = vmul.f32 1.442695, %v2333_v9  ;;  %v5027_v9 = vld [vmem:[#allocation16 + $0x80] ss:$16 sps:$4 sm:$0xff]   ;;  %v5050_v21 = vld [vmem:[#allocation16 + $0xec] ss:$16 sps:$4 sm:$0xff]  }
 0x889   :  { %5207 = vpow2.f32 %v2334_v10  ;;  %v5030_v10 = vld [vmem:[#allocation16 + $0x88] ss:$16 sps:$4 sm:$0xff]  }
 0x893   :  { %v5208_v12 = vpop.eup %5207 }
 0x894   :  { %v2336_v13 = vadd.f32 1.0, %v5208_v12  ;;  %v5035_v12 = vld [vmem:[#allocation16 + $0xa4] ss:$16 sps:$4 sm:$0xff]  }
 0x896   :  { %5209 = vlog2.f32 %v2336_v13  ;;  %v5038_v13 = vld [vmem:[#allocation16 + $0xac] ss:$16 sps:$4 sm:$0xff]  }
 0x897   :  { %5211 = vtanh.f32 %v2330_v23  ;;  %v5045_v23 = vld [vmem:[#allocation16 + $0xe0] ss:$16 sps:$4 sm:$0xff]  }
 0x8a0   :  { %v5210_v14 = vpop.eup %5209 }
 0x8a1   :  { %v2338_v16 = vmul.f32 0.6931472, %v5210_v14  ;;  %v5212_v46 = vpop.eup %5211  ;;  %v5033_v14 = vld [vmem:[#allocation16 + $0xa0] ss:$16 sps:$4 sm:$0xff]  }
 0x8a3   :  { %v2339_v18 = vsub.f32 %v2331_v15, %v2338_v16  ;;  %v5036_v15 = vld [vmem:[#allocation16 + $0xa8] ss:$16 sps:$4 sm:$0xff]   ;;  %v5041_v16 = vld [vmem:[#allocation16 + $0xc4] ss:$16 sps:$4 sm:$0xff]  }
 0x8a5   :  { %v2340_v20 = vadd.f32 %v2339_v18, %v6106_v50  ;;  %v5039_v18 = vld [vmem:[#allocation16 + $0xc0] ss:$16 sps:$4 sm:$0xff]  }
 0x8a7   :  { %v6156_v22 = vmax.f32 %v2340_v20, %v2327_v19 }
 0x8a9   :  { %v2342_v24 = vsub.f32 %v2327_v19, %v6156_v22  ;;  %v2345_v25 = vsub.f32 %v2340_v20, %v6156_v22  ;;  %v5042_v19 = vld [vmem:[#allocation16 + $0xc8] ss:$16 sps:$4 sm:$0xff]   ;;  %v5047_v20 = vld [vmem:[#allocation16 + $0xe4] ss:$16 sps:$4 sm:$0xff]  }
 0x8ab   :  { %v2343_v26 = vmul.f32 1.442695, %v2342_v24  ;;  %v2346_v44 = vmul.f32 1.442695, %v2345_v25  ;;  %v5048_v24 = vld [vmem:[#allocation16 + $0xe8] ss:$16 sps:$4 sm:$0xff]   ;;  %v2703_v25 = vpack.c.bf16 %v5847_v43, %v5795_v52 }
 0x8ac   :  { %v6187_v52 = vld [vmem:[#allocation17 + $0x4] ss:$16 sps:$4 sm:$0xff]   ;;  %v6189_v43 = vld [vmem:[#allocation17 + $0xc] ss:$16 sps:$4 sm:$0xff]  }
 0x8ad   :  { %5213 = vpow2.f32 %v2343_v26  ;;  %v2704_v26 = vpack.c.bf16 %v6015_v35, %v5897_v37  ;;  %v6191_v37 = vld [vmem:[#allocation17] ss:$16 sps:$4 sm:$0xff]   ;;  %v6193_v35 = vld [vmem:[#allocation17 + $0x8] ss:$16 sps:$4 sm:$0xff]  }
 0x8ae   :  { %5215 = vpow2.f32 %v2346_v44  ;;  %v2705_v44 = vpack.c.bf16 %v6119_v61, %v6067_v48  ;;  %v6199_v48 = vld [vmem:[#allocation17 + $0x24] ss:$16 sps:$4 sm:$0xff]   ;;  %v6201_v61 = vld [vmem:[#allocation17 + $0x2c] ss:$16 sps:$4 sm:$0xff]  }
 0x8b7   :  { %v5214_v53 = vpop.eup %5213 }
 0x8b8   :  { %v5216_v38 = vpop.eup %5215  ;;  %v2350_v55 = vmul.f32 %v5214_v53, %v5212_v46  ;;  %v6205_v46 = vld [vmem:[#allocation17 + $0x28] ss:$16 sps:$4 sm:$0xff]  }
 0x8b9   :  { %v2352_v50 = vmul.f32 %v5216_v38, %v6112_v59  ;;  %v2348_v34 = vmul.f32 %v5216_v38, %v6114_v39  ;;  %v6215_v38 = vld [vmem:[#allocation17 + $0x40] ss:$16 sps:$4 sm:$0xff]  }
 0x8bb   :  { %v6162_v57 = vadd.f32 %v5214_v53, %v2352_v50  ;;  %v6164_v31 = vadd.f32 %v2350_v55, %v2348_v34  ;;  %v6213_v53 = vld [vmem:[#allocation17 + $0x4c] ss:$16 sps:$4 sm:$0xff]   ;;  %v6217_v55 = vld [vmem:[#allocation17 + $0x48] ss:$16 sps:$4 sm:$0xff]   ;;  %v6223_v50 = vld [vmem:[#allocation17 + $0x64] ss:$16 sps:$4 sm:$0xff]  }
 0x8bc   :  { %v6225_v34 = vld [vmem:[#allocation17 + $0x60] ss:$16 sps:$4 sm:$0xff]  }
 0x8bd   :  { %5217 = vrcp.f32 %v6162_v57 }
 0x8be   :  { %5219 = vpow2.f32 %v4704_v29  ;;  %v6227_v29 = vld [vmem:[#allocation17 + $0x6c] ss:$16 sps:$4 sm:$0xff]  }
 0x8c7   :  { %v5218_v0 = vpop.eup %5217 }
 0x8c8   :  { %v5220_v27 = vpop.eup %5219  ;;  %v2355_v47 = vmul.f32 %v5218_v0, %v6162_v57 }
 0x8c9   :  { %v2361_v54 = vadd.f32 1.0, %v5220_v27  ;;  %v6231_v27 = vld [vmem:[#allocation17 + $0x84] ss:$16 sps:$4 sm:$0xff]  }
 0x8ca   :  { %v2356_v36 = vsub.f32 2.0, %v2355_v47  ;;  %v6235_v47 = vld [vmem:[#allocation17 + $0x8c] ss:$16 sps:$4 sm:$0xff]  }
 0x8cb   :  { %5221 = vrcp.f32 %v2361_v54  ;;  %v6241_v54 = vld [vmem:[#allocation17 + $0x88] ss:$16 sps:$4 sm:$0xff]  }
 0x8cc   :  { %v2357_v51 = vmul.f32 %v5218_v0, %v2356_v36  ;;  %v6229_v0 = vld [vmem:[#allocation17 + $0x68] ss:$16 sps:$4 sm:$0xff]   ;;  %v6239_v36 = vld [vmem:[#allocation17 + $0x80] ss:$16 sps:$4 sm:$0xff]  }
 0x8ce   :  { %v2364_v58 = vmul.f32 %v2357_v51, %v6164_v31  ;;  %v6245_v51 = vld [vmem:[#allocation17 + $0xa4] ss:$16 sps:$4 sm:$0xff]  }
 0x8d0   :  { %5223 = vtanh.f32 %v2364_v58  ;;  %v6247_v58 = vld [vmem:[#allocation17 + $0xac] ss:$16 sps:$4 sm:$0xff]  }
 0x8d5   :  { %v5222_v59 = vpop.eup %5221 }
 0x8da   :  { %v5224_v39 = vpop.eup %5223 }
 0x8db   :  { %v6169_v28 = vmul.f32 %v5224_v39, %v5222_v59  ;;  %v6251_v59 = vld [vmem:[#allocation17 + $0xa0] ss:$16 sps:$4 sm:$0xff]   ;;  %v6253_v39 = vld [vmem:[#allocation17 + $0xa8] ss:$16 sps:$4 sm:$0xff]  }
 0x8dd   :  { %v2374_v30 = vpack.c.bf16 %v6169_v28, %v6169_v28 }
 0x8df   :  { %2600 = vmatmul.mubr.bf16.vlgmr.msra.gmra.mrb[28].mxu0 %v2374_v30  ;;  %2641 = vmatmul.mubr.bf16.vlgmr.msra.gmra.mrb[28].mxu1 %v2374_v30  ;;  %v6264_v30 = vld [vmem:[#allocation17 + $0xc0] ss:$16 sps:$4 sm:$0xff]  }
 0x8e0   :  { %2922 = vmatpush1.bf16.msra.mxu0 %v5003_v60  ;;  %2995 = vmatpush1.bf16.msra.mxu1 %v5006_v63  ;;  %v6257_v60 = vld [vmem:[#allocation17 + $0xc4] ss:$16 sps:$4 sm:$0xff]   ;;  %v6262_v63 = vld [vmem:[#allocation17 + $0xcc] ss:$16 sps:$4 sm:$0xff]  }
 0x8e1   :  { %2923 = vmatprep.subr.bf16.mxu0 %v5011_v49  ;;  %2996 = vmatprep.subr.bf16.mxu1 %v5014_v56  ;;  %v6266_v49 = vld [vmem:[#allocation17 + $0xc8] ss:$16 sps:$4 sm:$0xff]   ;;  %v6269_v56 = vld [vmem:[#allocation17 + $0xe4] ss:$16 sps:$4 sm:$0xff]  }
 0x8e2   :  { %2953 = vmatprep.mubr.bf16.mxu0 %v6923_v3  ;;  %3026 = vmatprep.mubr.bf16.mxu1 %v6923_v3 }
 0x8e4   :  { %2924 = vmatpush1.bf16.msra.mxu0 %v5009_v1  ;;  %2997 = vmatpush1.bf16.msra.mxu1 %v5012_v40  ;;  %v6271_v1 = vld [vmem:[#allocation17 + $0xec] ss:$16 sps:$4 sm:$0xff]   ;;  %v6275_v40 = vld [vmem:[#allocation17 + $0xe0] ss:$16 sps:$4 sm:$0xff]  }
 0x8e5   :  { %2925 = vmatprep.subr.bf16.mxu0 %v5017_v11  ;;  %2998 = vmatprep.subr.bf16.mxu1 %v5020_v41  ;;  %v6277_v11 = vld [vmem:[#allocation17 + $0xe8] ss:$16 sps:$4 sm:$0xff]  }
 0x8e6   :  { %v2371_v41 = vld [vmem:[#allocation13 + $0xe8] sm:$0xff] }
 0x8e8   :  { %2926 = vmatpush1.bf16.msra.mxu0 %v5015_v42  ;;  %2999 = vmatpush1.bf16.msra.mxu1 %v5018_v45 }
 0x8e9   :  { %2927 = vmatprep.subr.bf16.mxu0 %v5023_v2  ;;  %3000 = vmatprep.subr.bf16.mxu1 %v5026_v4 }
 0x8ec   :  { %2928 = vmatpush1.bf16.msra.mxu0 %v5021_v5  ;;  %3001 = vmatpush1.bf16.msra.mxu1 %v5024_v6 }
 0x8ed   :  { %2929 = vmatprep.subr.bf16.mxu0 %v5029_v7  ;;  %3002 = vmatprep.subr.bf16.mxu1 %v5032_v8 }
 0x8f0   :  { %2930 = vmatpush1.bf16.msra.mxu0 %v5027_v9  ;;  %3003 = vmatpush1.bf16.msra.mxu1 %v5030_v10 }
 0x8f1   :  { %2931 = vmatprep.subr.bf16.mxu0 %v5035_v12  ;;  %3004 = vmatprep.subr.bf16.mxu1 %v5038_v13 }
 0x8f4   :  { %2932 = vmatpush1.bf16.msra.mxu0 %v5033_v14  ;;  %3005 = vmatpush1.bf16.msra.mxu1 %v5036_v15 }
 0x8f5   :  { %2933 = vmatprep.subr.bf16.mxu0 %v5041_v16  ;;  %3006 = vmatprep.subr.bf16.mxu1 %v5044_v17 }
 0x8f8   :  { %2934 = vmatpush1.bf16.msra.mxu0 %v5039_v18  ;;  %3007 = vmatpush1.bf16.msra.mxu1 %v5042_v19 }
 0x8f9   :  { %2935 = vmatprep.subr.bf16.mxu0 %v5047_v20  ;;  %3008 = vmatprep.subr.bf16.mxu1 %v5050_v21 }
 0x8fc   :  { %2936 = vmatpush1.bf16.msra.mxu0 %v5045_v23  ;;  %3009 = vmatpush1.bf16.msra.mxu1 %v5048_v24 }
 0x8fd   :  { %3305 = vmatprep.subr.bf16.mxu0 %v6187_v52  ;;  %3346 = vmatprep.subr.bf16.mxu1 %v6189_v43 }
 0x8ff   :  { %2954 = vmatmul.mubr.bf16.vlgmr.msra.gmra.mrb[32].mxu0 %v2703_v25  ;;  %3027 = vmatmul.mubr.bf16.vlgmr.msra.gmra.mrb[32].mxu1 %v2703_v25 }
 0x900   :  { %2963 = vmatprep.mubr.bf16.mxu0 %v6923_v3  ;;  %3036 = vmatprep.mubr.bf16.mxu1 %v6923_v3 }
 0x901   :  { %3306 = vmatpush1.bf16.msra.mxu0 %v6191_v37  ;;  %3347 = vmatpush1.bf16.msra.mxu1 %v6193_v35 }
 0x902   :  { %3307 = vmatprep.subr.bf16.mxu0 %v6199_v48  ;;  %3348 = vmatprep.subr.bf16.mxu1 %v6201_v61 }
 0x905   :  { %3308 = vmatpush1.bf16.msra.mxu0 %v6203_v32  ;;  %3349 = vmatpush1.bf16.msra.mxu1 %v6205_v46 }
 0x906   :  { %3309 = vmatprep.subr.bf16.mxu0 %v6211_v62  ;;  %3350 = vmatprep.subr.bf16.mxu1 %v6213_v53 }
 0x907   :  { %2964 = vmatmul.mubr.bf16.gmra.mrb[36].mxu0 %v2704_v26  ;;  %3037 = vmatmul.mubr.bf16.gmra.mrb[36].mxu1 %v2704_v26  ;;  %v2370_v26 = vld [vmem:[#allocation13 + $0xe0] sm:$0xff] }
 0x908   :  { %2973 = vmatprep.mubr.bf16.mxu0 %v6923_v3  ;;  %3046 = vmatprep.mubr.bf16.mxu1 %v6923_v3 }
 0x909   :  { %3310 = vmatpush1.bf16.msra.mxu0 %v6215_v38  ;;  %3351 = vmatpush1.bf16.msra.mxu1 %v6217_v55 }
 0x90a   :  { %3311 = vmatprep.subr.bf16.mxu0 %v6223_v50  ;;  %3352 = vmatprep.subr.bf16.mxu1 %v6227_v29 }
 0x90d   :  { %3312 = vmatpush1.bf16.msra.mxu0 %v6225_v34  ;;  %3353 = vmatpush1.bf16.msra.mxu1 %v6229_v0 }
 0x90e   :  { %3313 = vmatprep.subr.bf16.mxu0 %v6231_v27  ;;  %3354 = vmatprep.subr.bf16.mxu1 %v6235_v47 }
 0x90f   :  { %2974 = vmatmul.mubr.bf16.gmra.mrb[40].mxu0 %v2705_v44  ;;  %3047 = vmatmul.mubr.bf16.gmra.mrb[40].mxu1 %v2705_v44 }
 0x910   :  { %2983 = vmatprep.mubr.bf16.mxu0 %v6923_v3  ;;  %3056 = vmatprep.mubr.bf16.mxu1 %v6923_v3 }
 0x911   :  { %3314 = vmatpush1.bf16.msra.mxu0 %v6239_v36  ;;  %3355 = vmatpush1.bf16.msra.mxu1 %v6241_v54 }
 0x912   :  { %3315 = vmatprep.subr.bf16.mxu0 %v6245_v51  ;;  %3356 = vmatprep.subr.bf16.mxu1 %v6247_v58 }
 0x915   :  { %3316 = vmatpush1.bf16.msra.mxu0 %v6251_v59  ;;  %3357 = vmatpush1.bf16.msra.mxu1 %v6253_v39 }
 0x916   :  { %3317 = vmatprep.subr.bf16.mxu0 %v6257_v60  ;;  %3358 = vmatprep.subr.bf16.mxu1 %v6262_v63 }
 0x919   :  { %3318 = vmatpush1.bf16.msra.mxu0 %v6264_v30  ;;  %3359 = vmatpush1.bf16.msra.mxu1 %v6266_v49 }
 0x91a   :  { %3319 = vmatprep.subr.bf16.mxu0 %v6269_v56  ;;  %3360 = vmatprep.subr.bf16.mxu1 %v6271_v1 }
 0x91d   :  { %3320 = vmatpush1.bf16.msra.mxu0 %v6275_v40  ;;  %3361 = vmatpush1.bf16.msra.mxu1 %v6277_v11 }
 0x91e   :  { %3438 = vmatprep.subr.bf16.mxu0 %v6187_v52  ;;  %3479 = vmatprep.subr.bf16.mxu1 %v6189_v43 }
 0x9b2   :  { %v2601_v42 = vpop.f32.mrb[28].mxu0  ;;  %v2642_v45 = vpop.f32.mrb[28].mxu1 }
 0x9b3   :  { %v2603_v2 = vpop.f32.mrb[29].mxu0  ;;  %v2644_v4 = vpop.f32.mrb[29].mxu1 }
 0x9b4   :  { %v2650_v5 = vadd.f32 %v2603_v2, %v2371_v41  ;;  %v2605_v6 = vpop.f32.mrb[30].mxu0  ;;  %v2646_v7 = vpop.f32.mrb[30].mxu1 }
 0x9b5   :  { %v2606_v8 = vpop.f32.mrb[31].mxu0  ;;  %v2647_v9 = vpop.f32.mrb[31].mxu1  ;;  %v2649_v6 = vadd.f32 %v2601_v42, %v2370_v26 }
 0x9b6   :  { %v2654_v10 = vand.u32 2147483647, %v2650_v5  ;;  %v2653_v21 = vmin.f32 %v2650_v5, 0.0  ;;  %v2373_v8 = vld [vmem:[#allocation13 + $0xf8] sm:$0xff] }
 0x9b7   :  { %v2652_v5 = vadd.f32 %v2644_v4, %v2373_v8 }
 0x9b8   :  { %v2655_v12 = vsub.f32 0.0, %v2654_v10 }
 0x9ba   :  { %v2656_v13 = vmul.f32 1.442695, %v2655_v12 }
 0x9bc   :  { %5225 = vpow2.f32 %v2656_v13 }
 0x9c6   :  { %v5226_v14 = vpop.eup %5225 }
 0x9c7   :  { %v2658_v15 = vadd.f32 1.0, %v5226_v14 }
 0x9c9   :  { %5227 = vlog2.f32 %v2658_v15 }
 0x9ca   :  { %5229 = vtanh.f32 %v2652_v5 }
 0x9d2   :  { %v6285_v16 = vpop.f32.mrb[32].mxu0  ;;  %v6287_v17 = vpop.f32.mrb[32].mxu1 }
 0x9d3   :  { %v5228_v18 = vpop.eup %5227  ;;  %v6289_v19 = vpop.f32.mrb[33].mxu0 }
 0x9d4   :  { %v6291_v20 = vpop.f32.mrb[33].mxu1  ;;  %v2660_v23 = vmul.f32 0.6931472, %v5228_v18  ;;  %v6293_v24 = vpop.f32.mrb[34].mxu0 }
 0x9d5   :  { %v6295_v25 = vpop.f32.mrb[34].mxu1  ;;  %v6297_v44 = vpop.f32.mrb[35].mxu0 }
 0x9d6   :  { %v6299_v41 = vpop.f32.mrb[35].mxu1  ;;  %v2661_v2 = vsub.f32 %v2653_v21, %v2660_v23  ;;  %v5230_v5 = vpop.eup %5229 }
 0x9d7   :  { %6929 = vst [vmem:[#allocation23_spill] sm:$0xff] %v6299_v41 }
 0x9d8   :  { %v2662_v7 = vadd.f32 %v2661_v2, %v6156_v22 }
 0x9da   :  { %v2663_v9 = vmax.f32 %v2662_v7, %v2649_v6  ;;  %v6302_v10 = vpop.f32.mrb[36].mxu0  ;;  %v6304_v12 = vpop.f32.mrb[36].mxu1 }
 0x9db   :  { %6930 = vst [vmem:[#allocation24_spill] sm:$0xff] %v6302_v10  ;;  %6931 = vst [vmem:[#allocation25_spill] sm:$0xff] %v6304_v12  ;;  %v6306_v13 = vpop.f32.mrb[37].mxu0  ;;  %v6308_v14 = vpop.f32.mrb[37].mxu1 }
 0x9dc   :  { %6932 = vst [vmem:[#allocation26_spill] sm:$0xff] %v6306_v13  ;;  %6933 = vst [vmem:[#allocation27_spill] sm:$0xff] %v6308_v14  ;;  %v2664_v15 = vsub.f32 %v2649_v6, %v2663_v9  ;;  %v2667_v18 = vsub.f32 %v2662_v7, %v2663_v9  ;;  %v6310_v33 = vpop.f32.mrb[38].mxu0  ;;  %v6312_v3 = vpop.f32.mrb[38].mxu1 }
 0x9dd   :  { %6934 = vst [vmem:[#allocation28_spill] sm:$0xff] %v6310_v33  ;;  %6935 = vst [vmem:[#allocation29_spill] sm:$0xff] %v6312_v3  ;;  %v6314_v42 = vpop.f32.mrb[39].mxu0  ;;  %v6316_v22 = vpop.f32.mrb[39].mxu1 }
 0x9de   :  { %6936 = vst [vmem:[#allocation30_spill] sm:$0xff] %v6314_v42  ;;  %6937 = vst [vmem:[#allocation31_spill] sm:$0xff] %v6316_v22  ;;  %v2665_v21 = vmul.f32 1.442695, %v2664_v15  ;;  %v2668_v23 = vmul.f32 1.442695, %v2667_v18 }
 0x9df   :  { %v2372_v15 = vld [vmem:[#allocation13 + $0xf0] sm:$0xff] }
 0x9e0   :  { %5231 = vpow2.f32 %v2665_v21  ;;  %v2651_v18 = vadd.f32 %v2642_v45, %v2372_v15 }
 0x9e1   :  { %5233 = vpow2.f32 %v2668_v23 }
 0x9e2   :  { %v6318_v4 = vpop.f32.mrb[40].mxu0  ;;  %v6320_v26 = vpop.f32.mrb[40].mxu1  ;;  %v4737_v42 = vmul.f32 -1.442695, %v2651_v18 }
 0x9e3   :  { %6938 = vst [vmem:[#allocation32_spill] sm:$0xff] %v6318_v4  ;;  %6939 = vst [vmem:[#allocation33_spill] sm:$0xff] %v6320_v26  ;;  %v6322_v2 = vpop.f32.mrb[41].mxu0  ;;  %v6324_v6 = vpop.f32.mrb[41].mxu1 }
 0x9e4   :  { %6940 = vst [vmem:[#allocation34_spill] sm:$0xff] %v6322_v2  ;;  %6941 = vst [vmem:[#allocation35_spill] sm:$0xff] %v6324_v6  ;;  %v6326_v7 = vpop.f32.mrb[42].mxu0  ;;  %v6328_v8 = vpop.f32.mrb[42].mxu1 }
 0x9e5   :  { %6942 = vst [vmem:[#allocation36_spill] sm:$0xff] %v6326_v7  ;;  %6943 = vst [vmem:[#allocation37_spill] sm:$0xff] %v6328_v8  ;;  %v6330_v9 = vpop.f32.mrb[43].mxu0  ;;  %v6332_v22 = vpop.f32.mrb[43].mxu1 }
 0x9e6   :  { %6944 = vst [vmem:[#allocation38_spill] sm:$0xff] %v6330_v9  ;;  %6945 = vst [vmem:[#allocation39_spill] sm:$0xff] %v6332_v22 }
 0x9ea   :  { %v5232_v21 = vpop.eup %5231 }
 0x9eb   :  { %v5234_v23 = vpop.eup %5233  ;;  %v2672_v4 = vmul.f32 %v5232_v21, %v5230_v5 }
 0x9ec   :  { %v2674_v26 = vmul.f32 %v5234_v23, %v6162_v57  ;;  %v2670_v2 = vmul.f32 %v5234_v23, %v6164_v31  ;;  %v6946_v31 = vmov 0  }
 0x9ee   :  { %v2673_v6 = vadd.f32 %v2672_v4, %v2670_v2  ;;  %v2675_v3 = vadd.f32 %v5232_v21, %v2674_v26 }
 0x9f0   :  { %5235 = vrcp.f32 %v2675_v3 }
 0x9f1   :  { %5237 = vpow2.f32 %v4737_v42  ;;  %v6947_v42 = vmov 0.0|0.0  }
 0x9fa   :  { %v5236_v8 = vpop.eup %5235 }
 0x9fb   :  { %v5238_v7 = vpop.eup %5237  ;;  %v2677_v9 = vmul.f32 %v5236_v8, %v2675_v3  ;;  %v2741_v3 = vlaneseq }
 0x9fc   :  { %v2683_v22 = vadd.f32 1.0, %v5238_v7 }
 0x9fd   :  { %v2678_v33 = vsub.f32 2.0, %v2677_v9 }
 0x9fe   :  { %5239 = vrcp.f32 %v2683_v22 }
 0x9ff   :  { %v2679_v14 = vmul.f32 %v5236_v8, %v2678_v33  ;;  %v2742_v33 = vshrl.u32 %v2741_v3, 7 }
 0xa01   :  { %v2686_v13 = vmul.f32 %v2679_v14, %v2673_v6  ;;  %v2739_v14 = vld [vmem:[%s6917_s5] sm:$0xf]  ;;  %v2747_v22 = vsub.s32 1, %v2742_v33  ;;  %v2755_v4 = vsub.s32 3, %v2742_v33  ;;  %s3428_s5 = sld [smem:[#allocation10]] }
 0xa03   :  { %5241 = vtanh.f32 %v2686_v13  ;;  %v2751_v13 = vsub.s32 2, %v2742_v33 }
 0xa05   :  { %v6392_v21 = vrot.slane %v2739_v14, %v2751_v13 }
 0xa07   :  { %v3029_v3 = vadd.f32 %v6287_v17, %v6392_v21 }
 0xa08   :  { %v5240_v45 = vpop.eup %5239 }
 0xa0d   :  { %v5242_v15 = vpop.eup %5241 }
 0xa0e   :  { %v2688_v5 = vmul.f32 %v5242_v15, %v5240_v45  ;;  %v6398_v15 = vrot.slane %v2739_v14, %v2747_v22 }
 0xa10   :  { %v2706_v57 = vpack.c.bf16 %v2688_v5, %v6169_v28  ;;  %v2743_v28 = vsub.s32 0, %v2742_v33  ;;  %v6400_v5 = vrot.slane %v2739_v14, %v2755_v4  ;;  %v2958_v33 = vadd.f32 %v6289_v19, %v6398_v15 }
 0xa12   :  { %2984 = vmatmul.mubr.bf16.gmra.mrb[44].mxu0 %v2706_v57  ;;  %3057 = vmatmul.mubr.bf16.gmra.mrb[44].mxu1 %v2706_v57  ;;  %v6390_v18 = vrot.slane %v2739_v14, %v2743_v28  ;;  %6956 = vst [vmem:[#allocation48_spill] sm:$0xff] %v6400_v5  ;;  %v3031_v28 = vadd.f32 %v6291_v20, %v6400_v5 }
 0xa13   :  { %3337 = vmatprep.mubr.bf16.mxu0 %v6946_v31  ;;  %3378 = vmatprep.mubr.bf16.mxu1 %v6946_v31 }
 0xa14   :  { %v2956_v57 = vadd.f32 %v6285_v16, %v6390_v18 }
 0xa1a   :  { %3338 = vmatmul.mubr.bf16.vlgmr.msra.gmra.mrb[48].mxu0 %v6947_v42  ;;  %3379 = vmatmul.mubr.bf16.vlgmr.msra.gmra.mrb[48].mxu1 %v6947_v42 }
 0xa1b   :  { %3439 = vmatpush1.bf16.msra.mxu0 %v6191_v37  ;;  %3480 = vmatpush1.bf16.msra.mxu1 %v6193_v35 }
 0xa1c   :  { %3440 = vmatprep.subr.bf16.mxu0 %v6199_v48  ;;  %3481 = vmatprep.subr.bf16.mxu1 %v6201_v61 }
 0xa1d   :  { %3470 = vmatprep.mubr.bf16.mxu0 %v6946_v31  ;;  %3511 = vmatprep.mubr.bf16.mxu1 %v6946_v31 }
 0xa1f   :  { %3441 = vmatpush1.bf16.msra.mxu0 %v6203_v32  ;;  %3482 = vmatpush1.bf16.msra.mxu1 %v6205_v46 }
 0xa20   :  { %3442 = vmatprep.subr.bf16.mxu0 %v6211_v62  ;;  %3483 = vmatprep.subr.bf16.mxu1 %v6213_v53 }
 0xa23   :  { %3443 = vmatpush1.bf16.msra.mxu0 %v6215_v38  ;;  %3484 = vmatpush1.bf16.msra.mxu1 %v6217_v55 }
 0xa24   :  { %3444 = vmatprep.subr.bf16.mxu0 %v6223_v50  ;;  %3485 = vmatprep.subr.bf16.mxu1 %v6227_v29 }
 0xa27   :  { %3445 = vmatpush1.bf16.msra.mxu0 %v6225_v34  ;;  %3486 = vmatpush1.bf16.msra.mxu1 %v6229_v0 }
 0xa28   :  { %3446 = vmatprep.subr.bf16.mxu0 %v6231_v27  ;;  %3487 = vmatprep.subr.bf16.mxu1 %v6235_v47 }
 0xa2b   :  { %3447 = vmatpush1.bf16.msra.mxu0 %v6239_v36  ;;  %3488 = vmatpush1.bf16.msra.mxu1 %v6241_v54 }
 0xa2c   :  { %3448 = vmatprep.subr.bf16.mxu0 %v6245_v51  ;;  %3489 = vmatprep.subr.bf16.mxu1 %v6247_v58 }
 0xa2f   :  { %3449 = vmatpush1.bf16.msra.mxu0 %v6251_v59  ;;  %3490 = vmatpush1.bf16.msra.mxu1 %v6253_v39 }
 0xa30   :  { %3450 = vmatprep.subr.bf16.mxu0 %v6257_v60  ;;  %3491 = vmatprep.subr.bf16.mxu1 %v6262_v63 }
 0xa33   :  { %3451 = vmatpush1.bf16.msra.mxu0 %v6264_v30  ;;  %3492 = vmatpush1.bf16.msra.mxu1 %v6266_v49 }
 0xa34   :  { %3452 = vmatprep.subr.bf16.mxu0 %v6269_v56  ;;  %3493 = vmatprep.subr.bf16.mxu1 %v6271_v1 }
 0xa37   :  { %3453 = vmatpush1.bf16.msra.mxu0 %v6275_v40  ;;  %3494 = vmatpush1.bf16.msra.mxu1 %v6277_v11 }
 0xa38   :  { %3571 = vmatprep.subr.bf16.mxu0 %v6187_v52  ;;  %3612 = vmatprep.subr.bf16.mxu1 %v6189_v43 }
 0xae5   :  { %v6378_v26 = vpop.f32.mrb[44].mxu0  ;;  %v6380_v2 = vpop.f32.mrb[44].mxu1 }
 0xae6   :  { %6948 = vst [vmem:[#allocation40_spill] sm:$0xff] %v6378_v26  ;;  %6949 = vst [vmem:[#allocation41_spill] sm:$0xff] %v6380_v2  ;;  %v6382_v6 = vpop.f32.mrb[45].mxu0  ;;  %v6384_v7 = vpop.f32.mrb[45].mxu1 }
 0xae7   :  { %6950 = vst [vmem:[#allocation42_spill] sm:$0xff] %v6382_v6  ;;  %6951 = vst [vmem:[#allocation43_spill] sm:$0xff] %v6384_v7  ;;  %v6386_v8 = vpop.f32.mrb[46].mxu0  ;;  %v6388_v9 = vpop.f32.mrb[46].mxu1 }
 0xae8   :  { %6952 = vst [vmem:[#allocation44_spill] sm:$0xff] %v6386_v8  ;;  %6953 = vst [vmem:[#allocation45_spill] sm:$0xff] %v6388_v9  ;;  %v6394_v23 = vpop.f32.mrb[47].mxu0  ;;  %v6396_v45 = vpop.f32.mrb[47].mxu1 }
 0xae9   :  { %6954 = vst [vmem:[#allocation46_spill] sm:$0xff] %v6394_v23  ;;  %6955 = vst [vmem:[#allocation47_spill] sm:$0xff] %v6396_v45 }
 0xaed   :  { %v3339_v13 = vpop.f32.mrb[48].mxu0  ;;  %v3380_v23 = vpop.f32.mrb[48].mxu1 }
 0xaee   :  { %v3387_v9 = vadd.f32 %v3339_v13, %v2956_v57  ;;  %v3389_v45 = vadd.f32 %v3380_v23, %v3029_v3  ;;  %v3341_v22 = vpop.f32.mrb[49].mxu0  ;;  %v3382_v8 = vpop.f32.mrb[49].mxu1 }
 0xaef   :  { %v3388_v14 = vadd.f32 %v3341_v22, %v2958_v33  ;;  %v3390_v4 = vadd.f32 %v3382_v8, %v3031_v28  ;;  %v3343_v7 = vpop.f32.mrb[50].mxu0  ;;  %v3384_v6 = vpop.f32.mrb[50].mxu1 }
 0xaf0   :  { %v3344_v16 = vpop.f32.mrb[51].mxu0  ;;  %v3385_v2 = vpop.f32.mrb[51].mxu1  ;;  %v4802_v28 = vmul.f32 -1.442695, %v3389_v45 }
 0xaf1   :  { %v3392_v26 = vand.u32 2147483647, %v3388_v14  ;;  %v3391_v10 = vmin.f32 %v3388_v14, 0.0 }
 0xaf3   :  { %v3393_v17 = vsub.f32 0.0, %v3392_v26 }
 0xaf5   :  { %v3394_v42 = vmul.f32 1.442695, %v3393_v17 }
 0xaf7   :  { %5243 = vpow2.f32 %v3394_v42 }
 0xb01   :  { %v5244_v19 = vpop.eup %5243 }
 0xb02   :  { %v3396_v12 = vadd.f32 1.0, %v5244_v19 }
 0xb04   :  { %5245 = vlog2.f32 %v3396_v12 }
 0xb05   :  { %5247 = vtanh.f32 %v3390_v4 }
 0xb0e   :  { %v5246_v20 = vpop.eup %5245 }
 0xb0f   :  { %v3398_v41 = vmul.f32 0.6931472, %v5246_v20  ;;  %v5248_v26 = vpop.eup %5247 }
 0xb11   :  { %v3399_v57 = vsub.f32 %v3391_v10, %v3398_v41 }
 0xb13   :  { %v6410_v23 = vmax.f32 %v3399_v57, %v3387_v9 }
 0xb15   :  { %v3402_v3 = vsub.f32 %v3387_v9, %v6410_v23  ;;  %v3405_v7 = vsub.f32 %v3399_v57, %v6410_v23 }
 0xb17   :  { %v3403_v6 = vmul.f32 1.442695, %v3402_v3  ;;  %v3406_v8 = vmul.f32 1.442695, %v3405_v7  ;;  %v2960_v3 = vadd.f32 %v6293_v24, %v6390_v18  ;;  %v3033_v7 = vadd.f32 %v6295_v25, %v6392_v21 }
 0xb19   :  { %5249 = vpow2.f32 %v3403_v6  ;;  %v2962_v6 = vadd.f32 %v6297_v44, %v6398_v15 }
 0xb1a   :  { %5251 = vpow2.f32 %v3406_v8  ;;  %v6957_v8 = vld [vmem:[#allocation23_spill] sm:$0xff] }
 0xb23   :  { %v5250_v42 = vpop.eup %5249 }
 0xb24   :  { %v5252_v2 = vpop.eup %5251  ;;  %v3410_v33 = vmul.f32 %v5250_v42, %v5248_v26  ;;  %v3035_v26 = vadd.f32 %v6957_v8, %v6400_v5 }
 0xb25   :  { %v3408_v12 = vmul.f32 0.0, %v5252_v2 }
 0xb27   :  { %v6414_v13 = vadd.f32 %v5250_v42, %v3408_v12  ;;  %v6416_v41 = vadd.f32 %v3410_v33, %v3408_v12 }
 0xb29   :  { %5253 = vrcp.f32 %v6414_v13 }
 0xb2a   :  { %5255 = vpow2.f32 %v4802_v28 }
 0xb33   :  { %v5254_v10 = vpop.eup %5253 }
 0xb34   :  { %v5256_v9 = vpop.eup %5255  ;;  %v3415_v22 = vmul.f32 %v5254_v10, %v6414_v13 }
 0xb35   :  { %v3421_v4 = vadd.f32 1.0, %v5256_v9 }
 0xb36   :  { %v3416_v14 = vsub.f32 2.0, %v3415_v22 }
 0xb37   :  { %5257 = vrcp.f32 %v3421_v4 }
 0xb38   :  { %v3417_v16 = vmul.f32 %v5254_v10, %v3416_v14 }
 0xb3a   :  { %v3424_v17 = vmul.f32 %v3417_v16, %v6416_v41 }
 0xb3c   :  { %5259 = vtanh.f32 %v3424_v17 }
 0xb41   :  { %v5258_v19 = vpop.eup %5257 }
 0xb46   :  { %v5260_v45 = vpop.eup %5259 }
 0xb47   :  { %v6421_v20 = vmul.f32 %v5260_v45, %v5258_v19 }
 0xb49   :  { %v3437_v57 = vpack.c.bf16 %v6421_v20, %v6421_v20 }
 0xb4b   :  { %3471 = vmatmul.mubr.bf16.vlgmr.msra.gmra.mrb[52].mxu0 %v3437_v57  ;;  %3512 = vmatmul.mubr.bf16.vlgmr.msra.gmra.mrb[52].mxu1 %v3437_v57 }
 0xb4c   :  { %3572 = vmatpush1.bf16.msra.mxu0 %v6191_v37  ;;  %3613 = vmatpush1.bf16.msra.mxu1 %v6193_v35 }
 0xb4d   :  { %3573 = vmatprep.subr.bf16.mxu0 %v6199_v48  ;;  %3614 = vmatprep.subr.bf16.mxu1 %v6201_v61 }
 0xb4e   :  { %3603 = vmatprep.mubr.bf16.mxu0 %v6946_v31  ;;  %3644 = vmatprep.mubr.bf16.mxu1 %v6946_v31 }
 0xb50   :  { %3574 = vmatpush1.bf16.msra.mxu0 %v6203_v32  ;;  %3615 = vmatpush1.bf16.msra.mxu1 %v6205_v46 }
 0xb51   :  { %3575 = vmatprep.subr.bf16.mxu0 %v6211_v62  ;;  %3616 = vmatprep.subr.bf16.mxu1 %v6213_v53 }
 0xb54   :  { %3576 = vmatpush1.bf16.msra.mxu0 %v6215_v38  ;;  %3617 = vmatpush1.bf16.msra.mxu1 %v6217_v55 }
 0xb55   :  { %3577 = vmatprep.subr.bf16.mxu0 %v6223_v50  ;;  %3618 = vmatprep.subr.bf16.mxu1 %v6227_v29 }
 0xb58   :  { %3578 = vmatpush1.bf16.msra.mxu0 %v6225_v34  ;;  %3619 = vmatpush1.bf16.msra.mxu1 %v6229_v0 }
 0xb59   :  { %3579 = vmatprep.subr.bf16.mxu0 %v6231_v27  ;;  %3620 = vmatprep.subr.bf16.mxu1 %v6235_v47 }
 0xb5c   :  { %3580 = vmatpush1.bf16.msra.mxu0 %v6239_v36  ;;  %3621 = vmatpush1.bf16.msra.mxu1 %v6241_v54 }
 0xb5d   :  { %3581 = vmatprep.subr.bf16.mxu0 %v6245_v51  ;;  %3622 = vmatprep.subr.bf16.mxu1 %v6247_v58 }
 0xb60   :  { %3582 = vmatpush1.bf16.msra.mxu0 %v6251_v59  ;;  %3623 = vmatpush1.bf16.msra.mxu1 %v6253_v39 }
 0xb61   :  { %3583 = vmatprep.subr.bf16.mxu0 %v6257_v60  ;;  %3624 = vmatprep.subr.bf16.mxu1 %v6262_v63 }
 0xb64   :  { %3584 = vmatpush1.bf16.msra.mxu0 %v6264_v30  ;;  %3625 = vmatpush1.bf16.msra.mxu1 %v6266_v49 }
 0xb65   :  { %3585 = vmatprep.subr.bf16.mxu0 %v6269_v56  ;;  %3626 = vmatprep.subr.bf16.mxu1 %v6271_v1 }
 0xb68   :  { %3586 = vmatpush1.bf16.msra.mxu0 %v6275_v40  ;;  %3627 = vmatpush1.bf16.msra.mxu1 %v6277_v11 }
 0xb69   :  { %3704 = vmatprep.subr.bf16.mxu0 %v6187_v52  ;;  %3745 = vmatprep.subr.bf16.mxu1 %v6189_v43 }
 0xc1e   :  { %v3472_v42 = vpop.f32.mrb[52].mxu0  ;;  %v3513_v2 = vpop.f32.mrb[52].mxu1 }
 0xc1f   :  { %v3520_v33 = vadd.f32 %v3472_v42, %v2960_v3  ;;  %v3522_v12 = vadd.f32 %v3513_v2, %v3033_v7  ;;  %v3474_v28 = vpop.f32.mrb[53].mxu0  ;;  %v3515_v10 = vpop.f32.mrb[53].mxu1 }
 0xc20   :  { %v3521_v9 = vadd.f32 %v3474_v28, %v2962_v6  ;;  %v3523_v22 = vadd.f32 %v3515_v10, %v3035_v26  ;;  %v3476_v14 = vpop.f32.mrb[54].mxu0  ;;  %v3517_v4 = vpop.f32.mrb[54].mxu1 }
 0xc21   :  { %v3477_v24 = vpop.f32.mrb[55].mxu0  ;;  %v3518_v16 = vpop.f32.mrb[55].mxu1 }
 0xc22   :  { %v3525_v17 = vand.u32 2147483647, %v3521_v9  ;;  %v3524_v8 = vmin.f32 %v3521_v9, 0.0 }
 0xc24   :  { %v3526_v25 = vsub.f32 0.0, %v3525_v17 }
 0xc26   :  { %v3527_v19 = vmul.f32 1.442695, %v3526_v25 }
 0xc28   :  { %5261 = vpow2.f32 %v3527_v19 }
 0xc32   :  { %v5262_v44 = vpop.eup %5261 }
 0xc33   :  { %v3529_v45 = vadd.f32 1.0, %v5262_v44 }
 0xc35   :  { %5263 = vlog2.f32 %v3529_v45 }
 0xc36   :  { %5265 = vtanh.f32 %v3523_v22 }
 0xc3f   :  { %v5264_v57 = vpop.eup %5263 }
 0xc40   :  { %v3531_v5 = vmul.f32 0.6931472, %v5264_v57  ;;  %v5266_v10 = vpop.eup %5265 }
 0xc42   :  { %v3532_v3 = vsub.f32 %v3524_v8, %v3531_v5  ;;  %v3562_v8 = vstv %s4804_s19 }
 0xc44   :  { %v3533_v7 = vadd.f32 %v3532_v3, %v6410_v23  ;;  %v4803_v23 = vmul.f32 -1.442695, %v3522_v12  ;;  %v3429_v12 = vstv %s3428_s5 }
 0xc46   :  { %v6468_v42 = vmax.f32 %v3533_v7, %v3520_v33 }
 0xc48   :  { %v3535_v6 = vsub.f32 %v3520_v33, %v6468_v42  ;;  %v3538_v26 = vsub.f32 %v3533_v7, %v6468_v42  ;;  %v3430_v7 = vmul.f32 %v3429_v12, %v6421_v20  ;;  %v6958_v20 = vld [vmem:[#allocation24_spill] sm:$0xff] }
 0xc4a   :  { %v3536_v2 = vmul.f32 1.442695, %v3535_v6  ;;  %v3539_v28 = vmul.f32 1.442695, %v3538_v26 }
 0xc4c   :  { %5267 = vpow2.f32 %v3536_v2 }
 0xc4d   :  { %5269 = vpow2.f32 %v3539_v28  ;;  %v2966_v28 = vadd.f32 %v6958_v20, %v6390_v18 }
 0xc56   :  { %v5268_v14 = vpop.eup %5267 }
 0xc57   :  { %v5270_v4 = vpop.eup %5269  ;;  %v3543_v24 = vmul.f32 %v5268_v14, %v5266_v10  ;;  %v6959_v10 = vld [vmem:[#allocation25_spill] sm:$0xff] }
 0xc58   :  { %v3545_v9 = vmul.f32 %v5270_v4, %v6414_v13  ;;  %v3541_v5 = vmul.f32 %v5270_v4, %v6416_v41  ;;  %v6960_v4 = vld [vmem:[#allocation26_spill] sm:$0xff] }
 0xc5a   :  { %v6474_v16 = vadd.f32 %v5268_v14, %v3545_v9  ;;  %v6476_v17 = vadd.f32 %v3543_v24, %v3541_v5  ;;  %v3039_v14 = vadd.f32 %v6959_v10, %v6392_v21  ;;  %v2968_v24 = vadd.f32 %v6960_v4, %v6398_v15  ;;  %v6961_v9 = vld [vmem:[#allocation48_spill] sm:$0xff]  ;;  %v6962_v5 = vld [vmem:[#allocation27_spill] sm:$0xff] }
 0xc5c   :  { %5271 = vrcp.f32 %v6474_v16 }
 0xc5d   :  { %5273 = vpow2.f32 %v4803_v23  ;;  %v3041_v23 = vadd.f32 %v6962_v5, %v6961_v9 }
 0xc66   :  { %v5272_v33 = vpop.eup %5271 }
 0xc67   :  { %v5274_v22 = vpop.eup %5273  ;;  %v3548_v25 = vmul.f32 %v5272_v33, %v6474_v16 }
 0xc68   :  { %v3554_v44 = vadd.f32 1.0, %v5274_v22 }
 0xc69   :  { %v3549_v19 = vsub.f32 2.0, %v3548_v25 }
 0xc6a   :  { %5275 = vrcp.f32 %v3554_v44 }
 0xc6b   :  { %v3550_v45 = vmul.f32 %v5272_v33, %v3549_v19 }
 0xc6d   :  { %v3557_v57 = vmul.f32 %v3550_v45, %v6476_v17 }
 0xc6f   :  { %5277 = vtanh.f32 %v3557_v57 }
 0xc74   :  { %v5276_v13 = vpop.eup %5275 }
 0xc79   :  { %v5278_v41 = vpop.eup %5277 }
 0xc7a   :  { %v3559_v3 = vmul.f32 %v5278_v41, %v5276_v13 }
 0xc7c   :  { %v3563_v6 = vmul.f32 %v3562_v8, %v3559_v3  ;;  %v3570_v26 = vpack.c.bf16 %v3559_v3, %v3559_v3 }
 0xc7e   :  { %v6482_v2 = vadd.f32 %v3563_v6, %v3430_v7  ;;  %3604 = vmatmul.mubr.bf16.vlgmr.msra.gmra.mrb[56].mxu0 %v3570_v26  ;;  %3645 = vmatmul.mubr.bf16.vlgmr.msra.gmra.mrb[56].mxu1 %v3570_v26 }
 0xc7f   :  { %3705 = vmatpush1.bf16.msra.mxu0 %v6191_v37  ;;  %3746 = vmatpush1.bf16.msra.mxu1 %v6193_v35 }
 0xc80   :  { %3706 = vmatprep.subr.bf16.mxu0 %v6199_v48  ;;  %3747 = vmatprep.subr.bf16.mxu1 %v6201_v61 }
 0xc81   :  { %3736 = vmatprep.mubr.bf16.mxu0 %v6946_v31  ;;  %3777 = vmatprep.mubr.bf16.mxu1 %v6946_v31 }
 0xc83   :  { %3707 = vmatpush1.bf16.msra.mxu0 %v6203_v32  ;;  %3748 = vmatpush1.bf16.msra.mxu1 %v6205_v46 }
 0xc84   :  { %3708 = vmatprep.subr.bf16.mxu0 %v6211_v62  ;;  %3749 = vmatprep.subr.bf16.mxu1 %v6213_v53 }
 0xc87   :  { %3709 = vmatpush1.bf16.msra.mxu0 %v6215_v38  ;;  %3750 = vmatpush1.bf16.msra.mxu1 %v6217_v55 }
 0xc88   :  { %3710 = vmatprep.subr.bf16.mxu0 %v6223_v50  ;;  %3751 = vmatprep.subr.bf16.mxu1 %v6227_v29 }
 0xc8b   :  { %3711 = vmatpush1.bf16.msra.mxu0 %v6225_v34  ;;  %3752 = vmatpush1.bf16.msra.mxu1 %v6229_v0 }
 0xc8c   :  { %3712 = vmatprep.subr.bf16.mxu0 %v6231_v27  ;;  %3753 = vmatprep.subr.bf16.mxu1 %v6235_v47 }
 0xc8f   :  { %3713 = vmatpush1.bf16.msra.mxu0 %v6239_v36  ;;  %3754 = vmatpush1.bf16.msra.mxu1 %v6241_v54 }
 0xc90   :  { %3714 = vmatprep.subr.bf16.mxu0 %v6245_v51  ;;  %3755 = vmatprep.subr.bf16.mxu1 %v6247_v58 }
 0xc93   :  { %3715 = vmatpush1.bf16.msra.mxu0 %v6251_v59  ;;  %3756 = vmatpush1.bf16.msra.mxu1 %v6253_v39 }
 0xc94   :  { %3716 = vmatprep.subr.bf16.mxu0 %v6257_v60  ;;  %3757 = vmatprep.subr.bf16.mxu1 %v6262_v63 }
 0xc97   :  { %3717 = vmatpush1.bf16.msra.mxu0 %v6264_v30  ;;  %3758 = vmatpush1.bf16.msra.mxu1 %v6266_v49 }
 0xc98   :  { %3718 = vmatprep.subr.bf16.mxu0 %v6269_v56  ;;  %3759 = vmatprep.subr.bf16.mxu1 %v6271_v1 }
 0xc9b   :  { %3719 = vmatpush1.bf16.msra.mxu0 %v6275_v40  ;;  %3760 = vmatpush1.bf16.msra.mxu1 %v6277_v11 }
 0xc9c   :  { %3837 = vmatprep.subr.bf16.mxu0 %v6187_v52  ;;  %3878 = vmatprep.subr.bf16.mxu1 %v6189_v43 }
 0xd51   :  { %v3605_v33 = vpop.f32.mrb[56].mxu0  ;;  %v3646_v22 = vpop.f32.mrb[56].mxu1 }
 0xd52   :  { %v3653_v25 = vadd.f32 %v3605_v33, %v2966_v28  ;;  %v3655_v19 = vadd.f32 %v3646_v22, %v3039_v14  ;;  %v3607_v44 = vpop.f32.mrb[57].mxu0  ;;  %v3648_v45 = vpop.f32.mrb[57].mxu1 }
 0xd53   :  { %v3654_v57 = vadd.f32 %v3607_v44, %v2968_v24  ;;  %v3656_v13 = vadd.f32 %v3648_v45, %v3041_v23  ;;  %v3609_v41 = vpop.f32.mrb[58].mxu0  ;;  %v3650_v12 = vpop.f32.mrb[58].mxu1 }
 0xd54   :  { %v3610_v8 = vpop.f32.mrb[59].mxu0  ;;  %v3651_v3 = vpop.f32.mrb[59].mxu1 }
 0xd55   :  { %v3658_v7 = vand.u32 2147483647, %v3654_v57  ;;  %v3657_v5 = vmin.f32 %v3654_v57, 0.0 }
 0xd57   :  { %v3659_v6 = vsub.f32 0.0, %v3658_v7 }
 0xd59   :  { %v3660_v26 = vmul.f32 1.442695, %v3659_v6 }
 0xd5b   :  { %5279 = vpow2.f32 %v3660_v26 }
 0xd65   :  { %v5280_v20 = vpop.eup %5279 }
 0xd66   :  { %v3662_v10 = vadd.f32 1.0, %v5280_v20 }
 0xd68   :  { %5281 = vlog2.f32 %v3662_v10 }
 0xd69   :  { %5283 = vtanh.f32 %v3656_v13 }
 0xd72   :  { %v5282_v4 = vpop.eup %5281 }
 0xd73   :  { %v3664_v9 = vmul.f32 0.6931472, %v5282_v4  ;;  %v5284_v45 = vpop.eup %5283 }
 0xd75   :  { %v3665_v28 = vsub.f32 %v3657_v5, %v3664_v9 }
 0xd77   :  { %v3666_v14 = vadd.f32 %v3665_v28, %v6468_v42  ;;  %v4805_v42 = vmul.f32 -1.442695, %v3655_v19  ;;  %v3695_v19 = vstv %s4806_s14 }
 0xd79   :  { %v6527_v33 = vmax.f32 %v3666_v14, %v3653_v25 }
 0xd7b   :  { %v3668_v24 = vsub.f32 %v3653_v25, %v6527_v33  ;;  %v3671_v23 = vsub.f32 %v3666_v14, %v6527_v33 }
 0xd7d   :  { %v3669_v22 = vmul.f32 1.442695, %v3668_v24  ;;  %v3672_v44 = vmul.f32 1.442695, %v3671_v23 }
 0xd7f   :  { %5285 = vpow2.f32 %v3669_v22 }
 0xd80   :  { %5287 = vpow2.f32 %v3672_v44 }
 0xd89   :  { %v5286_v41 = vpop.eup %5285 }
 0xd8a   :  { %v5288_v12 = vpop.eup %5287  ;;  %v3676_v8 = vmul.f32 %v5286_v41, %v5284_v45 }
 0xd8b   :  { %v3678_v57 = vmul.f32 %v5288_v12, %v6474_v16  ;;  %v3674_v9 = vmul.f32 %v5288_v12, %v6476_v17 }
 0xd8d   :  { %v6533_v3 = vadd.f32 %v5286_v41, %v3678_v57  ;;  %v6535_v7 = vadd.f32 %v3676_v8, %v3674_v9 }
 0xd8f   :  { %5289 = vrcp.f32 %v6533_v3 }
 0xd90   :  { %5291 = vpow2.f32 %v4805_v42 }
 0xd99   :  { %v5290_v25 = vpop.eup %5289 }
 0xd9a   :  { %v5292_v13 = vpop.eup %5291  ;;  %v3681_v6 = vmul.f32 %v5290_v25, %v6533_v3 }
 0xd9b   :  { %v3687_v20 = vadd.f32 1.0, %v5292_v13 }
 0xd9c   :  { %v3682_v26 = vsub.f32 2.0, %v3681_v6 }
 0xd9d   :  { %5293 = vrcp.f32 %v3687_v20 }
 0xd9e   :  { %v3683_v10 = vmul.f32 %v5290_v25, %v3682_v26 }
 0xda0   :  { %v3690_v4 = vmul.f32 %v3683_v10, %v6535_v7 }
 0xda2   :  { %5295 = vtanh.f32 %v3690_v4 }
 0xda7   :  { %v5294_v16 = vpop.eup %5293 }
 0xdac   :  { %v5296_v17 = vpop.eup %5295 }
 0xdad   :  { %v3692_v5 = vmul.f32 %v5296_v17, %v5294_v16  ;;  %v3828_v17 = vstv %s4808_s15 }
 0xdaf   :  { %v3696_v28 = vmul.f32 %v3695_v19, %v3692_v5  ;;  %v3703_v14 = vpack.c.bf16 %v3692_v5, %v3692_v5 }
 0xdb1   :  { %v6541_v24 = vadd.f32 %v3696_v28, %v6482_v2  ;;  %3737 = vmatmul.mubr.bf16.vlgmr.msra.gmra.mrb[60].mxu0 %v3703_v14  ;;  %3778 = vmatmul.mubr.bf16.vlgmr.msra.gmra.mrb[60].mxu1 %v3703_v14 }
 0xdb2   :  { %3838 = vmatpush1.bf16.msra.mxu0 %v6191_v37  ;;  %3879 = vmatpush1.bf16.msra.mxu1 %v6193_v35  ;;  %v6963_v37 = vld [vmem:[#allocation28_spill] sm:$0xff] }
 0xdb3   :  { %3839 = vmatprep.subr.bf16.mxu0 %v6199_v48  ;;  %3880 = vmatprep.subr.bf16.mxu1 %v6201_v61  ;;  %v2970_v35 = vadd.f32 %v6963_v37, %v6390_v18  ;;  %v6964_v48 = vld [vmem:[#allocation29_spill] sm:$0xff] }
 0xdb4   :  { %3869 = vmatprep.mubr.bf16.mxu0 %v6946_v31  ;;  %3910 = vmatprep.mubr.bf16.mxu1 %v6946_v31  ;;  %v3043_v61 = vadd.f32 %v6964_v48, %v6392_v21  ;;  %v6602_v37 = vld [vmem:[#allocation17] ss:$16 sps:$4 sm:$0xff]   ;;  %v6608_v48 = vld [vmem:[#allocation17 + $0x24] ss:$16 sps:$4 sm:$0xff]  }
 0xdb6   :  { %3840 = vmatpush1.bf16.msra.mxu0 %v6203_v32  ;;  %3881 = vmatpush1.bf16.msra.mxu1 %v6205_v46  ;;  %v6965_v32 = vld [vmem:[#allocation30_spill] sm:$0xff] }
 0xdb7   :  { %3841 = vmatprep.subr.bf16.mxu0 %v6211_v62  ;;  %3882 = vmatprep.subr.bf16.mxu1 %v6213_v53  ;;  %v2972_v46 = vadd.f32 %v6965_v32, %v6398_v15  ;;  %v6966_v62 = vld [vmem:[#allocation48_spill] sm:$0xff]  ;;  %v6967_v53 = vld [vmem:[#allocation31_spill] sm:$0xff] }
 0xdb8   :  { %v6619_v32 = vld [vmem:[#allocation17 + $0x28] ss:$16 sps:$4 sm:$0xff]  }
 0xdba   :  { %3842 = vmatpush1.bf16.msra.mxu0 %v6215_v38  ;;  %3883 = vmatpush1.bf16.msra.mxu1 %v6217_v55  ;;  %v3045_v38 = vadd.f32 %v6967_v53, %v6966_v62  ;;  %v6625_v53 = vld [vmem:[#allocation17 + $0x4c] ss:$16 sps:$4 sm:$0xff]  }
 0xdbb   :  { %3843 = vmatprep.subr.bf16.mxu0 %v6223_v50  ;;  %3884 = vmatprep.subr.bf16.mxu1 %v6227_v29 }
 0xdbe   :  { %3844 = vmatpush1.bf16.msra.mxu0 %v6225_v34  ;;  %3885 = vmatpush1.bf16.msra.mxu1 %v6229_v0 }
 0xdbf   :  { %3845 = vmatprep.subr.bf16.mxu0 %v6231_v27  ;;  %3886 = vmatprep.subr.bf16.mxu1 %v6235_v47 }
 0xdc2   :  { %3846 = vmatpush1.bf16.msra.mxu0 %v6239_v36  ;;  %3887 = vmatpush1.bf16.msra.mxu1 %v6241_v54 }
 0xdc3   :  { %3847 = vmatprep.subr.bf16.mxu0 %v6245_v51  ;;  %3888 = vmatprep.subr.bf16.mxu1 %v6247_v58 }
 0xdc6   :  { %3848 = vmatpush1.bf16.msra.mxu0 %v6251_v59  ;;  %3889 = vmatpush1.bf16.msra.mxu1 %v6253_v39 }
 0xdc7   :  { %3849 = vmatprep.subr.bf16.mxu0 %v6257_v60  ;;  %3890 = vmatprep.subr.bf16.mxu1 %v6262_v63 }
 0xdca   :  { %3850 = vmatpush1.bf16.msra.mxu0 %v6264_v30  ;;  %3891 = vmatpush1.bf16.msra.mxu1 %v6266_v49 }
 0xdcb   :  { %3851 = vmatprep.subr.bf16.mxu0 %v6269_v56  ;;  %3892 = vmatprep.subr.bf16.mxu1 %v6271_v1 }
 0xdce   :  { %3852 = vmatpush1.bf16.msra.mxu0 %v6275_v40  ;;  %3893 = vmatpush1.bf16.msra.mxu1 %v6277_v11 }
 0xdcf   :  { %3970 = vmatprep.subr.bf16.mxu0 %v6187_v52  ;;  %4011 = vmatprep.subr.bf16.mxu1 %v6189_v43 }
 0xe84   :  { %v3738_v55 = vpop.f32.mrb[60].mxu0  ;;  %v3779_v50 = vpop.f32.mrb[60].mxu1 }
 0xe85   :  { %v3786_v34 = vadd.f32 %v3738_v55, %v2970_v35  ;;  %v3788_v29 = vadd.f32 %v3779_v50, %v3043_v61  ;;  %v3740_v0 = vpop.f32.mrb[61].mxu0  ;;  %v3781_v52 = vpop.f32.mrb[61].mxu1  ;;  %v6605_v35 = vld [vmem:[#allocation17 + $0x8] ss:$16 sps:$4 sm:$0xff]   ;;  %v6611_v61 = vld [vmem:[#allocation17 + $0x2c] ss:$16 sps:$4 sm:$0xff]  }
 0xe86   :  { %v3787_v27 = vadd.f32 %v3740_v0, %v2972_v46  ;;  %v3789_v43 = vadd.f32 %v3781_v52, %v3045_v38  ;;  %v3742_v47 = vpop.f32.mrb[62].mxu0  ;;  %v3783_v36 = vpop.f32.mrb[62].mxu1  ;;  %v6622_v46 = vld [vmem:[#allocation17 + $0x44] ss:$16 sps:$4 sm:$0xff]   ;;  %v6628_v38 = vld [vmem:[#allocation17 + $0x40] ss:$16 sps:$4 sm:$0xff]  }
 0xe87   :  { %v3743_v54 = vpop.f32.mrb[63].mxu0  ;;  %v3784_v51 = vpop.f32.mrb[63].mxu1  ;;  %v6631_v55 = vld [vmem:[#allocation17 + $0x48] ss:$16 sps:$4 sm:$0xff]   ;;  %v6634_v50 = vld [vmem:[#allocation17 + $0x64] ss:$16 sps:$4 sm:$0xff]  }
 0xe88   :  { %v3791_v58 = vand.u32 2147483647, %v3787_v27  ;;  %v3790_v49 = vmin.f32 %v3787_v27, 0.0  ;;  %v6643_v0 = vld [vmem:[#allocation17 + $0x68] ss:$16 sps:$4 sm:$0xff]  }
 0xe89   :  { %v6646_v52 = vld [vmem:[#allocation17 + $0x84] ss:$16 sps:$4 sm:$0xff]   ;;  %v6649_v27 = vld [vmem:[#allocation17 + $0x8c] ss:$16 sps:$4 sm:$0xff]   ;;  %v6655_v47 = vld [vmem:[#allocation17 + $0x88] ss:$16 sps:$4 sm:$0xff]  }
 0xe8a   :  { %v3792_v59 = vsub.f32 0.0, %v3791_v58  ;;  %v6658_v36 = vld [vmem:[#allocation17 + $0xa4] ss:$16 sps:$4 sm:$0xff]   ;;  %v6661_v54 = vld [vmem:[#allocation17 + $0xac] ss:$16 sps:$4 sm:$0xff]  }
 0xe8b   :  { %v6664_v51 = vld [vmem:[#allocation17 + $0xa0] ss:$16 sps:$4 sm:$0xff]   ;;  %v6667_v58 = vld [vmem:[#allocation17 + $0xa8] ss:$16 sps:$4 sm:$0xff]  }
 0xe8c   :  { %v3793_v39 = vmul.f32 1.442695, %v3792_v59  ;;  %v6670_v59 = vld [vmem:[#allocation17 + $0xc4] ss:$16 sps:$4 sm:$0xff]  }
 0xe8e   :  { %5297 = vpow2.f32 %v3793_v39  ;;  %v6673_v39 = vld [vmem:[#allocation17 + $0xcc] ss:$16 sps:$4 sm:$0xff]  }
 0xe98   :  { %v5298_v60 = vpop.eup %5297 }
 0xe99   :  { %v3795_v63 = vadd.f32 1.0, %v5298_v60  ;;  %v6676_v60 = vld [vmem:[#allocation17 + $0xc0] ss:$16 sps:$4 sm:$0xff]  }
 0xe9b   :  { %5299 = vlog2.f32 %v3795_v63  ;;  %v6679_v63 = vld [vmem:[#allocation17 + $0xc8] ss:$16 sps:$4 sm:$0xff]  }
 0xe9c   :  { %5301 = vtanh.f32 %v3789_v43  ;;  %v6652_v43 = vld [vmem:[#allocation17 + $0x80] ss:$16 sps:$4 sm:$0xff]  }
 0xea5   :  { %v5300_v30 = vpop.eup %5299 }
 0xea6   :  { %v3797_v56 = vmul.f32 0.6931472, %v5300_v30  ;;  %v5302_v45 = vpop.eup %5301  ;;  %v6682_v30 = vld [vmem:[#allocation17 + $0xe4] ss:$16 sps:$4 sm:$0xff]  }
 0xea8   :  { %v3798_v1 = vsub.f32 %v3790_v49, %v3797_v56  ;;  %v6685_v49 = vld [vmem:[#allocation17 + $0xec] ss:$16 sps:$4 sm:$0xff]   ;;  %v6688_v56 = vld [vmem:[#allocation17 + $0xe0] ss:$16 sps:$4 sm:$0xff]  }
 0xeaa   :  { %v3799_v40 = vadd.f32 %v3798_v1, %v6527_v33  ;;  %v4807_v33 = vmul.f32 -1.442695, %v3788_v29  ;;  %v6640_v29 = vld [vmem:[#allocation17 + $0x60] ss:$16 sps:$4 sm:$0xff]   ;;  %v6691_v1 = vld [vmem:[#allocation17 + $0xe8] ss:$16 sps:$4 sm:$0xff]  }
 0xeac   :  { %v6586_v11 = vmax.f32 %v3799_v40, %v3786_v34 }
 0xeae   :  { %v3801_v2 = vsub.f32 %v3786_v34, %v6586_v11  ;;  %v3804_v23 = vsub.f32 %v3799_v40, %v6586_v11  ;;  %v6637_v34 = vld [vmem:[#allocation17 + $0x6c] ss:$16 sps:$4 sm:$0xff]   ;;  %v6694_v40 = vld [vmem:[#allocation17 + $0x4] ss:$16 sps:$4 sm:$0xff]  }
 0xeb0   :  { %v3802_v22 = vmul.f32 1.442695, %v3801_v2  ;;  %v3805_v44 = vmul.f32 1.442695, %v3804_v23  ;;  %v6697_v2 = vld [vmem:[#allocation17 + $0xc] ss:$16 sps:$4 sm:$0xff]  }
 0xeb1   :  { %v6968_v23 = vld [vmem:[#allocation32_spill] sm:$0xff] }
 0xeb2   :  { %5303 = vpow2.f32 %v3802_v22  ;;  %v2976_v22 = vadd.f32 %v6968_v23, %v6390_v18 }
 0xeb3   :  { %5305 = vpow2.f32 %v3805_v44  ;;  %v6969_v44 = vld [vmem:[#allocation33_spill] sm:$0xff] }
 0xebc   :  { %v5304_v41 = vpop.eup %5303 }
 0xebd   :  { %v5306_v12 = vpop.eup %5305  ;;  %v3809_v8 = vmul.f32 %v5304_v41, %v5302_v45  ;;  %v3049_v45 = vadd.f32 %v6969_v44, %v6392_v21 }
 0xebe   :  { %v3811_v57 = vmul.f32 %v5306_v12, %v6533_v3  ;;  %v3807_v9 = vmul.f32 %v5306_v12, %v6535_v7 }
 0xec0   :  { %v6592_v42 = vadd.f32 %v5304_v41, %v3811_v57  ;;  %v6594_v25 = vadd.f32 %v3809_v8, %v3807_v9  ;;  %v6970_v41 = vld [vmem:[#allocation34_spill] sm:$0xff]  ;;  %v6971_v8 = vld [vmem:[#allocation35_spill] sm:$0xff] }
 0xec1   :  { %v2978_v12 = vadd.f32 %v6970_v41, %v6398_v15  ;;  %v3051_v57 = vadd.f32 %v6971_v8, %v6966_v62 }
 0xec2   :  { %5307 = vrcp.f32 %v6592_v42 }
 0xec3   :  { %5309 = vpow2.f32 %v4807_v33 }
 0xecc   :  { %v5308_v13 = vpop.eup %5307 }
 0xecd   :  { %v5310_v6 = vpop.eup %5309  ;;  %v3814_v26 = vmul.f32 %v5308_v13, %v6592_v42 }
 0xece   :  { %v3820_v10 = vadd.f32 1.0, %v5310_v6 }
 0xecf   :  { %v3815_v20 = vsub.f32 2.0, %v3814_v26 }
 0xed0   :  { %5311 = vrcp.f32 %v3820_v10 }
 0xed1   :  { %v3816_v4 = vmul.f32 %v5308_v13, %v3815_v20 }
 0xed3   :  { %v3823_v16 = vmul.f32 %v3816_v4, %v6594_v25 }
 0xed5   :  { %5313 = vtanh.f32 %v3823_v16 }
 0xeda   :  { %v5312_v3 = vpop.eup %5311 }
 0xedf   :  { %v5314_v7 = vpop.eup %5313 }
 0xee0   :  { %v3825_v19 = vmul.f32 %v5314_v7, %v5312_v3 }
 0xee2   :  { %v3829_v5 = vmul.f32 %v3828_v17, %v3825_v19  ;;  %v3836_v28 = vpack.c.bf16 %v3825_v19, %v3825_v19 }
 0xee4   :  { %v6600_v14 = vadd.f32 %v3829_v5, %v6541_v24  ;;  %3870 = vmatmul.mubr.bf16.vlgmr.msra.gmra.mrb[64].mxu0 %v3836_v28  ;;  %3911 = vmatmul.mubr.bf16.vlgmr.msra.gmra.mrb[64].mxu1 %v3836_v28  ;;  %v6616_v24 = vld [vmem:[#allocation17 + $0x20] ss:$16 sps:$4 sm:$0xff]  }
 0xee5   :  { %3971 = vmatpush1.bf16.msra.mxu0 %v6602_v37  ;;  %4012 = vmatpush1.bf16.msra.mxu1 %v6605_v35 }
 0xee6   :  { %3972 = vmatprep.subr.bf16.mxu0 %v6608_v48  ;;  %4013 = vmatprep.subr.bf16.mxu1 %v6611_v61 }
 0xee7   :  { %4002 = vmatprep.mubr.bf16.mxu0 %v6946_v31  ;;  %4043 = vmatprep.mubr.bf16.mxu1 %v6946_v31 }
 0xee9   :  { %3973 = vmatpush1.bf16.msra.mxu0 %v6616_v24  ;;  %4014 = vmatpush1.bf16.msra.mxu1 %v6619_v32 }
 0xeea   :  { %3974 = vmatprep.subr.bf16.mxu0 %v6622_v46  ;;  %4015 = vmatprep.subr.bf16.mxu1 %v6625_v53 }
 0xeed   :  { %3975 = vmatpush1.bf16.msra.mxu0 %v6628_v38  ;;  %4016 = vmatpush1.bf16.msra.mxu1 %v6631_v55 }
 0xeee   :  { %3976 = vmatprep.subr.bf16.mxu0 %v6634_v50  ;;  %4017 = vmatprep.subr.bf16.mxu1 %v6637_v34 }
 0xef1   :  { %3977 = vmatpush1.bf16.msra.mxu0 %v6640_v29  ;;  %4018 = vmatpush1.bf16.msra.mxu1 %v6643_v0 }
 0xef2   :  { %3978 = vmatprep.subr.bf16.mxu0 %v6646_v52  ;;  %4019 = vmatprep.subr.bf16.mxu1 %v6649_v27 }
 0xef5   :  { %3979 = vmatpush1.bf16.msra.mxu0 %v6652_v43  ;;  %4020 = vmatpush1.bf16.msra.mxu1 %v6655_v47 }
 0xef6   :  { %3980 = vmatprep.subr.bf16.mxu0 %v6658_v36  ;;  %4021 = vmatprep.subr.bf16.mxu1 %v6661_v54 }
 0xef9   :  { %3981 = vmatpush1.bf16.msra.mxu0 %v6664_v51  ;;  %4022 = vmatpush1.bf16.msra.mxu1 %v6667_v58 }
 0xefa   :  { %3982 = vmatprep.subr.bf16.mxu0 %v6670_v59  ;;  %4023 = vmatprep.subr.bf16.mxu1 %v6673_v39 }
 0xefd   :  { %3983 = vmatpush1.bf16.msra.mxu0 %v6676_v60  ;;  %4024 = vmatpush1.bf16.msra.mxu1 %v6679_v63 }
 0xefe   :  { %3984 = vmatprep.subr.bf16.mxu0 %v6682_v30  ;;  %4025 = vmatprep.subr.bf16.mxu1 %v6685_v49 }
 0xf01   :  { %3985 = vmatpush1.bf16.msra.mxu0 %v6688_v56  ;;  %4026 = vmatpush1.bf16.msra.mxu1 %v6691_v1 }
 0xf02   :  { %4103 = vmatprep.subr.bf16.mxu0 %v6694_v40  ;;  %4144 = vmatprep.subr.bf16.mxu1 %v6697_v2 }
 0xfb7   :  { %v3871_v9 = vpop.f32.mrb[64].mxu0  ;;  %v3912_v33 = vpop.f32.mrb[64].mxu1 }
 0xfb8   :  { %v3919_v13 = vadd.f32 %v3871_v9, %v2976_v22  ;;  %v3921_v6 = vadd.f32 %v3912_v33, %v3049_v45  ;;  %v3873_v26 = vpop.f32.mrb[65].mxu0  ;;  %v3914_v20 = vpop.f32.mrb[65].mxu1 }
 0xfb9   :  { %v3920_v10 = vadd.f32 %v3873_v26, %v2978_v12  ;;  %v3922_v4 = vadd.f32 %v3914_v20, %v3051_v57  ;;  %v3875_v16 = vpop.f32.mrb[66].mxu0  ;;  %v3916_v3 = vpop.f32.mrb[66].mxu1 }
 0xfba   :  { %v3876_v7 = vpop.f32.mrb[67].mxu0  ;;  %v3917_v17 = vpop.f32.mrb[67].mxu1 }
 0xfbb   :  { %v3924_v19 = vand.u32 2147483647, %v3920_v10  ;;  %v3923_v8 = vmin.f32 %v3920_v10, 0.0 }
 0xfbd   :  { %v3925_v5 = vsub.f32 0.0, %v3924_v19 }
 0xfbf   :  { %v3926_v28 = vmul.f32 1.442695, %v3925_v5 }
 0xfc1   :  { %5315 = vpow2.f32 %v3926_v28 }
 0xfcb   :  { %v5316_v23 = vpop.eup %5315 }
 0xfcc   :  { %v3928_v44 = vadd.f32 1.0, %v5316_v23 }
 0xfce   :  { %5317 = vlog2.f32 %v3928_v44 }
 0xfcf   :  { %5319 = vtanh.f32 %v3922_v4 }
 0xfd8   :  { %v5318_v41 = vpop.eup %5317 }
 0xfd9   :  { %v3930_v62 = vmul.f32 0.6931472, %v5318_v41  ;;  %v5320_v20 = vpop.eup %5319 }
 0xfdb   :  { %v3931_v22 = vsub.f32 %v3923_v8, %v3930_v62 }
 0xfdd   :  { %v3932_v45 = vadd.f32 %v3931_v22, %v6586_v11  ;;  %v4809_v11 = vmul.f32 -1.442695, %v3921_v6  ;;  %v3961_v6 = vstv %s4810_s16 }
 0xfdf   :  { %v6709_v9 = vmax.f32 %v3932_v45, %v3919_v13 }
 0xfe1   :  { %v3934_v12 = vsub.f32 %v3919_v13, %v6709_v9  ;;  %v3937_v57 = vsub.f32 %v3932_v45, %v6709_v9 }
 0xfe3   :  { %v3935_v33 = vmul.f32 1.442695, %v3934_v12  ;;  %v3938_v26 = vmul.f32 1.442695, %v3937_v57 }
 0xfe5   :  { %5321 = vpow2.f32 %v3935_v33  ;;  %v6973_v33 = vld [vmem:[#allocation37_spill] sm:$0xff] }
 0xfe6   :  { %5323 = vpow2.f32 %v3938_v26  ;;  %v3053_v26 = vadd.f32 %v6973_v33, %v6392_v21 }
 0xfef   :  { %v5322_v16 = vpop.eup %5321 }
 0xff0   :  { %v5324_v3 = vpop.eup %5323  ;;  %v3942_v7 = vmul.f32 %v5322_v16, %v5320_v20  ;;  %v6974_v20 = vld [vmem:[#allocation38_spill] sm:$0xff] }
 0xff1   :  { %v3944_v10 = vmul.f32 %v5324_v3, %v6592_v42  ;;  %v3940_v62 = vmul.f32 %v5324_v3, %v6594_v25  ;;  %v6975_v3 = vld [vmem:[#allocation48_spill] sm:$0xff] }
 0xff3   :  { %v6715_v17 = vadd.f32 %v5322_v16, %v3944_v10  ;;  %v6717_v19 = vadd.f32 %v3942_v7, %v3940_v62  ;;  %v2982_v16 = vadd.f32 %v6974_v20, %v6398_v15  ;;  %v6976_v7 = vld [vmem:[#allocation39_spill] sm:$0xff] }
 0xff4   :  { %v3055_v10 = vadd.f32 %v6976_v7, %v6975_v3 }
 0xff5   :  { %5325 = vrcp.f32 %v6715_v17 }
 0xff6   :  { %5327 = vpow2.f32 %v4809_v11 }
 0xfff   :  { %v5326_v13 = vpop.eup %5325 }
0x1000   :  { %v5328_v4 = vpop.eup %5327  ;;  %v3947_v5 = vmul.f32 %v5326_v13, %v6715_v17 }
0x1001   :  { %v3953_v23 = vadd.f32 1.0, %v5328_v4 }
0x1002   :  { %v3948_v28 = vsub.f32 2.0, %v3947_v5 }
0x1003   :  { %5329 = vrcp.f32 %v3953_v23 }
0x1004   :  { %v3949_v44 = vmul.f32 %v5326_v13, %v3948_v28 }
0x1006   :  { %v3956_v41 = vmul.f32 %v3949_v44, %v6717_v19 }
0x1008   :  { %5331 = vtanh.f32 %v3956_v41 }
0x100d   :  { %v5330_v42 = vpop.eup %5329 }
0x1012   :  { %v5332_v25 = vpop.eup %5331 }
0x1013   :  { %v3958_v8 = vmul.f32 %v5332_v25, %v5330_v42 }
0x1015   :  { %v3962_v22 = vmul.f32 %v3961_v6, %v3958_v8  ;;  %v3969_v45 = vpack.c.bf16 %v3958_v8, %v3958_v8 }
0x1017   :  { %4003 = vmatmul.mubr.bf16.vlgmr.msra.gmra.mrb[68].mxu0 %v3969_v45  ;;  %4044 = vmatmul.mubr.bf16.vlgmr.msra.gmra.mrb[68].mxu1 %v3969_v45  ;;  %v6723_v12 = vadd.f32 %v3962_v22, %v6600_v14  ;;  %v6972_v14 = vld [vmem:[#allocation36_spill] sm:$0xff] }
0x1018   :  { %4104 = vmatpush1.bf16.msra.mxu0 %v6602_v37  ;;  %4145 = vmatpush1.bf16.msra.mxu1 %v6605_v35  ;;  %v2980_v57 = vadd.f32 %v6972_v14, %v6390_v18 }
0x1019   :  { %4105 = vmatprep.subr.bf16.mxu0 %v6608_v48  ;;  %4146 = vmatprep.subr.bf16.mxu1 %v6611_v61 }
0x101a   :  { %4135 = vmatprep.mubr.bf16.mxu0 %v6946_v31  ;;  %4176 = vmatprep.mubr.bf16.mxu1 %v6946_v31 }
0x101c   :  { %4106 = vmatpush1.bf16.msra.mxu0 %v6616_v24  ;;  %4147 = vmatpush1.bf16.msra.mxu1 %v6619_v32 }
0x101d   :  { %4107 = vmatprep.subr.bf16.mxu0 %v6622_v46  ;;  %4148 = vmatprep.subr.bf16.mxu1 %v6625_v53 }
0x1020   :  { %4108 = vmatpush1.bf16.msra.mxu0 %v6628_v38  ;;  %4149 = vmatpush1.bf16.msra.mxu1 %v6631_v55 }
0x1021   :  { %4109 = vmatprep.subr.bf16.mxu0 %v6634_v50  ;;  %4150 = vmatprep.subr.bf16.mxu1 %v6637_v34 }
0x1024   :  { %4110 = vmatpush1.bf16.msra.mxu0 %v6640_v29  ;;  %4151 = vmatpush1.bf16.msra.mxu1 %v6643_v0 }
0x1025   :  { %4111 = vmatprep.subr.bf16.mxu0 %v6646_v52  ;;  %4152 = vmatprep.subr.bf16.mxu1 %v6649_v27 }
0x1028   :  { %4112 = vmatpush1.bf16.msra.mxu0 %v6652_v43  ;;  %4153 = vmatpush1.bf16.msra.mxu1 %v6655_v47 }
0x1029   :  { %4113 = vmatprep.subr.bf16.mxu0 %v6658_v36  ;;  %4154 = vmatprep.subr.bf16.mxu1 %v6661_v54 }
0x102c   :  { %4114 = vmatpush1.bf16.msra.mxu0 %v6664_v51  ;;  %4155 = vmatpush1.bf16.msra.mxu1 %v6667_v58 }
0x102d   :  { %4115 = vmatprep.subr.bf16.mxu0 %v6670_v59  ;;  %4156 = vmatprep.subr.bf16.mxu1 %v6673_v39 }
0x1030   :  { %4116 = vmatpush1.bf16.msra.mxu0 %v6676_v60  ;;  %4157 = vmatpush1.bf16.msra.mxu1 %v6679_v63 }
0x1031   :  { %4117 = vmatprep.subr.bf16.mxu0 %v6682_v30  ;;  %4158 = vmatprep.subr.bf16.mxu1 %v6685_v49 }
0x1034   :  { %4118 = vmatpush1.bf16.msra.mxu0 %v6688_v56  ;;  %4159 = vmatpush1.bf16.msra.mxu1 %v6691_v1 }
0x1035   :  { %4236 = vmatprep.subr.bf16.mxu0 %v6694_v40  ;;  %4277 = vmatprep.subr.bf16.mxu1 %v6697_v2 }
0x10ea   :  { %v4004_v62 = vpop.f32.mrb[68].mxu0  ;;  %v4045_v11 = vpop.f32.mrb[68].mxu1 }
0x10eb   :  { %v4052_v13 = vadd.f32 %v4004_v62, %v2980_v57  ;;  %v4054_v4 = vadd.f32 %v4045_v11, %v3053_v26  ;;  %v4006_v5 = vpop.f32.mrb[69].mxu0  ;;  %v4047_v40 = vpop.f32.mrb[69].mxu1 }
0x10ec   :  { %v4053_v28 = vadd.f32 %v4006_v5, %v2982_v16  ;;  %v4055_v2 = vadd.f32 %v4047_v40, %v3055_v10  ;;  %v4008_v23 = vpop.f32.mrb[70].mxu0  ;;  %v4049_v44 = vpop.f32.mrb[70].mxu1 }
0x10ed   :  { %v4009_v41 = vpop.f32.mrb[71].mxu0  ;;  %v4050_v42 = vpop.f32.mrb[71].mxu1 }
0x10ee   :  { %v4057_v25 = vand.u32 2147483647, %v4053_v28  ;;  %v4056_v33 = vmin.f32 %v4053_v28, 0.0 }
0x10f0   :  { %v4058_v6 = vsub.f32 0.0, %v4057_v25 }
0x10f2   :  { %v4059_v8 = vmul.f32 1.442695, %v4058_v6 }
0x10f4   :  { %5333 = vpow2.f32 %v4059_v8 }
0x10fe   :  { %v5334_v22 = vpop.eup %5333 }
0x10ff   :  { %v4061_v45 = vadd.f32 1.0, %v5334_v22 }
0x1101   :  { %5335 = vlog2.f32 %v4061_v45 }
0x1102   :  { %5337 = vtanh.f32 %v4055_v2 }
0x110b   :  { %v5336_v14 = vpop.eup %5335 }
0x110c   :  { %v4063_v20 = vmul.f32 0.6931472, %v5336_v14  ;;  %v5338_v5 = vpop.eup %5337 }
0x110e   :  { %v4064_v57 = vsub.f32 %v4056_v33, %v4063_v20 }
0x1110   :  { %v4065_v26 = vadd.f32 %v4064_v57, %v6709_v9  ;;  %v4811_v9 = vmul.f32 -1.442695, %v4054_v4  ;;  %v4094_v4 = vstv %s4812_s7 }
0x1112   :  { %v6768_v7 = vmax.f32 %v4065_v26, %v4052_v13 }
0x1114   :  { %v4067_v16 = vsub.f32 %v4052_v13, %v6768_v7  ;;  %v4070_v10 = vsub.f32 %v4065_v26, %v6768_v7 }
0x1116   :  { %v4068_v62 = vmul.f32 1.442695, %v4067_v16  ;;  %v4071_v11 = vmul.f32 1.442695, %v4070_v10 }
0x1118   :  { %5339 = vpow2.f32 %v4068_v62 }
0x1119   :  { %5341 = vpow2.f32 %v4071_v11 }
0x1122   :  { %v5340_v40 = vpop.eup %5339 }
0x1123   :  { %v5342_v23 = vpop.eup %5341  ;;  %v4075_v44 = vmul.f32 %v5340_v40, %v5338_v5 }
0x1124   :  { %v4077_v28 = vmul.f32 %v5342_v23, %v6715_v17  ;;  %v4073_v41 = vmul.f32 %v5342_v23, %v6717_v19 }
0x1126   :  { %v6774_v42 = vadd.f32 %v5340_v40, %v4077_v28  ;;  %v6776_v25 = vadd.f32 %v4075_v44, %v4073_v41 }
0x1128   :  { %5343 = vrcp.f32 %v6774_v42 }
0x1129   :  { %5345 = vpow2.f32 %v4811_v9 }
0x1132   :  { %v5344_v13 = vpop.eup %5343 }
0x1133   :  { %v5346_v2 = vpop.eup %5345  ;;  %v4080_v6 = vmul.f32 %v5344_v13, %v6774_v42 }
0x1134   :  { %v4086_v22 = vadd.f32 1.0, %v5346_v2 }
0x1135   :  { %v4081_v8 = vsub.f32 2.0, %v4080_v6 }
0x1136   :  { %5347 = vrcp.f32 %v4086_v22 }
0x1137   :  { %v4082_v45 = vmul.f32 %v5344_v13, %v4081_v8 }
0x1139   :  { %v4089_v14 = vmul.f32 %v4082_v45, %v6776_v25 }
0x113b   :  { %5349 = vtanh.f32 %v4089_v14 }
0x1140   :  { %v5348_v17 = vpop.eup %5347 }
0x1145   :  { %v5350_v19 = vpop.eup %5349 }
0x1146   :  { %v4091_v33 = vmul.f32 %v5350_v19, %v5348_v17  ;;  %v4227_v19 = vstv %s4814_s17 }
0x1148   :  { %v4095_v20 = vmul.f32 %v4094_v4, %v4091_v33  ;;  %v4102_v57 = vpack.c.bf16 %v4091_v33, %v4091_v33 }
0x114a   :  { %4136 = vmatmul.mubr.bf16.vlgmr.msra.gmra.mrb[72].mxu0 %v4102_v57  ;;  %4177 = vmatmul.mubr.bf16.vlgmr.msra.gmra.mrb[72].mxu1 %v4102_v57  ;;  %v6782_v26 = vadd.f32 %v4095_v20, %v6723_v12 }
0x114b   :  { %4237 = vmatpush1.bf16.msra.mxu0 %v6602_v37  ;;  %4278 = vmatpush1.bf16.msra.mxu1 %v6605_v35  ;;  %v6978_v37 = vld [vmem:[#allocation40_spill] sm:$0xff] }
0x114c   :  { %4238 = vmatprep.subr.bf16.mxu0 %v6608_v48  ;;  %4279 = vmatprep.subr.bf16.mxu1 %v6611_v61  ;;  %v2986_v35 = vadd.f32 %v6978_v37, %v6390_v18  ;;  %v6979_v48 = vld [vmem:[#allocation41_spill] sm:$0xff]  ;;  %v4371_v37 = vld [vmem:[%s6918_s6] sm:$0xff] }
0x114d   :  { %4268 = vmatprep.mubr.bf16.mxu0 %v6946_v31  ;;  %4309 = vmatprep.mubr.bf16.mxu1 %v6946_v31  ;;  %v6977_v31 = vmov 0.0|0.0   ;;  %v3059_v61 = vadd.f32 %v6979_v48, %v6392_v21 }
0x114f   :  { %4239 = vmatpush1.bf16.msra.mxu0 %v6616_v24  ;;  %4280 = vmatpush1.bf16.msra.mxu1 %v6619_v32  ;;  %v6980_v24 = vld [vmem:[#allocation42_spill] sm:$0xff] }
0x1150   :  { %4240 = vmatprep.subr.bf16.mxu0 %v6622_v46  ;;  %4281 = vmatprep.subr.bf16.mxu1 %v6625_v53  ;;  %v2988_v32 = vadd.f32 %v6980_v24, %v6398_v15  ;;  %v6981_v46 = vld [vmem:[#allocation43_spill] sm:$0xff] }
0x1151   :  { %v3061_v53 = vadd.f32 %v6981_v46, %v6975_v3  ;;  %v4376_v46 = vld [vmem:[%s6918_s6 + $0x28] sm:$0xff] }
0x1153   :  { %4241 = vmatpush1.bf16.msra.mxu0 %v6628_v38  ;;  %4282 = vmatpush1.bf16.msra.mxu1 %v6631_v55 }
0x1154   :  { %4242 = vmatprep.subr.bf16.mxu0 %v6634_v50  ;;  %4283 = vmatprep.subr.bf16.mxu1 %v6637_v34 }
0x1157   :  { %4243 = vmatpush1.bf16.msra.mxu0 %v6640_v29  ;;  %4284 = vmatpush1.bf16.msra.mxu1 %v6643_v0 }
0x1158   :  { %4244 = vmatprep.subr.bf16.mxu0 %v6646_v52  ;;  %4285 = vmatprep.subr.bf16.mxu1 %v6649_v27 }
0x115b   :  { %4245 = vmatpush1.bf16.msra.mxu0 %v6652_v43  ;;  %4286 = vmatpush1.bf16.msra.mxu1 %v6655_v47 }
0x115c   :  { %4246 = vmatprep.subr.bf16.mxu0 %v6658_v36  ;;  %4287 = vmatprep.subr.bf16.mxu1 %v6661_v54 }
0x115f   :  { %4247 = vmatpush1.bf16.msra.mxu0 %v6664_v51  ;;  %4288 = vmatpush1.bf16.msra.mxu1 %v6667_v58 }
0x1160   :  { %4248 = vmatprep.subr.bf16.mxu0 %v6670_v59  ;;  %4289 = vmatprep.subr.bf16.mxu1 %v6673_v39 }
0x1163   :  { %4249 = vmatpush1.bf16.msra.mxu0 %v6676_v60  ;;  %4290 = vmatpush1.bf16.msra.mxu1 %v6679_v63 }
0x1164   :  { %4250 = vmatprep.subr.bf16.mxu0 %v6682_v30  ;;  %4291 = vmatprep.subr.bf16.mxu1 %v6685_v49 }
0x1167   :  { %4251 = vmatpush1.bf16.msra.mxu0 %v6688_v56  ;;  %4292 = vmatpush1.bf16.msra.mxu1 %v6691_v1 }
0x1168   :  { %4870 = vmatprep.subr.bf16.mxu0 %v6977_v31 }
0x121d   :  { %v4137_v38 = vpop.f32.mrb[72].mxu0  ;;  %v4178_v55 = vpop.f32.mrb[72].mxu1 }
0x121e   :  { %v4185_v50 = vadd.f32 %v4137_v38, %v2986_v35  ;;  %v4187_v34 = vadd.f32 %v4178_v55, %v3059_v61  ;;  %v4139_v29 = vpop.f32.mrb[73].mxu0  ;;  %v4180_v0 = vpop.f32.mrb[73].mxu1  ;;  %v4372_v35 = vld [vmem:[%s6918_s6 + $0x8] sm:$0xff]  ;;  %v4373_v61 = vld [vmem:[%s6918_s6 + $0x10] sm:$0xff]  ;;  %v4378_v55 = vld [vmem:[%s6918_s6 + $0x38] sm:$0xff] }
0x121f   :  { %v4186_v52 = vadd.f32 %v4139_v29, %v2988_v32  ;;  %v4188_v27 = vadd.f32 %v4180_v0, %v3061_v53  ;;  %v4141_v43 = vpop.f32.mrb[74].mxu0  ;;  %v4182_v47 = vpop.f32.mrb[74].mxu1  ;;  %v4871_v48 = vpack.c.bf16 %v4372_v35, %v4371_v37  ;;  %v4375_v32 = vld [vmem:[%s6918_s6 + $0x20] sm:$0xff]  ;;  %v4377_v38 = vld [vmem:[%s6918_s6 + $0x30] sm:$0xff]  ;;  %v4380_v29 = vld [vmem:[%s6918_s6 + $0x48] sm:$0xff] }
0x1220   :  { %v4142_v36 = vpop.f32.mrb[75].mxu0  ;;  %v4183_v54 = vpop.f32.mrb[75].mxu1  ;;  %v4877_v53 = vpack.c.bf16 %v4376_v46, %v4375_v32  ;;  %v5539_v43 = vmov 0.0  }
0x1221   :  { %v4190_v51 = vand.u32 2147483647, %v4186_v52  ;;  %v4189_v30 = vmin.f32 %v4186_v52, 0.0  ;;  %v4381_v52 = vld [vmem:[%s6918_s6 + $0x50] sm:$0xff]  ;;  %v4383_v36 = vld [vmem:[%s6918_s6 + $0x60] sm:$0xff]  ;;  %v4384_v54 = vld [vmem:[%s6918_s6 + $0x68] sm:$0xff] }
0x1223   :  { %v4191_v58 = vsub.f32 0.0, %v4190_v51  ;;  %v4889_v51 = vpack.c.bf16 %v4384_v54, %v4383_v36  ;;  %v4817_v36 = vld [vmem:[#allocation9] ss:$0 sm:$0xff] }
0x1225   :  { %v4192_v59 = vmul.f32 1.442695, %v4191_v58  ;;  %v4385_v58 = vld [vmem:[%s6918_s6 + $0x70] sm:$0xff] }
0x1227   :  { %5351 = vpow2.f32 %v4192_v59  ;;  %v4386_v59 = vld [vmem:[%s6918_s6 + $0x78] sm:$0xff] }
0x1231   :  { %v5352_v39 = vpop.eup %5351 }
0x1232   :  { %v4194_v60 = vadd.f32 1.0, %v5352_v39  ;;  %v4892_v39 = vpack.c.bf16 %v4386_v59, %v4385_v58 }
0x1234   :  { %5353 = vlog2.f32 %v4194_v60  ;;  %v6982_v60 = vld [vmem:[#allocation44_spill] sm:$0xff] }
0x1235   :  { %5355 = vtanh.f32 %v4188_v27  ;;  %v4382_v27 = vld [vmem:[%s6918_s6 + $0x58] sm:$0xff] }
0x1236   :  { %v4886_v47 = vpack.c.bf16 %v4382_v27, %v4381_v52 }
0x123e   :  { %v5354_v63 = vpop.eup %5353 }
0x123f   :  { %v4196_v49 = vmul.f32 0.6931472, %v5354_v63  ;;  %v5356_v5 = vpop.eup %5355  ;;  %v2990_v63 = vadd.f32 %v6982_v60, %v6390_v18 }
0x1241   :  { %v4197_v56 = vsub.f32 %v4189_v30, %v4196_v49  ;;  %v6983_v30 = vld [vmem:[#allocation45_spill] sm:$0xff] }
0x1242   :  { %v3063_v49 = vadd.f32 %v6983_v30, %v6392_v21 }
0x1243   :  { %v4198_v1 = vadd.f32 %v4197_v56, %v6768_v7  ;;  %v4813_v7 = vmul.f32 -1.442695, %v4187_v34  ;;  %v4379_v34 = vld [vmem:[%s6918_s6 + $0x40] sm:$0xff] }
0x1244   :  { %v4883_v0 = vpack.c.bf16 %v4380_v29, %v4379_v34  ;;  %v6984_v56 = vld [vmem:[#allocation46_spill] sm:$0xff] }
0x1245   :  { %v6826_v12 = vmax.f32 %v4198_v1, %v4185_v50 }
0x1247   :  { %v4200_v16 = vsub.f32 %v4185_v50, %v6826_v12  ;;  %v4203_v10 = vsub.f32 %v4198_v1, %v6826_v12  ;;  %v4880_v50 = vpack.c.bf16 %v4378_v55, %v4377_v38  ;;  %v2992_v1 = vadd.f32 %v6984_v56, %v6398_v15 }
0x1249   :  { %v4201_v62 = vmul.f32 1.442695, %v4200_v16  ;;  %v4204_v11 = vmul.f32 1.442695, %v4203_v10  ;;  %v6985_v16 = vld [vmem:[#allocation47_spill] sm:$0xff] }
0x124a   :  { %v3065_v10 = vadd.f32 %v6985_v16, %v6975_v3 }
0x124b   :  { %5357 = vpow2.f32 %v4201_v62 }
0x124c   :  { %5359 = vpow2.f32 %v4204_v11 }
0x1255   :  { %v5358_v40 = vpop.eup %5357 }
0x1256   :  { %v5360_v23 = vpop.eup %5359  ;;  %v4208_v44 = vmul.f32 %v5358_v40, %v5356_v5 }
0x1257   :  { %v4210_v28 = vmul.f32 %v5360_v23, %v6774_v42  ;;  %v4206_v41 = vmul.f32 %v5360_v23, %v6776_v25 }
0x1259   :  { %v6832_v9 = vadd.f32 %v5358_v40, %v4210_v28  ;;  %v6834_v13 = vadd.f32 %v4208_v44, %v4206_v41 }
0x125b   :  { %5361 = vrcp.f32 %v6832_v9 }
0x125c   :  { %5363 = vpow2.f32 %v4813_v7 }
0x1265   :  { %v5362_v2 = vpop.eup %5361 }
0x1266   :  { %v5364_v6 = vpop.eup %5363  ;;  %v4213_v8 = vmul.f32 %v5362_v2, %v6832_v9 }
0x1267   :  { %v4219_v45 = vadd.f32 1.0, %v5364_v6 }
0x1268   :  { %v4214_v22 = vsub.f32 2.0, %v4213_v8 }
0x1269   :  { %5365 = vrcp.f32 %v4219_v45 }
0x126a   :  { %v4215_v14 = vmul.f32 %v5362_v2, %v4214_v22 }
0x126c   :  { %v4222_v17 = vmul.f32 %v4215_v14, %v6834_v13 }
0x126e   :  { %5367 = vtanh.f32 %v4222_v17 }
0x1273   :  { %v5366_v42 = vpop.eup %5365 }
0x1278   :  { %v5368_v25 = vpop.eup %5367 }
0x1279   :  { %v4224_v4 = vmul.f32 %v5368_v25, %v5366_v42 }
0x127b   :  { %v4235_v33 = vpack.c.bf16 %v4224_v4, %v4224_v4  ;;  %v4228_v20 = vmul.f32 %v4227_v19, %v4224_v4 }
0x127d   :  { %4269 = vmatmul.mubr.bf16.vlgmr.msra.gmra.mrb[76].mxu0 %v4235_v33  ;;  %4310 = vmatmul.mubr.bf16.vlgmr.msra.gmra.mrb[76].mxu1 %v4235_v33  ;;  %v6840_v57 = vadd.f32 %v4228_v20, %v6782_v26  ;;  %v4374_v26 = vld [vmem:[%s6918_s6 + $0x18] sm:$0xff]  ;;  %s4816_s6 = sld [smem:[#allocation10 + $0x7]] }
0x127e   :  { %4872 = vmatpush3.bf16.msra.mxu0 %v4871_v48  ;;  %v4874_v24 = vpack.c.bf16 %v4374_v26, %v4373_v61  ;;  %4867 = vmatprep.mubr.msk.f32.mxu0 %vm5538_vm0, %v5539_v43 }
0x127f   :  { %4873 = vmatprep.subr.bf16.mxu0 %v6977_v31 }
0x1282   :  { %4875 = vmatpush3.bf16.msra.mxu0 %v4874_v24 }
0x1283   :  { %4876 = vmatprep.subr.bf16.mxu0 %v6977_v31 }
0x1286   :  { %4878 = vmatpush3.bf16.msra.mxu0 %v4877_v53 }
0x1287   :  { %4879 = vmatprep.subr.bf16.mxu0 %v6977_v31 }
0x128a   :  { %4881 = vmatpush3.bf16.msra.mxu0 %v4880_v50 }
0x128b   :  { %4882 = vmatprep.subr.bf16.mxu0 %v6977_v31 }
0x128e   :  { %4884 = vmatpush3.bf16.msra.mxu0 %v4883_v0 }
0x128f   :  { %4885 = vmatprep.subr.bf16.mxu0 %v6977_v31 }
0x1292   :  { %4887 = vmatpush3.bf16.msra.mxu0 %v4886_v47 }
0x1293   :  { %4888 = vmatprep.subr.bf16.mxu0 %v6977_v31 }
0x1296   :  { %4890 = vmatpush3.bf16.msra.mxu0 %v4889_v51 }
0x1297   :  { %4891 = vmatprep.subr.bf16.mxu0 %v6977_v31 }
0x129a   :  { %4893 = vmatpush3.bf16.msra.mxu0 %v4892_v39 }
0x1350   :  { %v4270_v62 = vpop.f32.mrb[76].mxu0  ;;  %v4311_v11 = vpop.f32.mrb[76].mxu1 }
0x1351   :  { %v4318_v5 = vadd.f32 %v4270_v62, %v2990_v63  ;;  %v4320_v40 = vadd.f32 %v4311_v11, %v3063_v49  ;;  %v4272_v23 = vpop.f32.mrb[77].mxu0  ;;  %v4313_v44 = vpop.f32.mrb[77].mxu1 }
0x1352   :  { %v4319_v31 = vadd.f32 %v4272_v23, %v2992_v1  ;;  %v4321_v28 = vadd.f32 %v4313_v44, %v3065_v10  ;;  %v4274_v41 = vpop.f32.mrb[78].mxu0  ;;  %v4315_v7 = vpop.f32.mrb[78].mxu1 }
0x1353   :  { %v4275_v18 = vpop.f32.mrb[79].mxu0  ;;  %v4316_v2 = vpop.f32.mrb[79].mxu1  ;;  %v4815_v32 = vmul.f32 -1.442695, %v4320_v40 }
0x1354   :  { %v4323_v6 = vand.u32 2147483647, %v4319_v31  ;;  %v4322_v45 = vmin.f32 %v4319_v31, 0.0 }
0x1356   :  { %v4324_v21 = vsub.f32 0.0, %v4323_v6 }
0x1358   :  { %v4325_v8 = vmul.f32 1.442695, %v4324_v21 }
0x135a   :  { %5369 = vpow2.f32 %v4325_v8 }
0x1364   :  { %v5370_v15 = vpop.eup %5369 }
0x1365   :  { %v4327_v22 = vadd.f32 1.0, %v5370_v15 }
0x1367   :  { %5371 = vlog2.f32 %v4327_v22 }
0x1368   :  { %5373 = vtanh.f32 %v4321_v28 }
0x1371   :  { %v5372_v3 = vpop.eup %5371 }
0x1372   :  { %v4329_v14 = vmul.f32 0.6931472, %v5372_v3  ;;  %v5374_v37 = vpop.eup %5373 }
0x1374   :  { %v4330_v17 = vsub.f32 %v4322_v45, %v4329_v14 }
0x1376   :  { %v4331_v42 = vadd.f32 %v4330_v17, %v6826_v12 }
0x1378   :  { %v4332_v25 = vmax.f32 %v4331_v42, %v4318_v5 }
0x137a   :  { %v4333_v19 = vsub.f32 %v4318_v5, %v4332_v25  ;;  %v4336_v4 = vsub.f32 %v4331_v42, %v4332_v25 }
0x137c   :  { %v4334_v33 = vmul.f32 1.442695, %v4333_v19  ;;  %v4337_v20 = vmul.f32 1.442695, %v4336_v4 }
0x137e   :  { %5375 = vpow2.f32 %v4334_v33 }
0x137f   :  { %5377 = vpow2.f32 %v4337_v20 }
0x1388   :  { %v5376_v35 = vpop.eup %5375 }
0x1389   :  { %v5378_v48 = vpop.eup %5377  ;;  %v4341_v61 = vmul.f32 %v5376_v35, %v5374_v37 }
0x138a   :  { %v4343_v26 = vmul.f32 %v5378_v48, %v6832_v9  ;;  %v4339_v24 = vmul.f32 %v5378_v48, %v6834_v13  ;;  %v4360_v9 = vstv %s4816_s6 }
0x138c   :  { %v4342_v46 = vadd.f32 %v4341_v61, %v4339_v24  ;;  %v4344_v53 = vadd.f32 %v5376_v35, %v4343_v26 }
0x138e   :  { %5379 = vrcp.f32 %v4344_v53 }
0x138f   :  { %5381 = vpow2.f32 %v4815_v32 }
0x1398   :  { %v5380_v12 = vpop.eup %5379 }
0x1399   :  { %v5382_v38 = vpop.eup %5381  ;;  %v4346_v55 = vmul.f32 %v5380_v12, %v4344_v53 }
0x139a   :  { %v4352_v34 = vadd.f32 1.0, %v5382_v38 }
0x139b   :  { %v4347_v50 = vsub.f32 2.0, %v4346_v55 }
0x139c   :  { %5383 = vrcp.f32 %v4352_v34 }
0x139d   :  { %v4348_v29 = vmul.f32 %v5380_v12, %v4347_v50 }
0x139f   :  { %v4355_v0 = vmul.f32 %v4348_v29, %v4342_v46 }
0x13a1   :  { %5385 = vtanh.f32 %v4355_v0 }
0x13a6   :  { %v5384_v52 = vpop.eup %5383 }
0x13ab   :  { %v5386_v27 = vpop.eup %5385 }
0x13ac   :  { %v4357_v43 = vmul.f32 %v5386_v27, %v5384_v52 }
0x13ae   :  { %v4361_v13 = vmul.f32 %v4360_v9, %v4357_v43 }
0x13b0   :  { %v4362_v47 = vadd.f32 %v4361_v13, %v6840_v57 }
0x13b2   :  { %4868 = vmatmul.mubr.f32.vlgmr.msra.gmra.mrb[80].mxu0 %v4362_v47 }
0x1485   :  { %v4460_v54 = vpop.f32.mrb[80].mxu0 }
0x1486   :  { %v4461_v51 = vadd.f32 %v4817_v36, %v4460_v54  ;;  %v4869_v58 = vpop.f32.mrb[81].mxu0 }
0x1488   :  { %4465 = vst.msk [vmem:[%s6920_s8] sm:$0xff] %vm4464_vm1, %v4461_v51 }
0x1489   :  { %4470 = vsyncpa [#allocation11], 1 }
0x148a   :  { %4471 = vsyncpa [#allocation15], 1 }
0x148b   :  { %4472 = vsyncpa [#allocation18], 1 }
0x148c   :  { %4473 = vsyncpa [#allocation12], 1 }

</bundles_post_ra>
